<compile_context>
chip_gen: v7x
topology: tpu7x:2x2x1
jax: 0.10.0
libtpu: 0.0.40
codegen_flags: <defaults>
</compile_context>

<pallas_src>
import functools

import jax
import jax.numpy as jnp
from jax import lax
from jax.experimental import pallas as pl
from jax.experimental.pallas import tpu as pltpu

BN_EPS = 1e-5


# ----------------------------------------------------------------------------
# Helpers
# ----------------------------------------------------------------------------
@functools.lru_cache(maxsize=1)
def _vmem_limit_bytes():
    """Generation-aware scoped-VMEM limit (leave headroom for compiler scratch)."""
    try:
        cap = int(getattr(pltpu.get_tpu_info(), "vmem_capacity_bytes", 128 << 20))
    except Exception:
        cap = 64 << 20
    return int(min((cap * 3) // 4, 96 << 20))


def _pick_row_tile(H):
    """Row-tile height: prefer 8-row tiles (M = 8*W pixels per MXU dot)."""
    for th in (8, 4, 2):
        if H % th == 0:
            return th
    return H


def _bn_scale_bias(partial_stats, count, gamma, beta, eps):
    """Fold training-mode BN (batch statistics) into per-channel scale/bias."""
    s = jnp.sum(partial_stats[:, 0, :], axis=0)
    ss = jnp.sum(partial_stats[:, 1, :], axis=0)
    mean = s / count
    # TODO(synk): E[x^2]-E[x]^2 can cancel for very large N*H*W; use a
    # compensated / two-pass reduction for production batch sizes.
    var = jnp.maximum(ss / count - mean * mean, 0.0)   # biased var (PyTorch fwd)
    scale = gamma * lax.rsqrt(var + eps)
    bias = beta - mean * scale
    return scale.reshape(1, -1), bias.reshape(1, -1)


# ----------------------------------------------------------------------------
# Kernels
# ----------------------------------------------------------------------------
def _channel_stats_kernel(x_ref, stats_ref):
    # x_ref: (H*W, C) one image's pixels; stats_ref: (2, C) per-image (sum, sumsq)
    x = x_ref[...]
    stats_ref[0:1, :] = jnp.sum(x, axis=0, keepdims=True)
    stats_ref[1:2, :] = jnp.sum(x * x, axis=0, keepdims=True)


def _build_padded(xp_ref, src_f32, s_ref, b_ref, H, W, C):
    """Zero the 1-px border and write relu(src*scale+bias) (bf16) to the interior."""
    zrow = jnp.zeros((1, W + 2, C), xp_ref.dtype)
    xp_ref[0:1, :, :] = zrow
    xp_ref[H + 1:H + 2, :, :] = zrow
    zcol = jnp.zeros((H, 1, C), xp_ref.dtype)
    xp_ref[1:H + 1, 0:1, :] = zcol
    xp_ref[1:H + 1, W + 1:W + 2, :] = zcol
    scale = s_ref[...].reshape(1, 1, C)
    bias = b_ref[...].reshape(1, 1, C)
    h = jnp.maximum(src_f32 * scale + bias, 0.0)
    xp_ref[1:H + 1, 1:W + 1, :] = h.astype(xp_ref.dtype)


def _conv3x3_rowtile(xp_ref, w_ref, r0, TH, W, Cin, Cout):
    """3x3 conv over TH output rows as 9 accumulating MXU dots (no im2col scratch)."""
    xs = xp_ref[pl.ds(r0, TH + 2), :, :]             # (TH+2, W+2, Cin) bf16 window
    acc = jnp.zeros((TH * W, Cout), jnp.float32)
    for kh in range(3):
        for kw in range(3):
            lhs = xs[kh:kh + TH, kw:kw + W, :].reshape(TH * W, Cin)
            k = (kh * 3 + kw) * Cin
            acc += jnp.dot(lhs, w_ref[k:k + Cin, :],
                           preferred_element_type=jnp.float32)
    # TODO(synk): on v6e/v7x with Cin < 256, group 3 taps per dot (K = 3*Cin)
    # to better fill the 256-deep MXU.
    return acc


def _bn_relu_conv_stats_kernel(x_ref, s_ref, b_ref, w_ref, y_ref, stats_ref,
                               xp_ref, *, TH, H, W, Cin, Cout):
    # x_ref:  (H, W, Cin) f32   full image (t-invariant block, DMA'd once per n)
    # s/b:    (1, Cin) f32      folded BN1 scale / bias
    # w_ref:  (9*Cin, Cout) bf16 conv1 taps ordered (kh, kw, cin) x cout
    # y_ref:  (TH, W, Cout) bf16 conv1 output row tile
    # stats_ref: (2, Cout) f32  per-image (sum, sumsq) of conv output (resident)
    # xp_ref: (H+2, W+2, Cin) bf16 scratch: zero-padded relu(bn1(x))
    t = pl.program_id(1)

    @pl.when(t == 0)
    def _():
        _build_padded(xp_ref, x_ref[...], s_ref, b_ref, H, W, Cin)
        stats_ref[...] = jnp.zeros_like(stats_ref)

    r0 = pl.multiple_of(t * TH, TH)
    acc = _conv3x3_rowtile(xp_ref, w_ref, r0, TH, W, Cin, Cout)

    # Fused BN2 statistics, accumulated across the row tiles of this image.
    stats_ref[0:1, :] += jnp.sum(acc, axis=0, keepdims=True)
    stats_ref[1:2, :] += jnp.sum(acc * acc, axis=0, keepdims=True)

    y_ref[...] = acc.reshape(TH, W, Cout).astype(y_ref.dtype)


def _bn_relu_conv_add_kernel(y1_ref, s_ref, b_ref, w_ref, res_ref, out_ref,
                             xp_ref, *, TH, H, W, C):
    # y1_ref: (H, W, C) bf16    conv1 output, full image (t-invariant block)
    # s/b:    (1, C) f32        folded BN2 scale / bias
    # w_ref:  (9*C, C) bf16     conv2 taps
    # res_ref:(TH, W, C) f32    residual row tile (original x)
    # out_ref:(TH, W, C) f32    block output row tile (aliased with residual HBM)
    # xp_ref: (H+2, W+2, C) bf16 scratch: zero-padded relu(bn2(y1))
    t = pl.program_id(1)

    @pl.when(t == 0)
    def _():
        # TODO(synk): F.dropout between relu2 and conv2 (droprate > 0) is not
        # implemented (reference config uses droprate = 0).
        _build_padded(xp_ref, y1_ref[...].astype(jnp.float32), s_ref, b_ref,
                      H, W, C)

    r0 = pl.multiple_of(t * TH, TH)
    acc = _conv3x3_rowtile(xp_ref, w_ref, r0, TH, W, C, C)
    out_ref[...] = res_ref[...] + acc.reshape(TH, W, C)


# ----------------------------------------------------------------------------
# Wrapper
# ----------------------------------------------------------------------------
def basic_block_forward(x_nchw, w1_oihw, w2_oihw, gamma1, beta1, gamma2, beta2,
                        eps=BN_EPS):
    """FreezeOut BasicBlock forward (equalInOut, stride=1, droprate=0, active)."""
    N, C, H, W = x_nchw.shape
    Cout = w1_oihw.shape[0]
    # Only the equalInOut (in_planes == out_planes, stride=1) path is fused.
    assert Cout == C and w1_oihw.shape == (C, C, 3, 3)
    assert w2_oihw.shape == (Cout, Cout, 3, 3)
    # TODO(synk): stride > 1 and the 1x1 convShortcut (in_planes != out_planes)
    # downsample branch are not implemented.
    # TODO(synk): running_mean / running_var updates (BN buffer side effects)
    # are not modeled; only the forward output is produced.

    TH = _pick_row_tile(H)
    n_t = H // TH
    vmem = _vmem_limit_bytes()
    params1 = pltpu.CompilerParams(dimension_semantics=("parallel",),
                                   vmem_limit_bytes=vmem)
    params2 = pltpu.CompilerParams(dimension_semantics=("parallel", "arbitrary"),
                                   vmem_limit_bytes=vmem)

    x_nhwc = jnp.transpose(x_nchw, (0, 2, 3, 1)).astype(jnp.float32)
    # TODO(synk): keep activations NHWC across blocks to remove this transpose
    # (and the inverse one on the output) — each is an extra HBM pass.

    # ---- pass 1: per-channel stats of x (training-mode BN1) -----------------
    stats_x = pl.pallas_call(
        _channel_stats_kernel,
        grid=(N,),
        in_specs=[pl.BlockSpec((None, H * W, C), lambda n: (n, 0, 0))],
        out_specs=pl.BlockSpec((None, 2, C), lambda n: (n, 0, 0)),
        out_shape=jax.ShapeDtypeStruct((N, 2, C), jnp.float32),
        compiler_params=params1,
    )(x_nhwc.reshape(N, H * W, C))
    scale1, bias1 = _bn_scale_bias(stats_x, N * H * W, gamma1, beta1, eps)

    # Conv taps as (kh, kw, cin) x cout matrices, bf16 for the MXU (prepped once).
    w1_mat = jnp.transpose(w1_oihw, (2, 3, 1, 0)).reshape(9 * C, Cout)
    w1_mat = w1_mat.astype(jnp.bfloat16)
    w2_mat = jnp.transpose(w2_oihw, (2, 3, 1, 0)).reshape(9 * Cout, Cout)
    w2_mat = w2_mat.astype(jnp.bfloat16)

    # ---- pass 2: relu(bn1(x)) -> conv1, fused with BN2 stat accumulation ----
    kernel2 = functools.partial(_bn_relu_conv_stats_kernel,
                                TH=TH, H=H, W=W, Cin=C, Cout=Cout)
    y1, stats_y1 = pl.pallas_call(
        kernel2,
        grid=(N, n_t),
        in_specs=[
            pl.BlockSpec((None, H, W, C), lambda n, t: (n, 0, 0, 0)),
            pl.BlockSpec((1, C), lambda n, t: (0, 0)),
            pl.BlockSpec((1, C), lambda n, t: (0, 0)),
            pl.BlockSpec((9 * C, Cout), lambda n, t: (0, 0)),
        ],
        out_specs=(
            pl.BlockSpec((None, TH, W, Cout), lambda n, t: (n, t, 0, 0)),
            pl.BlockSpec((None, 2, Cout), lambda n, t: (n, 0, 0)),
        ),
        out_shape=(
            jax.ShapeDtypeStruct((N, H, W, Cout), jnp.bfloat16),   # y1 in bf16
            jax.ShapeDtypeStruct((N, 2, Cout), jnp.float32),
        ),
        scratch_shapes=[pltpu.VMEM((H + 2, W + 2, C), jnp.bfloat16)],
        compiler_params=params2,
    )(x_nhwc, scale1, bias1, w1_mat)
    scale2, bias2 = _bn_scale_bias(stats_y1, N * H * W, gamma2, beta2, eps)

    # ---- pass 3: relu(bn2(y1)) -> conv2 -> residual add ---------------------
    kernel3 = functools.partial(_bn_relu_conv_add_kernel,
                                TH=TH, H=H, W=W, C=Cout)
    out_nhwc = pl.pallas_call(
        kernel3,
        grid=(N, n_t),
        in_specs=[
            pl.BlockSpec((None, H, W, Cout), lambda n, t: (n, 0, 0, 0)),
            pl.BlockSpec((1, Cout), lambda n, t: (0, 0)),
            pl.BlockSpec((1, Cout), lambda n, t: (0, 0)),
            pl.BlockSpec((9 * Cout, Cout), lambda n, t: (0, 0)),
            pl.BlockSpec((None, TH, W, Cout), lambda n, t: (n, t, 0, 0)),
        ],
        out_specs=pl.BlockSpec((None, TH, W, Cout), lambda n, t: (n, t, 0, 0)),
        out_shape=jax.ShapeDtypeStruct((N, H, W, Cout), jnp.float32),
        scratch_shapes=[pltpu.VMEM((H + 2, W + 2, Cout), jnp.bfloat16)],
        input_output_aliases={4: 0},            # residual buffer -> output buffer
        compiler_params=params2,
    )(y1, scale2, bias2, w2_mat, x_nhwc)

    return jnp.transpose(out_nhwc, (0, 3, 1, 2))


# ----------------------------------------------------------------------------
# Pure-JAX reference (checking only)
# ----------------------------------------------------------------------------
def _reference(x, w1, w2, g1, b1, g2, b2, eps=BN_EPS):
    def bn_relu(t, g, b):
        m = jnp.mean(t, axis=(0, 2, 3), keepdims=True)
        v = jnp.mean(jnp.square(t - m), axis=(0, 2, 3), keepdims=True)
        t = (t - m) * lax.rsqrt(v + eps)
        t = t * g.reshape(1, -1, 1, 1) + b.reshape(1, -1, 1, 1)
        return jnp.maximum(t, 0.0)

    def conv3x3(t, w):
        return lax.conv_general_dilated(
            t, w, window_strides=(1, 1), padding="SAME",
            dimension_numbers=("NCHW", "OIHW", "NCHW"))

    h1 = bn_relu(x, g1, b1)
    y1 = conv3x3(h1, w1)
    h2 = bn_relu(y1, g2, b2)
    y2 = conv3x3(h2, w2)
    return x + y2


if __name__ == "__main__":
    key = jax.random.PRNGKey(0)
    kx, kw1, kw2, kg1, kb1, kg2, kb2 = jax.random.split(key, 7)

    # equalInOut BasicBlock: in_planes == out_planes, stride=1, droprate=0.
    N, C, H, W = 2, 32, 16, 16

    x = jax.random.normal(kx, (N, C, H, W), dtype=jnp.float32)

    fan_in = C * 3 * 3
    bound = 1.0 / (fan_in ** 0.5)
    w1 = jax.random.uniform(kw1, (C, C, 3, 3), jnp.float32,
                            minval=-bound, maxval=bound)
    w2 = jax.random.uniform(kw2, (C, C, 3, 3), jnp.float32,
                            minval=-bound, maxval=bound)

    gamma1 = 1.0 + 0.1 * jax.random.normal(kg1, (C,), jnp.float32)
    beta1 = 0.1 * jax.random.normal(kb1, (C,), jnp.float32)
    gamma2 = 1.0 + 0.1 * jax.random.normal(kg2, (C,), jnp.float32)
    beta2 = 0.1 * jax.random.normal(kb2, (C,), jnp.float32)

    fwd = jax.jit(basic_block_forward)
    out = fwd(x, w1, w2, gamma1, beta1, gamma2, beta2)
    jax.block_until_ready(out)

    ref = _reference(x, w1, w2, gamma1, beta1, gamma2, beta2)
    assert out.shape == (N, C, H, W)
    err = float(jnp.max(jnp.abs(out - ref)))
    # bf16 MXU operands + bf16 y1 round trip -> compare at ~1e-2 level.
    assert jnp.allclose(out, ref, atol=5e-2, rtol=5e-2), (
        "mismatch vs reference: max abs err = %e" % err)

    print("KERNEL_OK")
</pallas_src>

<mosaic_0001>
module attributes {stable_mosaic.version = 11 : i64} {
  func.func @_channel_stats_kernel(%arg0: i32, %arg1: memref<1x256x32xf32, #tpu.memory_space<vmem>>, %arg2: memref<1x2x32xf32, #tpu.memory_space<vmem>>) attributes {dimension_semantics = [#tpu.dimension_semantics<parallel>], iteration_bounds = array<i64: 2>, scalar_prefetch = 0 : i64, scratch_operands = 0 : i64, tpu.core_type = #tpu.core_type<tc>, window_params = [{transform_indices = @transform_0, window_bounds = array<i64: 1, 256, 32>}, {transform_indices = @transform_1, window_bounds = array<i64: 1, 2, 32>}]} {
    %c0 = arith.constant 0 : index
    %c0_0 = arith.constant 0 : index
    %c0_1 = arith.constant 0 : index
    %0 = vector.load %arg1[%c0, %c0_0, %c0_1] : memref<1x256x32xf32, #tpu.memory_space<vmem>>, vector<1x256x32xf32>
    %1 = vector.shape_cast %0 : vector<1x256x32xf32> to vector<256x32xf32>
    %cst = arith.constant dense<0.000000e+00> : vector<32xf32>
    %2 = vector.multi_reduction <add>, %1, %cst [0] : vector<256x32xf32> to vector<32xf32>
    %3 = vector.shape_cast %2 : vector<32xf32> to vector<1x32xf32>
    %c0_2 = arith.constant 0 : index
    %c0_3 = arith.constant 0 : index
    %c0_4 = arith.constant 0 : index
    %4 = vector.load %arg2[%c0_2, %c0_3, %c0_4] : memref<1x2x32xf32, #tpu.memory_space<vmem>>, vector<1x1x32xf32>
    %5 = vector.shape_cast %4 : vector<1x1x32xf32> to vector<1x32xf32>
    %6 = vector.shape_cast %3 : vector<1x32xf32> to vector<1x1x32xf32>
    tpu.vector_store %arg2[%c0_2, %c0_3, %c0_4], %6 {strides = array<i32>} : memref<1x2x32xf32, #tpu.memory_space<vmem>>, vector<1x1x32xf32>,
    %7 = arith.mulf %1, %1 : vector<256x32xf32>
    %cst_5 = arith.constant dense<0.000000e+00> : vector<32xf32>
    %8 = vector.multi_reduction <add>, %7, %cst_5 [0] : vector<256x32xf32> to vector<32xf32>
    %9 = vector.shape_cast %8 : vector<32xf32> to vector<1x32xf32>
    %c0_6 = arith.constant 0 : index
    %c1 = arith.constant 1 : index
    %c0_7 = arith.constant 0 : index
    %10 = vector.load %arg2[%c0_6, %c1, %c0_7] : memref<1x2x32xf32, #tpu.memory_space<vmem>>, vector<1x1x32xf32>
    %11 = vector.shape_cast %10 : vector<1x1x32xf32> to vector<1x32xf32>
    %12 = vector.shape_cast %9 : vector<1x32xf32> to vector<1x1x32xf32>
    tpu.vector_store %arg2[%c0_6, %c1, %c0_7], %12 {strides = array<i32>} : memref<1x2x32xf32, #tpu.memory_space<vmem>>, vector<1x1x32xf32>,
    return
  }
  func.func @transform_0(%arg0: i32) -> (i32, i32, i32) {
    %c0_i32 = arith.constant 0 : i32
    %c0_i32_0 = arith.constant 0 : i32
    %c0_i32_1 = arith.constant 0 : i32
    return %arg0, %c0_i32, %c0_i32_0 : i32, i32, i32
  }
  func.func @transform_1(%arg0: i32) -> (i32, i32, i32) {
    %c0_i32 = arith.constant 0 : i32
    %c0_i32_0 = arith.constant 0 : i32
    %c0_i32_1 = arith.constant 0 : i32
    return %arg0, %c0_i32, %c0_i32_0 : i32, i32, i32
  }
}

module attributes {stable_mosaic.version = 11 : i64} {
  func.func @_bn_relu_conv_stats_kernel(%arg0: i32, %arg1: i32, %arg2: memref<1x16x16x32xf32, #tpu.memory_space<vmem>>, %arg3: memref<1x32xf32, #tpu.memory_space<vmem>>, %arg4: memref<1x32xf32, #tpu.memory_space<vmem>>, %arg5: memref<288x32xbf16, #tpu.memory_space<vmem>>, %arg6: memref<1x8x16x32xbf16, #tpu.memory_space<vmem>>, %arg7: memref<1x2x32xf32, #tpu.memory_space<vmem>>, %arg8: memref<18x18x32xbf16, #tpu.memory_space<vmem>>) attributes {dimension_semantics = [#tpu.dimension_semantics<parallel>, #tpu.dimension_semantics<arbitrary>], iteration_bounds = array<i64: 2, 2>, scalar_prefetch = 0 : i64, scratch_operands = 1 : i64, tpu.core_type = #tpu.core_type<tc>, window_params = [{transform_indices = @transform_0, window_bounds = array<i64: 1, 16, 16, 32>}, {pipeline_mode = #tpu.pipeline_mode<synchronous>, transform_indices = @transform_1, window_bounds = array<i64: 1, 32>}, {pipeline_mode = #tpu.pipeline_mode<synchronous>, transform_indices = @transform_2, window_bounds = array<i64: 1, 32>}, {pipeline_mode = #tpu.pipeline_mode<synchronous>, transform_indices = @transform_3, window_bounds = array<i64: 288, 32>}, {transform_indices = @transform_4, window_bounds = array<i64: 1, 8, 16, 32>}, {transform_indices = @transform_5, window_bounds = array<i64: 1, 2, 32>}]} {
    %c0_i32 = arith.constant 0 : i32
    %0 = arith.cmpi eq, %arg1, %c0_i32 : i32
    %1 = arith.extui %0 : i1 to i32
    %c0_i32_0 = arith.constant 0 : i32
    %2 = arith.cmpi ne, %1, %c0_i32_0 : i32
    scf.if %2 {
      %c0_38 = arith.constant 0 : index
      %c0_39 = arith.constant 0 : index
      %c0_40 = arith.constant 0 : index
      %c0_41 = arith.constant 0 : index
      %75 = vector.load %arg2[%c0_38, %c0_39, %c0_40, %c0_41] : memref<1x16x16x32xf32, #tpu.memory_space<vmem>>, vector<1x16x16x32xf32>
      %76 = vector.shape_cast %75 : vector<1x16x16x32xf32> to vector<16x16x32xf32>
      %cst_42 = arith.constant 0.000000e+00 : bf16
      %77 = vector.broadcast %cst_42 : bf16 to vector<1x18x32xbf16>
      %c0_43 = arith.constant 0 : index
      %c0_44 = arith.constant 0 : index
      %c0_45 = arith.constant 0 : index
      %78 = vector.load %arg8[%c0_43, %c0_44, %c0_45] : memref<18x18x32xbf16, #tpu.memory_space<vmem>>, vector<1x18x32xbf16>
      tpu.vector_store %arg8[%c0_43, %c0_44, %c0_45], %77 {strides = array<i32>} : memref<18x18x32xbf16, #tpu.memory_space<vmem>>, vector<1x18x32xbf16>,
      %c17 = arith.constant 17 : index
      %c0_46 = arith.constant 0 : index
      %c0_47 = arith.constant 0 : index
      %79 = vector.load %arg8[%c17, %c0_46, %c0_47] : memref<18x18x32xbf16, #tpu.memory_space<vmem>>, vector<1x18x32xbf16>
      tpu.vector_store %arg8[%c17, %c0_46, %c0_47], %77 {strides = array<i32>} : memref<18x18x32xbf16, #tpu.memory_space<vmem>>, vector<1x18x32xbf16>,
      %cst_48 = arith.constant 0.000000e+00 : bf16
      %80 = vector.broadcast %cst_48 : bf16 to vector<16x1x32xbf16>
      %c1_49 = arith.constant 1 : index
      %c0_50 = arith.constant 0 : index
      %c0_51 = arith.constant 0 : index
      %81 = vector.load %arg8[%c1_49, %c0_50, %c0_51] : memref<18x18x32xbf16, #tpu.memory_space<vmem>>, vector<16x1x32xbf16>
      tpu.vector_store %arg8[%c1_49, %c0_50, %c0_51], %80 {strides = array<i32>} : memref<18x18x32xbf16, #tpu.memory_space<vmem>>, vector<16x1x32xbf16>,
      %c1_52 = arith.constant 1 : index
      %c17_53 = arith.constant 17 : index
      %c0_54 = arith.constant 0 : index
      %82 = vector.load %arg8[%c1_52, %c17_53, %c0_54] : memref<18x18x32xbf16, #tpu.memory_space<vmem>>, vector<16x1x32xbf16>
      tpu.vector_store %arg8[%c1_52, %c17_53, %c0_54], %80 {strides = array<i32>} : memref<18x18x32xbf16, #tpu.memory_space<vmem>>, vector<16x1x32xbf16>,
      %c0_55 = arith.constant 0 : index
      %c0_56 = arith.constant 0 : index
      %83 = vector.load %arg3[%c0_55, %c0_56] : memref<1x32xf32, #tpu.memory_space<vmem>>, vector<1x32xf32>
      %84 = vector.shape_cast %83 : vector<1x32xf32> to vector<1x1x32xf32>
      %c0_57 = arith.constant 0 : index
      %c0_58 = arith.constant 0 : index
      %85 = vector.load %arg4[%c0_57, %c0_58] : memref<1x32xf32, #tpu.memory_space<vmem>>, vector<1x32xf32>
      %86 = vector.shape_cast %85 : vector<1x32xf32> to vector<1x1x32xf32>
      %87 = vector.broadcast %84 : vector<1x1x32xf32> to vector<16x16x32xf32>
      %88 = arith.mulf %76, %87 : vector<16x16x32xf32>
      %89 = vector.broadcast %86 : vector<1x1x32xf32> to vector<16x16x32xf32>
      %90 = arith.addf %88, %89 : vector<16x16x32xf32>
      %cst_59 = arith.constant 0.000000e+00 : f32
      %91 = vector.broadcast %cst_59 : f32 to vector<16x16x32xf32>
      %92 = arith.maximumf %90, %91 : vector<16x16x32xf32>
      %93 = arith.truncf %92 : vector<16x16x32xf32> to vector<16x16x32xbf16>
      %c1_60 = arith.constant 1 : index
      %c1_61 = arith.constant 1 : index
      %c0_62 = arith.constant 0 : index
      %94 = vector.load %arg8[%c1_60, %c1_61, %c0_62] : memref<18x18x32xbf16, #tpu.memory_space<vmem>>, vector<16x16x32xbf16>
      tpu.vector_store %arg8[%c1_60, %c1_61, %c0_62], %93 {strides = array<i32>} : memref<18x18x32xbf16, #tpu.memory_space<vmem>>, vector<16x16x32xbf16>,
      %cst_63 = arith.constant 0.000000e+00 : f32
      %95 = vector.broadcast %cst_63 : f32 to vector<2x32xf32>
      %c0_64 = arith.constant 0 : index
      %c0_65 = arith.constant 0 : index
      %c0_66 = arith.constant 0 : index
      %96 = vector.load %arg7[%c0_64, %c0_65, %c0_66] : memref<1x2x32xf32, #tpu.memory_space<vmem>>, vector<1x2x32xf32>
      %97 = vector.shape_cast %96 : vector<1x2x32xf32> to vector<2x32xf32>
      %98 = vector.shape_cast %95 : vector<2x32xf32> to vector<1x2x32xf32>
      tpu.vector_store %arg7[%c0_64, %c0_65, %c0_66], %98 {strides = array<i32>} : memref<1x2x32xf32, #tpu.memory_space<vmem>>, vector<1x2x32xf32>,
    } else {
    }
    %c8_i32 = arith.constant 8 : i32
    %3 = arith.muli %arg1, %c8_i32 : i32
    %4 = tpu.assume_multiple %3, 8 : i32
    %5 = arith.index_cast %4 : i32 to index
    %c0 = arith.constant 0 : index
    %c0_1 = arith.constant 0 : index
    %6 = vector.load %arg8[%5, %c0, %c0_1] : memref<18x18x32xbf16, #tpu.memory_space<vmem>>, vector<10x18x32xbf16>
    %cst = arith.constant 0.000000e+00 : f32
    %7 = vector.broadcast %cst : f32 to vector<128x32xf32>
    %8 = vector.extract_strided_slice %6 {offsets = [0, 0, 0], sizes = [8, 16, 32], strides = [1, 1, 1]} : vector<10x18x32xbf16> to vector<8x16x32xbf16>
    %9 = vector.shape_cast %8 : vector<8x16x32xbf16> to vector<128x32xbf16>
    %c0_2 = arith.constant 0 : index
    %c0_3 = arith.constant 0 : index
    %10 = vector.load %arg5[%c0_2, %c0_3] : memref<288x32xbf16, #tpu.memory_space<vmem>>, vector<32x32xbf16>
    %cst_4 = arith.constant dense<0.000000e+00> : vector<128x32xf32>
    %11 = tpu.matmul %9, %10, %cst_4 {dimension_numbers = #tpu.dot_dimension_numbers<[1], [0], [0], [1], [0, 0, 1, 1], [], []>} : vector<128x32xbf16>, vector<32x32xbf16>, vector<128x32xf32> -> vector<128x32xf32>
    %12 = arith.addf %7, %11 : vector<128x32xf32>
    %13 = vector.extract_strided_slice %6 {offsets = [0, 1, 0], sizes = [8, 16, 32], strides = [1, 1, 1]} : vector<10x18x32xbf16> to vector<8x16x32xbf16>
    %14 = vector.shape_cast %13 : vector<8x16x32xbf16> to vector<128x32xbf16>
    %c32 = arith.constant 32 : index
    %c0_5 = arith.constant 0 : index
    %15 = vector.load %arg5[%c32, %c0_5] : memref<288x32xbf16, #tpu.memory_space<vmem>>, vector<32x32xbf16>
    %cst_6 = arith.constant dense<0.000000e+00> : vector<128x32xf32>
    %16 = tpu.matmul %14, %15, %cst_6 {dimension_numbers = #tpu.dot_dimension_numbers<[1], [0], [0], [1], [0, 0, 1, 1], [], []>} : vector<128x32xbf16>, vector<32x32xbf16>, vector<128x32xf32> -> vector<128x32xf32>
    %17 = arith.addf %12, %16 : vector<128x32xf32>
    %18 = vector.extract_strided_slice %6 {offsets = [0, 2, 0], sizes = [8, 16, 32], strides = [1, 1, 1]} : vector<10x18x32xbf16> to vector<8x16x32xbf16>
    %19 = vector.shape_cast %18 : vector<8x16x32xbf16> to vector<128x32xbf16>
    %c64 = arith.constant 64 : index
    %c0_7 = arith.constant 0 : index
    %20 = vector.load %arg5[%c64, %c0_7] : memref<288x32xbf16, #tpu.memory_space<vmem>>, vector<32x32xbf16>
    %cst_8 = arith.constant dense<0.000000e+00> : vector<128x32xf32>
    %21 = tpu.matmul %19, %20, %cst_8 {dimension_numbers = #tpu.dot_dimension_numbers<[1], [0], [0], [1], [0, 0, 1, 1], [], []>} : vector<128x32xbf16>, vector<32x32xbf16>, vector<128x32xf32> -> vector<128x32xf32>
    %22 = arith.addf %17, %21 : vector<128x32xf32>
    %23 = vector.extract_strided_slice %6 {offsets = [1, 0, 0], sizes = [8, 16, 32], strides = [1, 1, 1]} : vector<10x18x32xbf16> to vector<8x16x32xbf16>
    %24 = vector.shape_cast %23 : vector<8x16x32xbf16> to vector<128x32xbf16>
    %c96 = arith.constant 96 : index
    %c0_9 = arith.constant 0 : index
    %25 = vector.load %arg5[%c96, %c0_9] : memref<288x32xbf16, #tpu.memory_space<vmem>>, vector<32x32xbf16>
    %cst_10 = arith.constant dense<0.000000e+00> : vector<128x32xf32>
    %26 = tpu.matmul %24, %25, %cst_10 {dimension_numbers = #tpu.dot_dimension_numbers<[1], [0], [0], [1], [0, 0, 1, 1], [], []>} : vector<128x32xbf16>, vector<32x32xbf16>, vector<128x32xf32> -> vector<128x32xf32>
    %27 = arith.addf %22, %26 : vector<128x32xf32>
    %28 = vector.extract_strided_slice %6 {offsets = [1, 1, 0], sizes = [8, 16, 32], strides = [1, 1, 1]} : vector<10x18x32xbf16> to vector<8x16x32xbf16>
    %29 = vector.shape_cast %28 : vector<8x16x32xbf16> to vector<128x32xbf16>
    %c128 = arith.constant 128 : index
    %c0_11 = arith.constant 0 : index
    %30 = vector.load %arg5[%c128, %c0_11] : memref<288x32xbf16, #tpu.memory_space<vmem>>, vector<32x32xbf16>
    %cst_12 = arith.constant dense<0.000000e+00> : vector<128x32xf32>
    %31 = tpu.matmul %29, %30, %cst_12 {dimension_numbers = #tpu.dot_dimension_numbers<[1], [0], [0], [1], [0, 0, 1, 1], [], []>} : vector<128x32xbf16>, vector<32x32xbf16>, vector<128x32xf32> -> vector<128x32xf32>
    %32 = arith.addf %27, %31 : vector<128x32xf32>
    %33 = vector.extract_strided_slice %6 {offsets = [1, 2, 0], sizes = [8, 16, 32], strides = [1, 1, 1]} : vector<10x18x32xbf16> to vector<8x16x32xbf16>
    %34 = vector.shape_cast %33 : vector<8x16x32xbf16> to vector<128x32xbf16>
    %c160 = arith.constant 160 : index
    %c0_13 = arith.constant 0 : index
    %35 = vector.load %arg5[%c160, %c0_13] : memref<288x32xbf16, #tpu.memory_space<vmem>>, vector<32x32xbf16>
    %cst_14 = arith.constant dense<0.000000e+00> : vector<128x32xf32>
    %36 = tpu.matmul %34, %35, %cst_14 {dimension_numbers = #tpu.dot_dimension_numbers<[1], [0], [0], [1], [0, 0, 1, 1], [], []>} : vector<128x32xbf16>, vector<32x32xbf16>, vector<128x32xf32> -> vector<128x32xf32>
    %37 = arith.addf %32, %36 : vector<128x32xf32>
    %38 = vector.extract_strided_slice %6 {offsets = [2, 0, 0], sizes = [8, 16, 32], strides = [1, 1, 1]} : vector<10x18x32xbf16> to vector<8x16x32xbf16>
    %39 = vector.shape_cast %38 : vector<8x16x32xbf16> to vector<128x32xbf16>
    %c192 = arith.constant 192 : index
    %c0_15 = arith.constant 0 : index
    %40 = vector.load %arg5[%c192, %c0_15] : memref<288x32xbf16, #tpu.memory_space<vmem>>, vector<32x32xbf16>
    %cst_16 = arith.constant dense<0.000000e+00> : vector<128x32xf32>
    %41 = tpu.matmul %39, %40, %cst_16 {dimension_numbers = #tpu.dot_dimension_numbers<[1], [0], [0], [1], [0, 0, 1, 1], [], []>} : vector<128x32xbf16>, vector<32x32xbf16>, vector<128x32xf32> -> vector<128x32xf32>
    %42 = arith.addf %37, %41 : vector<128x32xf32>
    %43 = vector.extract_strided_slice %6 {offsets = [2, 1, 0], sizes = [8, 16, 32], strides = [1, 1, 1]} : vector<10x18x32xbf16> to vector<8x16x32xbf16>
    %44 = vector.shape_cast %43 : vector<8x16x32xbf16> to vector<128x32xbf16>
    %c224 = arith.constant 224 : index
    %c0_17 = arith.constant 0 : index
    %45 = vector.load %arg5[%c224, %c0_17] : memref<288x32xbf16, #tpu.memory_space<vmem>>, vector<32x32xbf16>
    %cst_18 = arith.constant dense<0.000000e+00> : vector<128x32xf32>
    %46 = tpu.matmul %44, %45, %cst_18 {dimension_numbers = #tpu.dot_dimension_numbers<[1], [0], [0], [1], [0, 0, 1, 1], [], []>} : vector<128x32xbf16>, vector<32x32xbf16>, vector<128x32xf32> -> vector<128x32xf32>
    %47 = arith.addf %42, %46 : vector<128x32xf32>
    %48 = vector.extract_strided_slice %6 {offsets = [2, 2, 0], sizes = [8, 16, 32], strides = [1, 1, 1]} : vector<10x18x32xbf16> to vector<8x16x32xbf16>
    %49 = vector.shape_cast %48 : vector<8x16x32xbf16> to vector<128x32xbf16>
    %c256 = arith.constant 256 : index
    %c0_19 = arith.constant 0 : index
    %50 = vector.load %arg5[%c256, %c0_19] : memref<288x32xbf16, #tpu.memory_space<vmem>>, vector<32x32xbf16>
    %cst_20 = arith.constant dense<0.000000e+00> : vector<128x32xf32>
    %51 = tpu.matmul %49, %50, %cst_20 {dimension_numbers = #tpu.dot_dimension_numbers<[1], [0], [0], [1], [0, 0, 1, 1], [], []>} : vector<128x32xbf16>, vector<32x32xbf16>, vector<128x32xf32> -> vector<128x32xf32>
    %52 = arith.addf %47, %51 : vector<128x32xf32>
    %c0_21 = arith.constant 0 : index
    %c0_22 = arith.constant 0 : index
    %c0_23 = arith.constant 0 : index
    %53 = vector.load %arg7[%c0_21, %c0_22, %c0_23] : memref<1x2x32xf32, #tpu.memory_space<vmem>>, vector<1x1x32xf32>
    %54 = vector.shape_cast %53 : vector<1x1x32xf32> to vector<1x32xf32>
    %cst_24 = arith.constant dense<0.000000e+00> : vector<32xf32>
    %55 = vector.multi_reduction <add>, %52, %cst_24 [0] : vector<128x32xf32> to vector<32xf32>
    %56 = vector.shape_cast %55 : vector<32xf32> to vector<1x32xf32>
    %57 = arith.addf %54, %56 : vector<1x32xf32>
    %c0_25 = arith.constant 0 : index
    %c0_26 = arith.constant 0 : index
    %c0_27 = arith.constant 0 : index
    %58 = vector.load %arg7[%c0_25, %c0_26, %c0_27] : memref<1x2x32xf32, #tpu.memory_space<vmem>>, vector<1x1x32xf32>
    %59 = vector.shape_cast %58 : vector<1x1x32xf32> to vector<1x32xf32>
    %60 = vector.shape_cast %57 : vector<1x32xf32> to vector<1x1x32xf32>
    tpu.vector_store %arg7[%c0_25, %c0_26, %c0_27], %60 {strides = array<i32>} : memref<1x2x32xf32, #tpu.memory_space<vmem>>, vector<1x1x32xf32>,
    %c0_28 = arith.constant 0 : index
    %c1 = arith.constant 1 : index
    %c0_29 = arith.constant 0 : index
    %61 = vector.load %arg7[%c0_28, %c1, %c0_29] : memref<1x2x32xf32, #tpu.memory_space<vmem>>, vector<1x1x32xf32>
    %62 = vector.shape_cast %61 : vector<1x1x32xf32> to vector<1x32xf32>
    %63 = arith.mulf %52, %52 : vector<128x32xf32>
    %cst_30 = arith.constant dense<0.000000e+00> : vector<32xf32>
    %64 = vector.multi_reduction <add>, %63, %cst_30 [0] : vector<128x32xf32> to vector<32xf32>
    %65 = vector.shape_cast %64 : vector<32xf32> to vector<1x32xf32>
    %66 = arith.addf %62, %65 : vector<1x32xf32>
    %c0_31 = arith.constant 0 : index
    %c1_32 = arith.constant 1 : index
    %c0_33 = arith.constant 0 : index
    %67 = vector.load %arg7[%c0_31, %c1_32, %c0_33] : memref<1x2x32xf32, #tpu.memory_space<vmem>>, vector<1x1x32xf32>
    %68 = vector.shape_cast %67 : vector<1x1x32xf32> to vector<1x32xf32>
    %69 = vector.shape_cast %66 : vector<1x32xf32> to vector<1x1x32xf32>
    tpu.vector_store %arg7[%c0_31, %c1_32, %c0_33], %69 {strides = array<i32>} : memref<1x2x32xf32, #tpu.memory_space<vmem>>, vector<1x1x32xf32>,
    %70 = vector.shape_cast %52 : vector<128x32xf32> to vector<8x16x32xf32>
    %71 = arith.truncf %70 : vector<8x16x32xf32> to vector<8x16x32xbf16>
    %c0_34 = arith.constant 0 : index
    %c0_35 = arith.constant 0 : index
    %c0_36 = arith.constant 0 : index
    %c0_37 = arith.constant 0 : index
    %72 = vector.load %arg6[%c0_34, %c0_35, %c0_36, %c0_37] : memref<1x8x16x32xbf16, #tpu.memory_space<vmem>>, vector<1x8x16x32xbf16>
    %73 = vector.shape_cast %72 : vector<1x8x16x32xbf16> to vector<8x16x32xbf16>
    %74 = vector.shape_cast %71 : vector<8x16x32xbf16> to vector<1x8x16x32xbf16>
    tpu.vector_store %arg6[%c0_34, %c0_35, %c0_36, %c0_37], %74 {strides = array<i32>} : memref<1x8x16x32xbf16, #tpu.memory_space<vmem>>, vector<1x8x16x32xbf16>,
    return
  }
  func.func @transform_0(%arg0: i32, %arg1: i32) -> (i32, i32, i32, i32) {
    %c0_i32 = arith.constant 0 : i32
    %c0_i32_0 = arith.constant 0 : i32
    %c0_i32_1 = arith.constant 0 : i32
    %c0_i32_2 = arith.constant 0 : i32
    return %arg0, %c0_i32, %c0_i32_0, %c0_i32_1 : i32, i32, i32, i32
  }
  func.func @transform_1(%arg0: i32, %arg1: i32) -> (i32, i32) {
    %c0_i32 = arith.constant 0 : i32
    %c0_i32_0 = arith.constant 0 : i32
    %c0_i32_1 = arith.constant 0 : i32
    return %c0_i32, %c0_i32_0 : i32, i32
  }
  func.func @transform_2(%arg0: i32, %arg1: i32) -> (i32, i32) {
    %c0_i32 = arith.constant 0 : i32
    %c0_i32_0 = arith.constant 0 : i32
    %c0_i32_1 = arith.constant 0 : i32
    return %c0_i32, %c0_i32_0 : i32, i32
  }
  func.func @transform_3(%arg0: i32, %arg1: i32) -> (i32, i32) {
    %c0_i32 = arith.constant 0 : i32
    %c0_i32_0 = arith.constant 0 : i32
    %c0_i32_1 = arith.constant 0 : i32
    return %c0_i32, %c0_i32_0 : i32, i32
  }
  func.func @transform_4(%arg0: i32, %arg1: i32) -> (i32, i32, i32, i32) {
    %c0_i32 = arith.constant 0 : i32
    %c0_i32_0 = arith.constant 0 : i32
    %c0_i32_1 = arith.constant 0 : i32
    return %arg0, %arg1, %c0_i32, %c0_i32_0 : i32, i32, i32, i32
  }
  func.func @transform_5(%arg0: i32, %arg1: i32) -> (i32, i32, i32) {
    %c0_i32 = arith.constant 0 : i32
    %c0_i32_0 = arith.constant 0 : i32
    %c0_i32_1 = arith.constant 0 : i32
    return %arg0, %c0_i32, %c0_i32_0 : i32, i32, i32
  }
}

module attributes {stable_mosaic.version = 11 : i64} {
  func.func @_bn_relu_conv_add_kernel(%arg0: i32, %arg1: i32, %arg2: memref<1x16x16x32xbf16, #tpu.memory_space<vmem>>, %arg3: memref<1x32xf32, #tpu.memory_space<vmem>>, %arg4: memref<1x32xf32, #tpu.memory_space<vmem>>, %arg5: memref<288x32xbf16, #tpu.memory_space<vmem>>, %arg6: memref<1x8x16x32xf32, #tpu.memory_space<vmem>>, %arg7: memref<1x8x16x32xf32, #tpu.memory_space<vmem>>, %arg8: memref<18x18x32xbf16, #tpu.memory_space<vmem>>) attributes {dimension_semantics = [#tpu.dimension_semantics<parallel>, #tpu.dimension_semantics<arbitrary>], iteration_bounds = array<i64: 2, 2>, scalar_prefetch = 0 : i64, scratch_operands = 1 : i64, tpu.core_type = #tpu.core_type<tc>, window_params = [{transform_indices = @transform_0, window_bounds = array<i64: 1, 16, 16, 32>}, {pipeline_mode = #tpu.pipeline_mode<synchronous>, transform_indices = @transform_1, window_bounds = array<i64: 1, 32>}, {pipeline_mode = #tpu.pipeline_mode<synchronous>, transform_indices = @transform_2, window_bounds = array<i64: 1, 32>}, {pipeline_mode = #tpu.pipeline_mode<synchronous>, transform_indices = @transform_3, window_bounds = array<i64: 288, 32>}, {transform_indices = @transform_4, window_bounds = array<i64: 1, 8, 16, 32>}, {transform_indices = @transform_5, window_bounds = array<i64: 1, 8, 16, 32>}]} {
    %c0_i32 = arith.constant 0 : i32
    %0 = arith.cmpi eq, %arg1, %c0_i32 : i32
    %1 = arith.extui %0 : i1 to i32
    %c0_i32_0 = arith.constant 0 : i32
    %2 = arith.cmpi ne, %1, %c0_i32_0 : i32
    scf.if %2 {
      %c0_29 = arith.constant 0 : index
      %c0_30 = arith.constant 0 : index
      %c0_31 = arith.constant 0 : index
      %c0_32 = arith.constant 0 : index
      %60 = vector.load %arg2[%c0_29, %c0_30, %c0_31, %c0_32] : memref<1x16x16x32xbf16, #tpu.memory_space<vmem>>, vector<1x16x16x32xbf16>
      %61 = vector.shape_cast %60 : vector<1x16x16x32xbf16> to vector<16x16x32xbf16>
      %62 = arith.extf %61 : vector<16x16x32xbf16> to vector<16x16x32xf32>
      %cst_33 = arith.constant 0.000000e+00 : bf16
      %63 = vector.broadcast %cst_33 : bf16 to vector<1x18x32xbf16>
      %c0_34 = arith.constant 0 : index
      %c0_35 = arith.constant 0 : index
      %c0_36 = arith.constant 0 : index
      %64 = vector.load %arg8[%c0_34, %c0_35, %c0_36] : memref<18x18x32xbf16, #tpu.memory_space<vmem>>, vector<1x18x32xbf16>
      tpu.vector_store %arg8[%c0_34, %c0_35, %c0_36], %63 {strides = array<i32>} : memref<18x18x32xbf16, #tpu.memory_space<vmem>>, vector<1x18x32xbf16>,
      %c17 = arith.constant 17 : index
      %c0_37 = arith.constant 0 : index
      %c0_38 = arith.constant 0 : index
      %65 = vector.load %arg8[%c17, %c0_37, %c0_38] : memref<18x18x32xbf16, #tpu.memory_space<vmem>>, vector<1x18x32xbf16>
      tpu.vector_store %arg8[%c17, %c0_37, %c0_38], %63 {strides = array<i32>} : memref<18x18x32xbf16, #tpu.memory_space<vmem>>, vector<1x18x32xbf16>,
      %cst_39 = arith.constant 0.000000e+00 : bf16
      %66 = vector.broadcast %cst_39 : bf16 to vector<16x1x32xbf16>
      %c1 = arith.constant 1 : index
      %c0_40 = arith.constant 0 : index
      %c0_41 = arith.constant 0 : index
      %67 = vector.load %arg8[%c1, %c0_40, %c0_41] : memref<18x18x32xbf16, #tpu.memory_space<vmem>>, vector<16x1x32xbf16>
      tpu.vector_store %arg8[%c1, %c0_40, %c0_41], %66 {strides = array<i32>} : memref<18x18x32xbf16, #tpu.memory_space<vmem>>, vector<16x1x32xbf16>,
      %c1_42 = arith.constant 1 : index
      %c17_43 = arith.constant 17 : index
      %c0_44 = arith.constant 0 : index
      %68 = vector.load %arg8[%c1_42, %c17_43, %c0_44] : memref<18x18x32xbf16, #tpu.memory_space<vmem>>, vector<16x1x32xbf16>
      tpu.vector_store %arg8[%c1_42, %c17_43, %c0_44], %66 {strides = array<i32>} : memref<18x18x32xbf16, #tpu.memory_space<vmem>>, vector<16x1x32xbf16>,
      %c0_45 = arith.constant 0 : index
      %c0_46 = arith.constant 0 : index
      %69 = vector.load %arg3[%c0_45, %c0_46] : memref<1x32xf32, #tpu.memory_space<vmem>>, vector<1x32xf32>
      %70 = vector.shape_cast %69 : vector<1x32xf32> to vector<1x1x32xf32>
      %c0_47 = arith.constant 0 : index
      %c0_48 = arith.constant 0 : index
      %71 = vector.load %arg4[%c0_47, %c0_48] : memref<1x32xf32, #tpu.memory_space<vmem>>, vector<1x32xf32>
      %72 = vector.shape_cast %71 : vector<1x32xf32> to vector<1x1x32xf32>
      %73 = vector.broadcast %70 : vector<1x1x32xf32> to vector<16x16x32xf32>
      %74 = arith.mulf %62, %73 : vector<16x16x32xf32>
      %75 = vector.broadcast %72 : vector<1x1x32xf32> to vector<16x16x32xf32>
      %76 = arith.addf %74, %75 : vector<16x16x32xf32>
      %cst_49 = arith.constant 0.000000e+00 : f32
      %77 = vector.broadcast %cst_49 : f32 to vector<16x16x32xf32>
      %78 = arith.maximumf %76, %77 : vector<16x16x32xf32>
      %79 = arith.truncf %78 : vector<16x16x32xf32> to vector<16x16x32xbf16>
      %c1_50 = arith.constant 1 : index
      %c1_51 = arith.constant 1 : index
      %c0_52 = arith.constant 0 : index
      %80 = vector.load %arg8[%c1_50, %c1_51, %c0_52] : memref<18x18x32xbf16, #tpu.memory_space<vmem>>, vector<16x16x32xbf16>
      tpu.vector_store %arg8[%c1_50, %c1_51, %c0_52], %79 {strides = array<i32>} : memref<18x18x32xbf16, #tpu.memory_space<vmem>>, vector<16x16x32xbf16>,
    } else {
    }
    %c8_i32 = arith.constant 8 : i32
    %3 = arith.muli %arg1, %c8_i32 : i32
    %4 = tpu.assume_multiple %3, 8 : i32
    %5 = arith.index_cast %4 : i32 to index
    %c0 = arith.constant 0 : index
    %c0_1 = arith.constant 0 : index
    %6 = vector.load %arg8[%5, %c0, %c0_1] : memref<18x18x32xbf16, #tpu.memory_space<vmem>>, vector<10x18x32xbf16>
    %cst = arith.constant 0.000000e+00 : f32
    %7 = vector.broadcast %cst : f32 to vector<128x32xf32>
    %8 = vector.extract_strided_slice %6 {offsets = [0, 0, 0], sizes = [8, 16, 32], strides = [1, 1, 1]} : vector<10x18x32xbf16> to vector<8x16x32xbf16>
    %9 = vector.shape_cast %8 : vector<8x16x32xbf16> to vector<128x32xbf16>
    %c0_2 = arith.constant 0 : index
    %c0_3 = arith.constant 0 : index
    %10 = vector.load %arg5[%c0_2, %c0_3] : memref<288x32xbf16, #tpu.memory_space<vmem>>, vector<32x32xbf16>
    %cst_4 = arith.constant dense<0.000000e+00> : vector<128x32xf32>
    %11 = tpu.matmul %9, %10, %cst_4 {dimension_numbers = #tpu.dot_dimension_numbers<[1], [0], [0], [1], [0, 0, 1, 1], [], []>} : vector<128x32xbf16>, vector<32x32xbf16>, vector<128x32xf32> -> vector<128x32xf32>
    %12 = arith.addf %7, %11 : vector<128x32xf32>
    %13 = vector.extract_strided_slice %6 {offsets = [0, 1, 0], sizes = [8, 16, 32], strides = [1, 1, 1]} : vector<10x18x32xbf16> to vector<8x16x32xbf16>
    %14 = vector.shape_cast %13 : vector<8x16x32xbf16> to vector<128x32xbf16>
    %c32 = arith.constant 32 : index
    %c0_5 = arith.constant 0 : index
    %15 = vector.load %arg5[%c32, %c0_5] : memref<288x32xbf16, #tpu.memory_space<vmem>>, vector<32x32xbf16>
    %cst_6 = arith.constant dense<0.000000e+00> : vector<128x32xf32>
    %16 = tpu.matmul %14, %15, %cst_6 {dimension_numbers = #tpu.dot_dimension_numbers<[1], [0], [0], [1], [0, 0, 1, 1], [], []>} : vector<128x32xbf16>, vector<32x32xbf16>, vector<128x32xf32> -> vector<128x32xf32>
    %17 = arith.addf %12, %16 : vector<128x32xf32>
    %18 = vector.extract_strided_slice %6 {offsets = [0, 2, 0], sizes = [8, 16, 32], strides = [1, 1, 1]} : vector<10x18x32xbf16> to vector<8x16x32xbf16>
    %19 = vector.shape_cast %18 : vector<8x16x32xbf16> to vector<128x32xbf16>
    %c64 = arith.constant 64 : index
    %c0_7 = arith.constant 0 : index
    %20 = vector.load %arg5[%c64, %c0_7] : memref<288x32xbf16, #tpu.memory_space<vmem>>, vector<32x32xbf16>
    %cst_8 = arith.constant dense<0.000000e+00> : vector<128x32xf32>
    %21 = tpu.matmul %19, %20, %cst_8 {dimension_numbers = #tpu.dot_dimension_numbers<[1], [0], [0], [1], [0, 0, 1, 1], [], []>} : vector<128x32xbf16>, vector<32x32xbf16>, vector<128x32xf32> -> vector<128x32xf32>
    %22 = arith.addf %17, %21 : vector<128x32xf32>
    %23 = vector.extract_strided_slice %6 {offsets = [1, 0, 0], sizes = [8, 16, 32], strides = [1, 1, 1]} : vector<10x18x32xbf16> to vector<8x16x32xbf16>
    %24 = vector.shape_cast %23 : vector<8x16x32xbf16> to vector<128x32xbf16>
    %c96 = arith.constant 96 : index
    %c0_9 = arith.constant 0 : index
    %25 = vector.load %arg5[%c96, %c0_9] : memref<288x32xbf16, #tpu.memory_space<vmem>>, vector<32x32xbf16>
    %cst_10 = arith.constant dense<0.000000e+00> : vector<128x32xf32>
    %26 = tpu.matmul %24, %25, %cst_10 {dimension_numbers = #tpu.dot_dimension_numbers<[1], [0], [0], [1], [0, 0, 1, 1], [], []>} : vector<128x32xbf16>, vector<32x32xbf16>, vector<128x32xf32> -> vector<128x32xf32>
    %27 = arith.addf %22, %26 : vector<128x32xf32>
    %28 = vector.extract_strided_slice %6 {offsets = [1, 1, 0], sizes = [8, 16, 32], strides = [1, 1, 1]} : vector<10x18x32xbf16> to vector<8x16x32xbf16>
    %29 = vector.shape_cast %28 : vector<8x16x32xbf16> to vector<128x32xbf16>
    %c128 = arith.constant 128 : index
    %c0_11 = arith.constant 0 : index
    %30 = vector.load %arg5[%c128, %c0_11] : memref<288x32xbf16, #tpu.memory_space<vmem>>, vector<32x32xbf16>
    %cst_12 = arith.constant dense<0.000000e+00> : vector<128x32xf32>
    %31 = tpu.matmul %29, %30, %cst_12 {dimension_numbers = #tpu.dot_dimension_numbers<[1], [0], [0], [1], [0, 0, 1, 1], [], []>} : vector<128x32xbf16>, vector<32x32xbf16>, vector<128x32xf32> -> vector<128x32xf32>
    %32 = arith.addf %27, %31 : vector<128x32xf32>
    %33 = vector.extract_strided_slice %6 {offsets = [1, 2, 0], sizes = [8, 16, 32], strides = [1, 1, 1]} : vector<10x18x32xbf16> to vector<8x16x32xbf16>
    %34 = vector.shape_cast %33 : vector<8x16x32xbf16> to vector<128x32xbf16>
    %c160 = arith.constant 160 : index
    %c0_13 = arith.constant 0 : index
    %35 = vector.load %arg5[%c160, %c0_13] : memref<288x32xbf16, #tpu.memory_space<vmem>>, vector<32x32xbf16>
    %cst_14 = arith.constant dense<0.000000e+00> : vector<128x32xf32>
    %36 = tpu.matmul %34, %35, %cst_14 {dimension_numbers = #tpu.dot_dimension_numbers<[1], [0], [0], [1], [0, 0, 1, 1], [], []>} : vector<128x32xbf16>, vector<32x32xbf16>, vector<128x32xf32> -> vector<128x32xf32>
    %37 = arith.addf %32, %36 : vector<128x32xf32>
    %38 = vector.extract_strided_slice %6 {offsets = [2, 0, 0], sizes = [8, 16, 32], strides = [1, 1, 1]} : vector<10x18x32xbf16> to vector<8x16x32xbf16>
    %39 = vector.shape_cast %38 : vector<8x16x32xbf16> to vector<128x32xbf16>
    %c192 = arith.constant 192 : index
    %c0_15 = arith.constant 0 : index
    %40 = vector.load %arg5[%c192, %c0_15] : memref<288x32xbf16, #tpu.memory_space<vmem>>, vector<32x32xbf16>
    %cst_16 = arith.constant dense<0.000000e+00> : vector<128x32xf32>
    %41 = tpu.matmul %39, %40, %cst_16 {dimension_numbers = #tpu.dot_dimension_numbers<[1], [0], [0], [1], [0, 0, 1, 1], [], []>} : vector<128x32xbf16>, vector<32x32xbf16>, vector<128x32xf32> -> vector<128x32xf32>
    %42 = arith.addf %37, %41 : vector<128x32xf32>
    %43 = vector.extract_strided_slice %6 {offsets = [2, 1, 0], sizes = [8, 16, 32], strides = [1, 1, 1]} : vector<10x18x32xbf16> to vector<8x16x32xbf16>
    %44 = vector.shape_cast %43 : vector<8x16x32xbf16> to vector<128x32xbf16>
    %c224 = arith.constant 224 : index
    %c0_17 = arith.constant 0 : index
    %45 = vector.load %arg5[%c224, %c0_17] : memref<288x32xbf16, #tpu.memory_space<vmem>>, vector<32x32xbf16>
    %cst_18 = arith.constant dense<0.000000e+00> : vector<128x32xf32>
    %46 = tpu.matmul %44, %45, %cst_18 {dimension_numbers = #tpu.dot_dimension_numbers<[1], [0], [0], [1], [0, 0, 1, 1], [], []>} : vector<128x32xbf16>, vector<32x32xbf16>, vector<128x32xf32> -> vector<128x32xf32>
    %47 = arith.addf %42, %46 : vector<128x32xf32>
    %48 = vector.extract_strided_slice %6 {offsets = [2, 2, 0], sizes = [8, 16, 32], strides = [1, 1, 1]} : vector<10x18x32xbf16> to vector<8x16x32xbf16>
    %49 = vector.shape_cast %48 : vector<8x16x32xbf16> to vector<128x32xbf16>
    %c256 = arith.constant 256 : index
    %c0_19 = arith.constant 0 : index
    %50 = vector.load %arg5[%c256, %c0_19] : memref<288x32xbf16, #tpu.memory_space<vmem>>, vector<32x32xbf16>
    %cst_20 = arith.constant dense<0.000000e+00> : vector<128x32xf32>
    %51 = tpu.matmul %49, %50, %cst_20 {dimension_numbers = #tpu.dot_dimension_numbers<[1], [0], [0], [1], [0, 0, 1, 1], [], []>} : vector<128x32xbf16>, vector<32x32xbf16>, vector<128x32xf32> -> vector<128x32xf32>
    %52 = arith.addf %47, %51 : vector<128x32xf32>
    %c0_21 = arith.constant 0 : index
    %c0_22 = arith.constant 0 : index
    %c0_23 = arith.constant 0 : index
    %c0_24 = arith.constant 0 : index
    %53 = vector.load %arg6[%c0_21, %c0_22, %c0_23, %c0_24] : memref<1x8x16x32xf32, #tpu.memory_space<vmem>>, vector<1x8x16x32xf32>
    %54 = vector.shape_cast %53 : vector<1x8x16x32xf32> to vector<8x16x32xf32>
    %55 = vector.shape_cast %52 : vector<128x32xf32> to vector<8x16x32xf32>
    %56 = arith.addf %54, %55 : vector<8x16x32xf32>
    %c0_25 = arith.constant 0 : index
    %c0_26 = arith.constant 0 : index
    %c0_27 = arith.constant 0 : index
    %c0_28 = arith.constant 0 : index
    %57 = vector.load %arg7[%c0_25, %c0_26, %c0_27, %c0_28] : memref<1x8x16x32xf32, #tpu.memory_space<vmem>>, vector<1x8x16x32xf32>
    %58 = vector.shape_cast %57 : vector<1x8x16x32xf32> to vector<8x16x32xf32>
    %59 = vector.shape_cast %56 : vector<8x16x32xf32> to vector<1x8x16x32xf32>
    tpu.vector_store %arg7[%c0_25, %c0_26, %c0_27, %c0_28], %59 {strides = array<i32>} : memref<1x8x16x32xf32, #tpu.memory_space<vmem>>, vector<1x8x16x32xf32>,
    return
  }
  func.func @transform_0(%arg0: i32, %arg1: i32) -> (i32, i32, i32, i32) {
    %c0_i32 = arith.constant 0 : i32
    %c0_i32_0 = arith.constant 0 : i32
    %c0_i32_1 = arith.constant 0 : i32
    %c0_i32_2 = arith.constant 0 : i32
    return %arg0, %c0_i32, %c0_i32_0, %c0_i32_1 : i32, i32, i32, i32
  }
  func.func @transform_1(%arg0: i32, %arg1: i32) -> (i32, i32) {
    %c0_i32 = arith.constant 0 : i32
    %c0_i32_0 = arith.constant 0 : i32
    %c0_i32_1 = arith.constant 0 : i32
    return %c0_i32, %c0_i32_0 : i32, i32
  }
  func.func @transform_2(%arg0: i32, %arg1: i32) -> (i32, i32) {
    %c0_i32 = arith.constant 0 : i32
    %c0_i32_0 = arith.constant 0 : i32
    %c0_i32_1 = arith.constant 0 : i32
    return %c0_i32, %c0_i32_0 : i32, i32
  }
  func.func @transform_3(%arg0: i32, %arg1: i32) -> (i32, i32) {
    %c0_i32 = arith.constant 0 : i32
    %c0_i32_0 = arith.constant 0 : i32
    %c0_i32_1 = arith.constant 0 : i32
    return %c0_i32, %c0_i32_0 : i32, i32
  }
  func.func @transform_4(%arg0: i32, %arg1: i32) -> (i32, i32, i32, i32) {
    %c0_i32 = arith.constant 0 : i32
    %c0_i32_0 = arith.constant 0 : i32
    %c0_i32_1 = arith.constant 0 : i32
    return %arg0, %arg1, %c0_i32, %c0_i32_0 : i32, i32, i32, i32
  }
  func.func @transform_5(%arg0: i32, %arg1: i32) -> (i32, i32, i32, i32) {
    %c0_i32 = arith.constant 0 : i32
    %c0_i32_0 = arith.constant 0 : i32
    %c0_i32_1 = arith.constant 0 : i32
    return %arg0, %arg1, %c0_i32, %c0_i32_0 : i32, i32, i32, i32
  }
}

</mosaic_0001>

<bundles_post_ra>
// kernel: basic_block_forward.3
= control target key start
LH: loop header
LB: loop body
LE: loop exit
PB: predicated region body
PF: predicated region fallthrough
CT: control target
= control target key end

     0   :  { %s411_s6 = smov 0   ;;  %s532_s0 = inlined_call_operand.vmem [shape: f32[2,256,32], index: 0, kind: input, shape index: {}]   ;;  %s533_s1 = inlined_call_operand.vmem [shape: f32[2,2,32], index: 1, kind: output, shape index: {}]  }
   0x1 LB: > { %s374_s7 = sadd.s32 4294967295, %s399_s6   ;;  %p378_p0 = scmp.ge.s32.totalorder %s399_s6, 1  ;;  %s399_s6 = sphi %s411_s6, %s11_s6  }
   0x2   : > { %p87_p1 = scmp.lt.s32.totalorder %s399_s6, 3 }
   0x4   : > { %p88_p2 = pnand %p378_p0, %p87_p1 }
   0x5   : > { %p106_p3 = scmp.lt.s32.totalorder (!%p88_p2), %s374_s7, 1  ;;  %vm147_vm0 = vcmask (!%p88_p2), 261120   ;;  %vm217_vm1 = vcmask (!%p88_p2), 253952  }
   0x6   : > { %91 = sbr.rel (%p88_p2) target bundleno = 98 (0x62), region = 24 }
   0xd   : > { %s535_s7 = smov (!%p106_p3, %s374_s7), 1 }
   0xe   : > { %s384_s8 = sshll.u32 %s535_s7, 8  ;;  %s381_s12 = sshll.u32 %s535_s7, 1 }
   0xf   : > { %s425_s11 = scalar_lea.vmem %s532_s0, %s384_s8  ;;  %s114_s15 = scalar_lea.vmem %s533_s1, %s381_s12 }
  0x10   : > { %v115_v0 = vld [vmem:[%s425_s11] sm:$0xff]  ;;  %v116_v1 = vld [vmem:[%s425_s11 + $0x8] sm:$0xff]  ;;  %v117_v2 = vld [vmem:[%s425_s11 + $0x10] sm:$0xff] }
  0x11   : > { %v148_v3 = vsel %vm147_vm0, %v115_v0, 0.0  ;;  %v149_v4 = vsel %vm147_vm0, %v116_v1, 0.0  ;;  %v151_v5 = vsel %vm147_vm0, %v117_v2, 0.0  ;;  %v118_v6 = vld [vmem:[%s425_s11 + $0x18] sm:$0xff]  ;;  %v119_v9 = vld [vmem:[%s425_s11 + $0x20] sm:$0xff]  ;;  %v120_v12 = vld [vmem:[%s425_s11 + $0x28] sm:$0xff]  ;;  %v219_v27 = vmul.f32 %v115_v0, %v115_v0 }
  0x12   : > { %v150_v7 = vadd.f32 %v149_v4, %v148_v3  ;;  %v153_v8 = vsel %vm147_vm0, %v118_v6, 0.0  ;;  %v155_v11 = vsel %vm147_vm0, %v119_v9, 0.0  ;;  %v157_v14 = vsel %vm147_vm0, %v120_v12, 0.0  ;;  %v121_v15 = vld [vmem:[%s425_s11 + $0x30] sm:$0xff]  ;;  %v122_v18 = vld [vmem:[%s425_s11 + $0x38] sm:$0xff]  ;;  %v123_v21 = vld [vmem:[%s425_s11 + $0x40] sm:$0xff] }
  0x13   : > { %v159_v17 = vsel %vm147_vm0, %v121_v15, 0.0  ;;  %v161_v20 = vsel %vm147_vm0, %v122_v18, 0.0  ;;  %v163_v23 = vsel %vm147_vm0, %v123_v21, 0.0  ;;  %v124_v24 = vld [vmem:[%s425_s11 + $0x48] sm:$0xff]  ;;  %v220_v28 = vmul.f32 %v116_v1, %v116_v1  ;;  %v125_v30 = vld [vmem:[%s425_s11 + $0x50] sm:$0xff]  ;;  %v126_v32 = vld [vmem:[%s425_s11 + $0x58] sm:$0xff] }
  0x14   : > { %v152_v10 = vadd.f32 %v151_v5, %v150_v7  ;;  %v165_v26 = vsel %vm147_vm0, %v124_v24, 0.0  ;;  %v221_v29 = vmul.f32 %v117_v2, %v117_v2  ;;  %v167_v33 = vsel %vm147_vm0, %v125_v30, 0.0  ;;  %v127_v41 = vld [vmem:[%s425_s11 + $0x60] sm:$0xff]  ;;  %v128_v47 = vld [vmem:[%s425_s11 + $0x68] sm:$0xff]  ;;  %v129_v53 = vld [vmem:[%s425_s11 + $0x70] sm:$0xff] }
  0x15   : > { %v222_v34 = vmul.f32 %v118_v6, %v118_v6  ;;  %v169_v36 = vsel %vm147_vm0, %v126_v32, 0.0  ;;  %v223_v37 = vmul.f32 %v119_v9, %v119_v9  ;;  %v251_v38 = vsel %vm147_vm0, %v219_v27, 0.0  ;;  %v130_v59 = vld [vmem:[%s425_s11 + $0x78] sm:$0xff]  ;;  %v131_v1 = vld [vmem:[%s425_s11 + $0x80] sm:$0xff]  ;;  %v132_v7 = vld [vmem:[%s425_s11 + $0x88] sm:$0xff] }
  0x16   : > { %v154_v13 = vadd.f32 %v153_v8, %v152_v10  ;;  %v252_v39 = vsel %vm147_vm0, %v220_v28, 0.0  ;;  %v254_v40 = vsel %vm147_vm0, %v221_v29, 0.0  ;;  %v171_v44 = vsel %vm147_vm0, %v127_v41, 0.0 }
  0x17   : > { %v253_v43 = vadd.f32 %v252_v39, %v251_v38  ;;  %v224_v45 = vmul.f32 %v120_v12, %v120_v12  ;;  %v256_v46 = vsel %vm147_vm0, %v222_v34, 0.0  ;;  %v173_v50 = vsel %vm147_vm0, %v128_v47, 0.0 }
  0x18   : > { %v156_v16 = vadd.f32 %v155_v11, %v154_v13  ;;  %v225_v51 = vmul.f32 %v121_v15, %v121_v15  ;;  %v258_v52 = vsel %vm147_vm0, %v223_v37, 0.0  ;;  %v175_v56 = vsel %vm147_vm0, %v129_v53, 0.0  ;;  %v133_v13 = vld [vmem:[%s425_s11 + $0x90] sm:$0xff] }
  0x19   : > { %v255_v49 = vadd.f32 %v254_v40, %v253_v43  ;;  %v226_v57 = vmul.f32 %v122_v18, %v122_v18  ;;  %v260_v58 = vsel %vm147_vm0, %v224_v45, 0.0  ;;  %v177_v62 = vsel %vm147_vm0, %v130_v59, 0.0  ;;  %v137_v37 = vld [vmem:[%s425_s11 + $0xb0] sm:$0xff]  ;;  %v138_v43 = vld [vmem:[%s425_s11 + $0xb8] sm:$0xff] }
  0x1a   : > { %v158_v19 = vadd.f32 %v157_v14, %v156_v16  ;;  %v227_v63 = vmul.f32 %v123_v21, %v123_v21  ;;  %v262_v0 = vsel %vm147_vm0, %v225_v51, 0.0  ;;  %v179_v4 = vsel %vm147_vm0, %v131_v1, 0.0 }
  0x1b   : > { %v257_v55 = vadd.f32 %v256_v46, %v255_v49  ;;  %v228_v5 = vmul.f32 %v124_v24, %v124_v24  ;;  %v264_v6 = vsel %vm147_vm0, %v226_v57, 0.0  ;;  %v181_v10 = vsel %vm147_vm0, %v132_v7, 0.0  ;;  %v139_v49 = vld [vmem:[%s425_s11 + $0xc0] sm:$0xff] }
  0x1c   : > { %v160_v22 = vadd.f32 %v159_v17, %v158_v19  ;;  %v229_v11 = vmul.f32 %v125_v30, %v125_v30  ;;  %v266_v12 = vsel %vm147_vm0, %v227_v63, 0.0  ;;  %v183_v16 = vsel %vm147_vm0, %v133_v13, 0.0  ;;  %v134_v19 = vld [vmem:[%s425_s11 + $0x98] sm:$0xff] }
  0x1d   : > { %v259_v61 = vadd.f32 %v258_v52, %v257_v55  ;;  %v230_v17 = vmul.f32 %v126_v32, %v126_v32  ;;  %v268_v18 = vsel %vm147_vm0, %v228_v5, 0.0  ;;  %v232_v29 = vmul.f32 %v128_v47, %v128_v47  ;;  %v140_v55 = vld [vmem:[%s425_s11 + $0xc8] sm:$0xff] }
  0x1e   : > { %v162_v25 = vadd.f32 %v161_v20, %v160_v22  ;;  %v185_v22 = vsel %vm147_vm0, %v134_v19, 0.0  ;;  %v270_v24 = vsel %vm147_vm0, %v229_v11, 0.0  ;;  %v191_v40 = vsel %vm147_vm0, %v137_v37, 0.0 }
  0x1f   : > { %v261_v3 = vadd.f32 %v260_v58, %v259_v61  ;;  %v272_v30 = vsel %vm147_vm0, %v230_v17, 0.0  ;;  %v193_v46 = vsel %vm147_vm0, %v138_v43, 0.0  ;;  %v235_v47 = vmul.f32 %v131_v1, %v131_v1  ;;  %v141_v61 = vld [vmem:[%s425_s11 + $0xd0] sm:$0xff] }
  0x20   : > { %v164_v31 = vadd.f32 %v163_v23, %v162_v25  ;;  %v231_v23 = vmul.f32 %v127_v41, %v127_v41  ;;  %v135_v25 = vld [vmem:[%s425_s11 + $0xa0] sm:$0xff]  ;;  %v234_v41 = vmul.f32 %v130_v59, %v130_v59  ;;  %v195_v52 = vsel %vm147_vm0, %v139_v49, 0.0 }
  0x21   : > { %v263_v9 = vadd.f32 %v262_v0, %v261_v3  ;;  %v187_v28 = vsel %vm147_vm0, %v135_v25, 0.0  ;;  %v197_v58 = vsel %vm147_vm0, %v140_v55, 0.0  ;;  %v237_v59 = vmul.f32 %v133_v13, %v133_v13  ;;  %v142_v3 = vld [vmem:[%s425_s11 + $0xd8] sm:$0xff] }
  0x22   : > { %v166_v35 = vadd.f32 %v165_v26, %v164_v31  ;;  %v136_v31 = vld [vmem:[%s425_s11 + $0xa8] sm:$0xff]  ;;  %v199_v0 = vsel %vm147_vm0, %v141_v61, 0.0  ;;  %v238_v1 = vmul.f32 %v134_v19, %v134_v19  ;;  %v241_v19 = vmul.f32 %v137_v37, %v137_v37 }
  0x23   : > { %v265_v15 = vadd.f32 %v264_v6, %v263_v9  ;;  %v189_v34 = vsel %vm147_vm0, %v136_v31, 0.0  ;;  %v201_v6 = vsel %vm147_vm0, %v142_v3, 0.0  ;;  %v143_v9 = vld [vmem:[%s425_s11 + $0xe0] sm:$0xff]  ;;  %v240_v13 = vmul.f32 %v136_v31, %v136_v31 }
  0x24   : > { %v168_v42 = vadd.f32 %v167_v33, %v166_v35  ;;  %v233_v35 = vmul.f32 %v129_v53, %v129_v53  ;;  %v236_v53 = vmul.f32 %v132_v7, %v132_v7  ;;  %v239_v7 = vmul.f32 %v135_v25, %v135_v25 }
  0x25   : > { %v267_v21 = vadd.f32 %v266_v12, %v265_v15  ;;  %v203_v12 = vsel %vm147_vm0, %v143_v9, 0.0  ;;  %v144_v15 = vld [vmem:[%s425_s11 + $0xe8] sm:$0xff]  ;;  %v242_v25 = vmul.f32 %v138_v43, %v138_v43  ;;  %v243_v31 = vmul.f32 %v139_v49, %v139_v49 }
  0x26   : > { %v170_v48 = vadd.f32 %v169_v36, %v168_v42  ;;  %v274_v36 = vsel %vm147_vm0, %v231_v23, 0.0  ;;  %v276_v42 = vsel %vm147_vm0, %v232_v29, 0.0  ;;  %v246_v43 = vmul.f32 %v142_v3, %v142_v3 }
  0x27   : > { %v269_v27 = vadd.f32 %v268_v18, %v267_v21  ;;  %v205_v18 = vsel %vm147_vm0, %v144_v15, 0.0  ;;  %v145_v21 = vld [vmem:[%s425_s11 + $0xf0] sm:$0xff] }
  0x28   : > { %v172_v54 = vadd.f32 %v171_v44, %v170_v48  ;;  %v278_v48 = vsel %vm147_vm0, %v233_v35, 0.0  ;;  %v244_v35 = vmul.f32 %v140_v55, %v140_v55  ;;  %v249_v55 = vmul.f32 %v145_v21, %v145_v21 }
  0x29   : > { %v271_v33 = vadd.f32 %v270_v24, %v269_v27  ;;  %v207_v24 = vsel %vm147_vm0, %v145_v21, 0.0  ;;  %v146_v27 = vld [vmem:[%s425_s11 + $0xf8] sm:$0xff] }
  0x2a   : > { %v174_v60 = vadd.f32 %v173_v50, %v172_v54  ;;  %v280_v54 = vsel %vm147_vm0, %v234_v41, 0.0 }
  0x2b   : > { %v273_v39 = vadd.f32 %v272_v30, %v271_v33  ;;  %v209_v30 = vsel %vm147_vm0, %v146_v27, 0.0 }
  0x2c   : > { %v176_v2 = vadd.f32 %v175_v56, %v174_v60  ;;  %v282_v60 = vsel %vm147_vm0, %v235_v47, 0.0  ;;  %v247_v47 = vmul.f32 %v143_v9, %v143_v9 }
  0x2d   : > { %v275_v45 = vadd.f32 %v274_v36, %v273_v39  ;;  %v296_v36 = vsel %vm147_vm0, %v242_v25, 0.0  ;;  %v245_v39 = vmul.f32 %v141_v61, %v141_v61 }
  0x2e   : > { %v178_v8 = vadd.f32 %v177_v62, %v176_v2  ;;  %v284_v2 = vsel %vm147_vm0, %v236_v53, 0.0 }
  0x2f   : > { %v277_v51 = vadd.f32 %v276_v42, %v275_v45 }
  0x30   : > { %v180_v14 = vadd.f32 %v179_v4, %v178_v8  ;;  %v286_v8 = vsel %vm147_vm0, %v237_v59, 0.0  ;;  %v250_v59 = vmul.f32 %v146_v27, %v146_v27 }
  0x31   : > { %v279_v57 = vadd.f32 %v278_v48, %v277_v51  ;;  %v302_v48 = vsel %vm147_vm0, %v245_v39, 0.0  ;;  %v248_v51 = vmul.f32 %v144_v15, %v144_v15 }
  0x32   : > { %v182_v20 = vadd.f32 %v181_v10, %v180_v14  ;;  %v288_v14 = vsel %vm147_vm0, %v238_v1, 0.0  ;;  %v312_v1 = vsel %vm147_vm0, %v250_v59, 0.0 }
  0x33   : > { %v281_v63 = vadd.f32 %v280_v54, %v279_v57 }
  0x34   : > { %v184_v26 = vadd.f32 %v183_v16, %v182_v20  ;;  %v290_v20 = vsel %vm147_vm0, %v239_v7, 0.0 }
  0x35   : > { %v283_v5 = vadd.f32 %v282_v60, %v281_v63  ;;  %v308_v60 = vsel %vm147_vm0, %v248_v51, 0.0  ;;  %v310_v63 = vsel %vm147_vm0, %v249_v55, 0.0 }
  0x36   : > { %v186_v32 = vadd.f32 %v185_v22, %v184_v26  ;;  %v292_v26 = vsel %vm147_vm0, %v240_v13, 0.0 }
  0x37   : > { %v285_v11 = vadd.f32 %v284_v2, %v283_v5 }
  0x38   : > { %v188_v38 = vadd.f32 %v187_v28, %v186_v32  ;;  %v294_v32 = vsel %vm147_vm0, %v241_v19, 0.0 }
  0x39   : > { %v287_v17 = vadd.f32 %v286_v8, %v285_v11 }
  0x3a   : > { %v190_v44 = vadd.f32 %v189_v34, %v188_v38 }
  0x3b   : > { %v289_v23 = vadd.f32 %v288_v14, %v287_v17 }
  0x3c   : > { %v192_v50 = vadd.f32 %v191_v40, %v190_v44  ;;  %v298_v40 = vsel %vm147_vm0, %v243_v31, 0.0  ;;  %v300_v44 = vsel %vm147_vm0, %v244_v35, 0.0 }
  0x3d   : > { %v291_v29 = vadd.f32 %v290_v20, %v289_v23 }
  0x3e   : > { %v194_v56 = vadd.f32 %v193_v46, %v192_v50 }
  0x3f   : > { %v293_v34 = vadd.f32 %v292_v26, %v291_v29 }
  0x40   : > { %v196_v62 = vadd.f32 %v195_v52, %v194_v56  ;;  %v304_v52 = vsel %vm147_vm0, %v246_v43, 0.0  ;;  %v306_v56 = vsel %vm147_vm0, %v247_v47, 0.0 }
  0x41   : > { %v295_v38 = vadd.f32 %v294_v32, %v293_v34 }
  0x42   : > { %v198_v4 = vadd.f32 %v197_v58, %v196_v62 }
  0x43   : > { %v297_v42 = vadd.f32 %v296_v36, %v295_v38 }
  0x44   : > { %v200_v10 = vadd.f32 %v199_v0, %v198_v4 }
  0x45   : > { %v299_v46 = vadd.f32 %v298_v40, %v297_v42 }
  0x46   : > { %v202_v16 = vadd.f32 %v201_v6, %v200_v10 }
  0x47   : > { %v301_v50 = vadd.f32 %v300_v44, %v299_v46 }
  0x48   : > { %v204_v22 = vadd.f32 %v203_v12, %v202_v16 }
  0x49   : > { %v303_v54 = vadd.f32 %v302_v48, %v301_v50 }
  0x4a   : > { %v206_v28 = vadd.f32 %v205_v18, %v204_v22 }
  0x4b   : > { %v305_v58 = vadd.f32 %v304_v52, %v303_v54 }
  0x4c   : > { %v208_v33 = vadd.f32 %v207_v24, %v206_v28 }
  0x4d   : > { %v307_v62 = vadd.f32 %v306_v56, %v305_v58 }
  0x4e   : > { %v210_v37 = vadd.f32 %v209_v30, %v208_v33 }
  0x4f   : > { %v309_v0 = vadd.f32 %v308_v60, %v307_v62 }
  0x50   : > { %v211_v41 = vrot.slane %v210_v37, 4 }
  0x51   : > { %v311_v2 = vadd.f32 %v310_v63, %v309_v0 }
  0x52   : > { %v212_v45 = vadd.f32 %v211_v41, %v210_v37 }
  0x53   : > { %v313_v3 = vadd.f32 %v312_v1, %v311_v2 }
  0x54   : > { %v213_v49 = vrot.slane %v212_v45, 2 }
  0x55   : > { %v314_v4 = vrot.slane %v313_v3, 4 }
  0x56   : > { %v214_v53 = vadd.f32 %v213_v49, %v212_v45 }
  0x57   : > { %v315_v5 = vadd.f32 %v314_v4, %v313_v3 }
  0x58   : > { %v215_v57 = vrot.slane %v214_v53, 1 }
  0x59   : > { %v316_v6 = vrot.slane %v315_v5, 2 }
  0x5a   : > { %v216_v61 = vadd.f32 %v215_v57, %v214_v53 }
  0x5b   : > { %v317_v7 = vadd.f32 %v316_v6, %v315_v5 }
  0x5c   : > { %218 = vst.msk [vmem:[%s114_s15] sm:$0x1] %vm217_vm1, %v216_v61 }
  0x5d   : > { %v318_v8 = vrot.slane %v317_v7, 1 }
  0x5f   : > { %v319_v9 = vadd.f32 %v318_v8, %v317_v7 }
  0x61   : > { %320 = vst.msk [vmem:[%s114_s15 + $0x1] sm:$0x1] %vm217_vm1, %v319_v9 }
  0x62 PF: > { %s11_s6 = sadd.s32 1, %s399_s6  }
  0x63   : > { %p8_p4 = scmp.ge.s32.totalorder %s11_s6, 4  }
  0x65   :  { %10 = sbr.rel (!%p8_p4) target bundleno = 1 (0x1), region = 54 }

// kernel: basic_block_forward.5
= control target key start
LH: loop header
LB: loop body
LE: loop exit
PB: predicated region body
PF: predicated region fallthrough
CT: control target
= control target key end

     0   :  { %s3802_s18 = smov 0   ;;  %s3804_s19 = smov 0   ;;  %s4787_s0 = inlined_call_operand.vmem [shape: bf16[2,16,16,32], index: 0, kind: input, shape index: {}]   ;;  %s4788_s1 = inlined_call_operand.vmem [shape: f32[1,32], index: 1, kind: input, shape index: {}]   ;;  %s4789_s2 = inlined_call_operand.vmem [shape: f32[1,32], index: 2, kind: input, shape index: {}]   ;;  %s4790_s3 = inlined_call_operand.vmem [shape: bf16[288,32], index: 3, kind: input, shape index: {}]   ;;  %s4791_s4 = inlined_call_operand.vmem [shape: f32[2,16,16,32], index: 4, kind: input, shape index: {}, may-alias: {4,5}]   ;;  %s4792_s5 = inlined_call_operand.vmem [shape: f32[2,16,16,32], index: 5, kind: output, shape index: {}, may-alias: {4,5}]  }
   0x1   :  { %s3806_s20 = smov 0   ;;  %s3808_s21 = smov 0  }
   0x2   :  { %s3810_s22 = smov 0  }
   0x3 LB: > { %s24_s23 = sadd.s32 1, %s3761_s20  ;;  %s27_s24 = sadd.s32 1, %s3765_s21  ;;  %s3769_s22 = sphi %s3810_s22, %s15_s22   ;;  %s3765_s21 = sphi %s3808_s21, %s4808_s21   ;;  %s3761_s20 = sphi %s3806_s20, %s4807_s20   ;;  %s3757_s19 = sphi %s3804_s19, %s4806_s19   ;;  %s3753_s18 = sphi %s3802_s18, %s4805_s18  }
   0x4   : > { %p25_p0 = scmp.ge.s32.totalorder %s24_s23, 2  ;;  %p2966_p1 = scmp.ge.s32.totalorder %s3769_s22, 1 }
   0x5   : > { %p219_p2 = scmp.lt.s32.totalorder %s3769_s22, 5 }
   0x6   : > { %s4810_s23 = smov (%p25_p0, %s24_s23), 0  ;;  %s4812_s24 = smov (!%p25_p0, %s27_s24), %s3765_s21 }
   0x7   : > { %p220_p3 = pnand %p2966_p1, %p219_p2  ;;  %p29_p4 = scmp.ge.s32.totalorder %s4812_s24, 2 }
   0x8   : > { %p262_p5 = scmp.lt.s32.totalorder (!%p220_p3), %s3757_s19, 1  ;;  %s2969_s25 = sshll.u32 (!%p220_p3), %s3753_s18, 3 }
   0x9   : > { %s4814_s24 = smov (%p29_p4, %s4812_s24), 0  ;;  %223 = sbr.rel (%p220_p3) target bundleno = 532 (0x214), region = 40 }
   0xa   : > { %p270_p6 = scmp.lt.s32.totalorder (!%p220_p3), %s2969_s25, 15  ;;  %p2977_p7 = scmp.ne.s32.totalorder (!%p220_p3), %s3753_s18, 0 }
  0x10   : > { %s4816_s19 = smov (!%p262_p5, %s3757_s19), 1  ;;  %s4818_s25 = smov (!%p270_p6, %s2969_s25), 15 }
  0x11   : > { %s3147_s26 = sshll.u32 %s4816_s19, 7  ;;  %s2971_s27 = sshll.u32 %s4816_s19, 5  ;;  %vm361_vm0 = vcmask (!%p2977_p7), 253952   ;;  %vm369_vm1 = vsmask.f32 (!%p2977_p7), 256  ;;  %vm358_vm2 = vcmask (!%p2977_p7), 257024  }
  0x12   : > { %s3838_s30 = scalar_lea.vmem %s4787_s0, %s3147_s26  ;;  %s2970_s6 = sshll.u32 %s4818_s25, 1  ;;  %v371_v0 = vld [vmem:[#allocation2 + $0xc] sm:$0x1] (!%p2977_p7)  ;;  %vm3853_vm3 = vmand (!%p2977_p7), %vm361_vm0, %vm369_vm1  ;;  %v374_v2 = vld [vmem:[#allocation2 + $0x18] sm:$0x1] (!%p2977_p7)  ;;  %v3771_v11 = vmov (!%p2977_p7), 0  }
  0x13   : > { %s274_s7 = sadd.s32 %s2971_s27, %s2970_s6  ;;  %293 = sbr.rel (%p2977_p7) target bundleno = 147 (0x93), region = 44  ;;  %v377_v3 = vld [vmem:[#allocation2 + $0x24] sm:$0x1] (!%p2977_p7)  ;;  %vm419_vm4 = vsmask.f32 (!%p2977_p7), 7938  ;;  %v372_v4 = vsel (!%p2977_p7), %vm3853_vm3, 0, %v371_v0 }
  0x14   : > { %s2972_s8 = sshll.u32 %s274_s7, 3  ;;  %v375_v5 = vsel (!%p2977_p7), %vm3853_vm3, 0, %v374_v2  ;;  %v378_v6 = vsel (!%p2977_p7), %vm3853_vm3, 0, %v377_v3  ;;  %v380_v7 = vld [vmem:[#allocation2 + $0x30] sm:$0x1] (!%p2977_p7)  ;;  %vm3889_vm5 = vmand (!%p2977_p7), %vm361_vm0, %vm419_vm4 }
  0x15   : > { %s3843_s11 = scalar_lea.vmem %s4791_s4, %s2972_s8  ;;  %s3848_s14 = scalar_lea.vmem %s4792_s5, %s2972_s8  ;;  %373 = vst [vmem:[#allocation2 + $0xc] sm:$0x1] (!%p2977_p7), %v372_v4  ;;  %376 = vst [vmem:[#allocation2 + $0x18] sm:$0x1] (!%p2977_p7), %v375_v5  ;;  %v381_v8 = vsel (!%p2977_p7), %vm3853_vm3, 0, %v380_v7  ;;  %v3182_v4 = vld [vmem:[%s3838_s30] sm:$0xff] (!%p2977_p7)  }
  0x16   : > { %379 = vst [vmem:[#allocation2 + $0x24] sm:$0x1] (!%p2977_p7), %v378_v6  ;;  %v383_v9 = vld [vmem:[#allocation2 + $0x3c] sm:$0x1] (!%p2977_p7)  ;;  %v386_v10 = vld [vmem:[#allocation2 + $0x48] sm:$0x1] (!%p2977_p7)  ;;  %v3183_v7 = vunpack.c.l.bf16 (!%p2977_p7), %v3182_v4  ;;  %vm3965_vm7 = vmand (!%p2977_p7), %vm358_vm2, %vm419_vm4 }
  0x17   : > { %359 = vst.msk [vmem:[#allocation2] sm:$0xf] (!%p2977_p7), %vm358_vm2, %v3771_v11  ;;  %360 = vst.msk [vmem:[#allocation2 + $0x4] sm:$0xf] (!%p2977_p7), %vm358_vm2, %v3771_v11  ;;  %v384_v12 = vsel (!%p2977_p7), %vm3853_vm3, 0, %v383_v9  ;;  %v387_v13 = vsel (!%p2977_p7), %vm3853_vm3, 0, %v386_v10 }
  0x18   : > { %362 = vst.msk [vmem:[#allocation2 + $0x8] sm:$0x1] (!%p2977_p7), %vm361_vm0, %v3771_v11  ;;  %366 = vst.msk [vmem:[#allocation2 + $0xd4] sm:$0x1] (!%p2977_p7), %vm361_vm0, %v3771_v11  ;;  %v389_v14 = vld [vmem:[#allocation2 + $0x54] sm:$0x1] (!%p2977_p7) }
  0x19   : > { %364 = vst.msk [vmem:[#allocation2 + $0xcc] sm:$0xf] (!%p2977_p7), %vm358_vm2, %v3771_v11  ;;  %365 = vst.msk [vmem:[#allocation2 + $0xd0] sm:$0xf] (!%p2977_p7), %vm358_vm2, %v3771_v11  ;;  %v392_v15 = vld [vmem:[#allocation2 + $0x60] sm:$0x1] (!%p2977_p7) }
  0x1a   : > { %382 = vst [vmem:[#allocation2 + $0x30] sm:$0x1] %v381_v8  ;;  %385 = vst [vmem:[#allocation2 + $0x3c] sm:$0x1] %v384_v12  ;;  %v390_v16 = vsel %vm3853_vm3, 0, %v389_v14  ;;  %v393_v17 = vsel %vm3853_vm3, 0, %v392_v15  ;;  %v3184_v8 = vunpack.c.h.bf16 %v3182_v4 }
  0x1b   : > { %388 = vst [vmem:[#allocation2 + $0x48] sm:$0x1] %v387_v13  ;;  %v395_v18 = vld [vmem:[#allocation2 + $0x6c] sm:$0x1]  ;;  %v398_v19 = vld [vmem:[#allocation2 + $0x78] sm:$0x1] }
  0x1c   : > { %391 = vst [vmem:[#allocation2 + $0x54] sm:$0x1] %v390_v16  ;;  %394 = vst [vmem:[#allocation2 + $0x60] sm:$0x1] %v393_v17  ;;  %v396_v20 = vsel %vm3853_vm3, 0, %v395_v18  ;;  %v399_v21 = vsel %vm3853_vm3, 0, %v398_v19 }
  0x1d   : > { %v401_v22 = vld [vmem:[#allocation2 + $0x84] sm:$0x1]  ;;  %v404_v23 = vld [vmem:[#allocation2 + $0x90] sm:$0x1]  ;;  %397 = vst [vmem:[#allocation2 + $0x6c] sm:$0x1] %v396_v20 }
  0x1e   : > { %400 = vst [vmem:[#allocation2 + $0x78] sm:$0x1] %v399_v21  ;;  %v402_v24 = vsel %vm3853_vm3, 0, %v401_v22  ;;  %v405_v25 = vsel %vm3853_vm3, 0, %v404_v23  ;;  %v407_v26 = vld [vmem:[#allocation2 + $0x9c] sm:$0x1] }
  0x1f   : > { %v410_v27 = vld [vmem:[#allocation2 + $0xa8] sm:$0x1]  ;;  %403 = vst [vmem:[#allocation2 + $0x84] sm:$0x1] %v402_v24  ;;  %406 = vst [vmem:[#allocation2 + $0x90] sm:$0x1] %v405_v25 }
  0x20   : > { %v408_v29 = vsel %vm3853_vm3, 0, %v407_v26  ;;  %v411_v30 = vsel %vm3853_vm3, 0, %v410_v27  ;;  %v413_v31 = vld [vmem:[#allocation2 + $0xb4] sm:$0x1]  ;;  %v416_v32 = vld [vmem:[#allocation2 + $0xc0] sm:$0x1] }
  0x21   : > { %409 = vst [vmem:[#allocation2 + $0x9c] sm:$0x1] %v408_v29  ;;  %412 = vst [vmem:[#allocation2 + $0xa8] sm:$0x1] %v411_v30  ;;  %v414_v33 = vsel %vm3853_vm3, 0, %v413_v31  ;;  %v417_v34 = vsel %vm3853_vm3, 0, %v416_v32 }
  0x22   : > { %v421_v35 = vld [vmem:[#allocation2 + $0x14] sm:$0x1]  ;;  %v424_v36 = vld [vmem:[#allocation2 + $0x20] sm:$0x1]  ;;  %415 = vst [vmem:[#allocation2 + $0xb4] sm:$0x1] %v414_v33 }
  0x23   : > { %418 = vst [vmem:[#allocation2 + $0xc0] sm:$0x1] %v417_v34  ;;  %v422_v37 = vsel %vm3889_vm5, 0, %v421_v35  ;;  %v425_v38 = vsel %vm3889_vm5, 0, %v424_v36  ;;  %v427_v39 = vld [vmem:[#allocation2 + $0x2c] sm:$0x1] }
  0x24   : > { %v430_v40 = vld [vmem:[#allocation2 + $0x38] sm:$0x1]  ;;  %423 = vst [vmem:[#allocation2 + $0x14] sm:$0x1] %v422_v37  ;;  %426 = vst [vmem:[#allocation2 + $0x20] sm:$0x1] %v425_v38 }
  0x25   : > { %v428_v41 = vsel %vm3889_vm5, 0, %v427_v39  ;;  %v431_v42 = vsel %vm3889_vm5, 0, %v430_v40  ;;  %v433_v43 = vld [vmem:[#allocation2 + $0x44] sm:$0x1]  ;;  %v436_v44 = vld [vmem:[#allocation2 + $0x50] sm:$0x1] }
  0x26   : > { %429 = vst [vmem:[#allocation2 + $0x2c] sm:$0x1] %v428_v41  ;;  %432 = vst [vmem:[#allocation2 + $0x38] sm:$0x1] %v431_v42  ;;  %v434_v45 = vsel %vm3889_vm5, 0, %v433_v43  ;;  %v437_v46 = vsel %vm3889_vm5, 0, %v436_v44 }
  0x27   : > { %v439_v47 = vld [vmem:[#allocation2 + $0x5c] sm:$0x1]  ;;  %v442_v48 = vld [vmem:[#allocation2 + $0x68] sm:$0x1]  ;;  %435 = vst [vmem:[#allocation2 + $0x44] sm:$0x1] %v434_v45 }
  0x28   : > { %438 = vst [vmem:[#allocation2 + $0x50] sm:$0x1] %v437_v46  ;;  %v440_v49 = vsel %vm3889_vm5, 0, %v439_v47  ;;  %v443_v50 = vsel %vm3889_vm5, 0, %v442_v48  ;;  %v445_v51 = vld [vmem:[#allocation2 + $0x74] sm:$0x1] }
  0x29   : > { %v448_v52 = vld [vmem:[#allocation2 + $0x80] sm:$0x1]  ;;  %441 = vst [vmem:[#allocation2 + $0x5c] sm:$0x1] %v440_v49  ;;  %444 = vst [vmem:[#allocation2 + $0x68] sm:$0x1] %v443_v50 }
  0x2a   : > { %v446_v53 = vsel %vm3889_vm5, 0, %v445_v51  ;;  %v449_v54 = vsel %vm3889_vm5, 0, %v448_v52  ;;  %v451_v55 = vld [vmem:[#allocation2 + $0x8c] sm:$0x1]  ;;  %v454_v56 = vld [vmem:[#allocation2 + $0x98] sm:$0x1] }
  0x2b   : > { %447 = vst [vmem:[#allocation2 + $0x74] sm:$0x1] %v446_v53  ;;  %450 = vst [vmem:[#allocation2 + $0x80] sm:$0x1] %v449_v54  ;;  %v452_v57 = vsel %vm3889_vm5, 0, %v451_v55  ;;  %v455_v58 = vsel %vm3889_vm5, 0, %v454_v56 }
  0x2c   : > { %v457_v59 = vld [vmem:[#allocation2 + $0xa4] sm:$0x1]  ;;  %v460_v60 = vld [vmem:[#allocation2 + $0xb0] sm:$0x1]  ;;  %453 = vst [vmem:[#allocation2 + $0x8c] sm:$0x1] %v452_v57 }
  0x2d   : > { %456 = vst [vmem:[#allocation2 + $0x98] sm:$0x1] %v455_v58  ;;  %v458_v61 = vsel %vm3889_vm5, 0, %v457_v59  ;;  %v461_v62 = vsel %vm3889_vm5, 0, %v460_v60  ;;  %v463_v63 = vld [vmem:[#allocation2 + $0xbc] sm:$0x1] }
  0x2e   : > { %v466_v0 = vld [vmem:[#allocation2 + $0xc8] sm:$0x1]  ;;  %459 = vst [vmem:[#allocation2 + $0xa4] sm:$0x1] %v458_v61  ;;  %462 = vst [vmem:[#allocation2 + $0xb0] sm:$0x1] %v461_v62 }
  0x2f   : > { %v464_v2 = vsel %vm3889_vm5, 0, %v463_v63  ;;  %v467_v3 = vsel %vm3889_vm5, 0, %v466_v0  ;;  %v3937_v5 = vld [vmem:[%s4788_s1] ss:$0 sm:$0xff]  ;;  %v3245_v6 = vld [vmem:[%s3838_s30 + $0x8] sm:$0xff]   ;;  %v3246_v15 = vld [vmem:[%s3838_s30 + $0x10] sm:$0xff]  }
  0x30   : > { %465 = vst [vmem:[#allocation2 + $0xbc] sm:$0x1] %v464_v2  ;;  %468 = vst [vmem:[#allocation2 + $0xc8] sm:$0x1] %v467_v3  ;;  %v3187_v9 = vunpack.c.l.bf16 %v3245_v6  ;;  %v3943_v10 = vld [vmem:[%s4789_s2] ss:$0 sm:$0xff]  ;;  %v3188_v11 = vunpack.c.h.bf16 %v3245_v6  ;;  %v477_v12 = vmul.f32 %v3183_v7, %v3937_v5  ;;  %v478_v13 = vmul.f32 %v3184_v8, %v3937_v5 }
  0x31   : > { %vm675_vm6 = vsmask.f32 4368  ;;  %v3191_v17 = vunpack.c.l.bf16 %v3246_v15  ;;  %v3192_v18 = vunpack.c.h.bf16 %v3246_v15  ;;  %v3247_v19 = vld [vmem:[%s3838_s30 + $0x18] sm:$0xff]   ;;  %v999_v54 = vld [vmem:[#allocation2 + $0xc] sm:$0xf] }
  0x32   : > { %v479_v14 = vmul.f32 %v3187_v9, %v3937_v5  ;;  %v480_v16 = vmul.f32 %v3188_v11, %v3937_v5  ;;  %v515_v20 = vadd.f32 %v3943_v10, %v477_v12  ;;  %v516_v21 = vadd.f32 %v3943_v10, %v478_v13  ;;  %vm3971_vm8 = vmor %vm369_vm1, %vm675_vm6  ;;  %v1003_v59 = vld [vmem:[#allocation2 + $0x14] sm:$0x1]  ;;  %v1006_v6 = vld [vmem:[#allocation2 + $0x18] sm:$0xf] }
  0x33   : > { %v3195_v23 = vunpack.c.l.bf16 %v3247_v19  ;;  %v481_v25 = vmul.f32 %v3191_v17, %v3937_v5  ;;  %v482_v26 = vmul.f32 %v3192_v18, %v3937_v5  ;;  %v3196_v27 = vunpack.c.h.bf16 %v3247_v19  ;;  %v1010_v7 = vld [vmem:[#allocation2 + $0x20] sm:$0x1]  ;;  %v3983_v18 = vld [vmem:[%s3838_s30 + $0x28] sm:$0xff]  }
  0x34   : > { %v517_v22 = vadd.f32 %v3943_v10, %v479_v14  ;;  %v518_v24 = vadd.f32 %v3943_v10, %v480_v16  ;;  %v547_v28 = vmax.f32 %v515_v20, 0.0  ;;  %v548_v29 = vmax.f32 %v516_v21, 0.0  ;;  %v3248_v17 = vld [vmem:[%s3838_s30 + $0x20] sm:$0xff]  }
  0x35   : > { %v483_v31 = vmul.f32 %v3195_v23, %v3937_v5  ;;  %v519_v33 = vadd.f32 %v3943_v10, %v481_v25  ;;  %v520_v34 = vadd.f32 %v3943_v10, %v482_v26  ;;  %v484_v35 = vmul.f32 %v3196_v27, %v3937_v5  ;;  %v1013_v27 = vld [vmem:[#allocation2 + $0x24] sm:$0xf] }
  0x36   : > { %v549_v30 = vmax.f32 %v517_v22, 0.0  ;;  %v550_v32 = vmax.f32 %v518_v24, 0.0  ;;  %v3148_v36 = vpack.c.bf16 %v547_v28, %v547_v28  ;;  %v3149_v37 = vpack.c.bf16 %v548_v29, %v548_v29 }
  0x37   : > { %v521_v39 = vadd.f32 %v3943_v10, %v483_v31  ;;  %v551_v41 = vmax.f32 %v519_v33, 0.0  ;;  %v552_v42 = vmax.f32 %v520_v34, 0.0  ;;  %v522_v43 = vadd.f32 %v3943_v10, %v484_v35 }
  0x38   : > { %v3150_v38 = vpack.c.bf16 %v549_v30, %v549_v30  ;;  %v3151_v40 = vpack.c.bf16 %v550_v32, %v550_v32  ;;  %v678_v44 = vshrl.u32 %v3148_v36, 16  ;;  %v681_v45 = vshll.u32 %v3148_v36, 16  ;;  %v1017_v36 = vld [vmem:[#allocation2 + $0x2c] sm:$0x1] }
  0x39   : > { %v686_v46 = vshrl.u32 %v3149_v37, 16  ;;  %v689_v47 = vshll.u32 %v3149_v37, 16  ;;  %v3152_v56 = vpack.c.bf16 %v551_v41, %v551_v41  ;;  %v3153_v57 = vpack.c.bf16 %v552_v42, %v552_v42 }
  0x3a   : > { %v695_v48 = vshrl.u32 %v3150_v38, 16  ;;  %v698_v49 = vshll.u32 %v3150_v38, 16  ;;  %v703_v50 = vshrl.u32 %v3151_v40, 16  ;;  %v706_v51 = vshll.u32 %v3151_v40, 16 }
  0x3b   : > { %v680_v53 = vrot.slane %v678_v44, 7  ;;  %v688_v55 = vrot.slane %v686_v46, 7  ;;  %v553_v62 = vmax.f32 %v521_v39, 0.0  ;;  %v554_v63 = vmax.f32 %v522_v43, 0.0 }
  0x3c   : > { %v697_v60 = vrot.slane %v695_v48, 7  ;;  %v705_v61 = vrot.slane %v703_v50, 7  ;;  %v712_v16 = vshrl.u32 %v3152_v56, 16  ;;  %v715_v22 = vshll.u32 %v3152_v56, 16  ;;  %v3250_v50 = vld [vmem:[%s3838_s30 + $0x30] sm:$0xff]  }
  0x3d   : > { %v683_v0 = vor.u32 %v681_v45, %v680_v53  ;;  %v684_v2 = vrot.slane %v680_v53, 4  ;;  %v691_v3 = vor.u32 %v689_v47, %v688_v55  ;;  %v693_v4 = vrot.slane %v688_v55, 4  ;;  %v1020_v45 = vld [vmem:[#allocation2 + $0x30] sm:$0xf]  ;;  %v1024_v56 = vld [vmem:[#allocation2 + $0x38] sm:$0x1] }
  0x3e   : > { %v700_v8 = vor.u32 %v698_v49, %v697_v60  ;;  %v701_v9 = vrot.slane %v697_v60, 4  ;;  %v708_v11 = vor.u32 %v706_v51, %v705_v61  ;;  %v710_v12 = vrot.slane %v705_v61, 4 }
  0x3f   : > { %v1000_v13 = vsel %vm3965_vm7, %v683_v0, %v999_v54  ;;  %v692_v14 = vsel %vm3971_vm8, %v684_v2, %v691_v3  ;;  %v1004_v15 = vsel %vm3853_vm3, %v693_v4, %v1003_v59  ;;  %v714_v23 = vrot.slane %v712_v16, 7  ;;  %v4012_v3 = vld [vmem:[%s3838_s30 + $0x38] sm:$0xff]  }
  0x40   : > { %1001 = vst [vmem:[#allocation2 + $0xc] sm:$0xf] %v1000_v13  ;;  %1002 = vst.msk [vmem:[#allocation2 + $0x10] sm:$0xf] %vm358_vm2, %v692_v14  ;;  %v1007_v19 = vsel %vm3965_vm7, %v700_v8, %v1006_v6  ;;  %v709_v20 = vsel %vm3971_vm8, %v701_v9, %v708_v11  ;;  %v1011_v21 = vsel %vm3853_vm3, %v710_v12, %v1010_v7  ;;  %v720_v24 = vshrl.u32 %v3153_v57, 16 }
  0x41   : > { %1005 = vst [vmem:[#allocation2 + $0x14] sm:$0x1] %v1004_v15  ;;  %1008 = vst [vmem:[#allocation2 + $0x18] sm:$0xf] %v1007_v19  ;;  %v723_v25 = vshll.u32 %v3153_v57, 16  ;;  %v3154_v26 = vpack.c.bf16 %v553_v62, %v553_v62  ;;  %v3155_v28 = vpack.c.bf16 %v554_v63, %v554_v63  ;;  %v3199_v29 = vunpack.c.l.bf16 %v3248_v17 }
  0x42   : > { %1009 = vst.msk [vmem:[#allocation2 + $0x1c] sm:$0xf] %vm358_vm2, %v709_v20  ;;  %1012 = vst [vmem:[#allocation2 + $0x20] sm:$0x1] %v1011_v21  ;;  %v3200_v30 = vunpack.c.h.bf16 %v3248_v17  ;;  %v3203_v31 = vunpack.c.l.bf16 %v3983_v18  ;;  %v717_v32 = vor.u32 %v715_v22, %v714_v23  ;;  %v718_v33 = vrot.slane %v714_v23, 4 }
  0x43   : > { %v722_v34 = vrot.slane %v720_v24, 7  ;;  %v729_v35 = vshrl.u32 %v3154_v26, 16  ;;  %v732_v37 = vshll.u32 %v3154_v26, 16  ;;  %v737_v38 = vshrl.u32 %v3155_v28, 16  ;;  %v1027_v26 = vld [vmem:[#allocation2 + $0x3c] sm:$0xf] }
  0x44   : > { %v740_v39 = vshll.u32 %v3155_v28, 16  ;;  %v485_v40 = vmul.f32 %v3199_v29, %v3937_v5  ;;  %v1014_v41 = vsel %vm3965_vm7, %v717_v32, %v1013_v27  ;;  %v486_v48 = vmul.f32 %v3200_v30, %v3937_v5 }
  0x45   : > { %v725_v42 = vor.u32 %v723_v25, %v722_v34  ;;  %v727_v43 = vrot.slane %v722_v34, 4  ;;  %v731_v44 = vrot.slane %v729_v35, 7  ;;  %1015 = vst [vmem:[#allocation2 + $0x24] sm:$0xf] %v1014_v41  ;;  %v739_v46 = vrot.slane %v737_v38, 7 }
  0x46   : > { %v523_v47 = vadd.f32 %v3943_v10, %v485_v40  ;;  %v487_v49 = vmul.f32 %v3203_v31, %v3937_v5  ;;  %v524_v61 = vadd.f32 %v3943_v10, %v486_v48  ;;  %v3204_v0 = vunpack.c.h.bf16 %v3983_v18  ;;  %v1031_v35 = vld [vmem:[#allocation2 + $0x44] sm:$0x1] }
  0x47   : > { %v726_v51 = vsel %vm3971_vm8, %v718_v33, %v725_v42  ;;  %v1018_v53 = vsel %vm3853_vm3, %v727_v43, %v1017_v36  ;;  %v734_v54 = vor.u32 %v732_v37, %v731_v44  ;;  %v735_v55 = vrot.slane %v731_v44, 4  ;;  %v1034_v43 = vld [vmem:[#allocation2 + $0x48] sm:$0xf] }
  0x48   : > { %1016 = vst.msk [vmem:[#allocation2 + $0x28] sm:$0xf] %vm358_vm2, %v726_v51  ;;  %1019 = vst [vmem:[#allocation2 + $0x2c] sm:$0x1] %v1018_v53  ;;  %v742_v57 = vor.u32 %v740_v39, %v739_v46  ;;  %v744_v59 = vrot.slane %v739_v46, 4  ;;  %v555_v60 = vmax.f32 %v523_v47, 0.0  ;;  %v525_v63 = vadd.f32 %v3943_v10, %v487_v49 }
  0x49   : > { %v1021_v62 = vsel %vm3965_vm7, %v734_v54, %v1020_v45  ;;  %v3207_v2 = vunpack.c.l.bf16 %v3250_v50  ;;  %v556_v8 = vmax.f32 %v524_v61, 0.0  ;;  %v488_v11 = vmul.f32 %v3204_v0, %v3937_v5  ;;  %v3252_v49 = vld [vmem:[%s3838_s30 + $0x40] sm:$0xff]  }
  0x4a   : > { %1022 = vst [vmem:[#allocation2 + $0x30] sm:$0xf] %v1021_v62  ;;  %v743_v4 = vsel %vm3971_vm8, %v735_v55, %v742_v57  ;;  %v1025_v6 = vsel %vm3853_vm3, %v744_v59, %v1024_v56  ;;  %v3156_v7 = vpack.c.bf16 %v555_v60, %v555_v60  ;;  %v557_v9 = vmax.f32 %v525_v63, 0.0  ;;  %v1038_v60 = vld [vmem:[#allocation2 + $0x50] sm:$0x1] }
  0x4b   : > { %1023 = vst.msk [vmem:[#allocation2 + $0x34] sm:$0xf] %vm358_vm2, %v743_v4  ;;  %1026 = vst [vmem:[#allocation2 + $0x38] sm:$0x1] %v1025_v6  ;;  %v489_v12 = vmul.f32 %v3207_v2, %v3937_v5  ;;  %v3208_v13 = vunpack.c.h.bf16 %v3250_v50  ;;  %v3157_v16 = vpack.c.bf16 %v556_v8, %v556_v8  ;;  %v3211_v17 = vunpack.c.l.bf16 %v4012_v3  ;;  %v1041_v6 = vld [vmem:[#allocation2 + $0x54] sm:$0xf] }
  0x4c   : > { %v746_v14 = vshrl.u32 %v3156_v7, 16  ;;  %v749_v15 = vshll.u32 %v3156_v7, 16  ;;  %v3158_v18 = vpack.c.bf16 %v557_v9, %v557_v9  ;;  %v526_v19 = vadd.f32 %v3943_v10, %v488_v11 }
  0x4d   : > { %v527_v20 = vadd.f32 %v3943_v10, %v489_v12  ;;  %v490_v21 = vmul.f32 %v3208_v13, %v3937_v5  ;;  %v754_v23 = vshrl.u32 %v3157_v16, 16  ;;  %v757_v24 = vshll.u32 %v3157_v16, 16 }
  0x4e   : > { %v748_v22 = vrot.slane %v746_v14, 7  ;;  %v491_v25 = vmul.f32 %v3211_v17, %v3937_v5  ;;  %v763_v27 = vshrl.u32 %v3158_v18, 16  ;;  %v766_v28 = vshll.u32 %v3158_v18, 16  ;;  %v3253_v17 = vld [vmem:[%s3838_s30 + $0x48] sm:$0xff]  }
  0x4f   : > { %v558_v29 = vmax.f32 %v526_v19, 0.0  ;;  %v559_v30 = vmax.f32 %v527_v20, 0.0  ;;  %v756_v33 = vrot.slane %v754_v23, 7  ;;  %v528_v34 = vadd.f32 %v3943_v10, %v490_v21  ;;  %v1045_v19 = vld [vmem:[#allocation2 + $0x5c] sm:$0x1] }
  0x50   : > { %v751_v31 = vor.u32 %v749_v15, %v748_v22  ;;  %v752_v32 = vrot.slane %v748_v22, 4  ;;  %v765_v36 = vrot.slane %v763_v27, 7  ;;  %v529_v39 = vadd.f32 %v3943_v10, %v491_v25 }
  0x51   : > { %v3159_v37 = vpack.c.bf16 %v558_v29, %v558_v29  ;;  %v3160_v38 = vpack.c.bf16 %v559_v30, %v559_v30  ;;  %v759_v41 = vor.u32 %v757_v24, %v756_v33  ;;  %v761_v42 = vrot.slane %v756_v33, 4 }
  0x52   : > { %v1028_v40 = vsel %vm3965_vm7, %v751_v31, %v1027_v26  ;;  %v560_v44 = vmax.f32 %v528_v34, 0.0  ;;  %v768_v45 = vor.u32 %v766_v28, %v765_v36  ;;  %v769_v46 = vrot.slane %v765_v36, 4  ;;  %v3254_v31 = vld [vmem:[%s3838_s30 + $0x50] sm:$0xff]   ;;  %v1048_v34 = vld [vmem:[#allocation2 + $0x60] sm:$0xf] }
  0x53   : > { %1029 = vst [vmem:[#allocation2 + $0x3c] sm:$0xf] %v1028_v40  ;;  %v771_v47 = vshrl.u32 %v3159_v37, 16  ;;  %v774_v48 = vshll.u32 %v3159_v37, 16  ;;  %v760_v50 = vsel %vm3971_vm8, %v752_v32, %v759_v41  ;;  %v1032_v51 = vsel %vm3853_vm3, %v761_v42, %v1031_v35 }
  0x54   : > { %v780_v53 = vshrl.u32 %v3160_v38, 16  ;;  %v783_v54 = vshll.u32 %v3160_v38, 16  ;;  %1030 = vst.msk [vmem:[#allocation2 + $0x40] sm:$0xf] %vm358_vm2, %v760_v50  ;;  %1033 = vst [vmem:[#allocation2 + $0x44] sm:$0x1] %v1032_v51  ;;  %v1035_v55 = vsel %vm3965_vm7, %v768_v45, %v1034_v43  ;;  %v3161_v57 = vpack.c.bf16 %v560_v44, %v560_v44 }
  0x55   : > { %v773_v56 = vrot.slane %v771_v47, 7  ;;  %v561_v59 = vmax.f32 %v529_v39, 0.0  ;;  %1036 = vst [vmem:[#allocation2 + $0x48] sm:$0xf] %v1035_v55  ;;  %v3212_v62 = vunpack.c.h.bf16 %v4012_v3  ;;  %v3215_v63 = vunpack.c.l.bf16 %v3252_v49 }
  0x56   : > { %v782_v61 = vrot.slane %v780_v53, 7  ;;  %v3216_v0 = vunpack.c.h.bf16 %v3252_v49  ;;  %v788_v7 = vshrl.u32 %v3161_v57, 16  ;;  %v791_v8 = vshll.u32 %v3161_v57, 16 }
  0x57   : > { %v776_v2 = vor.u32 %v774_v48, %v773_v56  ;;  %v778_v4 = vrot.slane %v773_v56, 4  ;;  %v3162_v12 = vpack.c.bf16 %v561_v59, %v561_v59  ;;  %v492_v13 = vmul.f32 %v3212_v62, %v3937_v5  ;;  %v1052_v59 = vld [vmem:[#allocation2 + $0x68] sm:$0x1] }
  0x58   : > { %v785_v9 = vor.u32 %v783_v54, %v782_v61  ;;  %v786_v11 = vrot.slane %v782_v61, 4  ;;  %v790_v3 = vrot.slane %v788_v7, 7  ;;  %v493_v16 = vmul.f32 %v3215_v63, %v3937_v5 }
  0x59   : > { %v777_v14 = vsel %vm3971_vm8, %v769_v46, %v776_v2  ;;  %v1039_v15 = vsel %vm3853_vm3, %v778_v4, %v1038_v60  ;;  %v797_v20 = vshrl.u32 %v3162_v12, 16  ;;  %v800_v21 = vshll.u32 %v3162_v12, 16  ;;  %v1055_v4 = vld [vmem:[#allocation2 + $0x6c] sm:$0xf] }
  0x5a   : > { %1037 = vst.msk [vmem:[#allocation2 + $0x4c] sm:$0xf] %vm358_vm2, %v777_v14  ;;  %1040 = vst [vmem:[#allocation2 + $0x50] sm:$0x1] %v1039_v15  ;;  %v1042_v18 = vsel %vm3965_vm7, %v785_v9, %v1041_v6  ;;  %v530_v22 = vadd.f32 %v3943_v10, %v492_v13  ;;  %v793_v23 = vor.u32 %v791_v8, %v790_v3  ;;  %v795_v24 = vrot.slane %v790_v3, 4 }
  0x5b   : > { %1043 = vst [vmem:[#allocation2 + $0x54] sm:$0xf] %v1042_v18  ;;  %v531_v25 = vadd.f32 %v3943_v10, %v493_v16  ;;  %v494_v26 = vmul.f32 %v3216_v0, %v3937_v5  ;;  %v799_v27 = vrot.slane %v797_v20, 7  ;;  %v3219_v29 = vunpack.c.l.bf16 %v3253_v17  ;;  %v1059_v15 = vld [vmem:[#allocation2 + $0x74] sm:$0x1] }
  0x5c   : > { %v562_v28 = vmax.f32 %v530_v22, 0.0  ;;  %v3220_v30 = vunpack.c.h.bf16 %v3253_v17  ;;  %v794_v32 = vsel %vm3971_vm8, %v786_v11, %v793_v23  ;;  %v1046_v33 = vsel %vm3853_vm3, %v795_v24, %v1045_v19  ;;  %v3255_v17 = vld [vmem:[%s3838_s30 + $0x58] sm:$0xff]  }
  0x5d   : > { %v563_v35 = vmax.f32 %v531_v25, 0.0  ;;  %v532_v36 = vadd.f32 %v3943_v10, %v494_v26  ;;  %1044 = vst.msk [vmem:[#allocation2 + $0x58] sm:$0xf] %vm358_vm2, %v794_v32  ;;  %1047 = vst [vmem:[#allocation2 + $0x5c] sm:$0x1] %v1046_v33  ;;  %v802_v37 = vor.u32 %v800_v21, %v799_v27  ;;  %v803_v39 = vrot.slane %v799_v27, 4 }
  0x5e   : > { %v3163_v38 = vpack.c.bf16 %v562_v28, %v562_v28  ;;  %v495_v40 = vmul.f32 %v3219_v29, %v3937_v5  ;;  %v496_v43 = vmul.f32 %v3220_v30, %v3937_v5  ;;  %v3223_v44 = vunpack.c.l.bf16 %v3254_v31  ;;  %v1062_v28 = vld [vmem:[#allocation2 + $0x78] sm:$0xf]  ;;  %v1066_v33 = vld [vmem:[#allocation2 + $0x80] sm:$0x1] }
  0x5f   : > { %v3164_v41 = vpack.c.bf16 %v563_v35, %v563_v35  ;;  %v564_v42 = vmax.f32 %v532_v36, 0.0  ;;  %v1049_v45 = vsel %vm3965_vm7, %v802_v37, %v1048_v34  ;;  %v3224_v57 = vunpack.c.h.bf16 %v3254_v31 }
  0x60   : > { %v805_v46 = vshrl.u32 %v3163_v38, 16  ;;  %v808_v47 = vshll.u32 %v3163_v38, 16  ;;  %v533_v48 = vadd.f32 %v3943_v10, %v495_v40  ;;  %1050 = vst [vmem:[#allocation2 + $0x60] sm:$0xf] %v1049_v45  ;;  %v534_v53 = vadd.f32 %v3943_v10, %v496_v43  ;;  %v3256_v40 = vld [vmem:[%s3838_s30 + $0x60] sm:$0xff]   ;;  %v3257_v45 = vld [vmem:[%s3838_s30 + $0x68] sm:$0xff]  }
  0x61   : > { %v814_v49 = vshrl.u32 %v3164_v41, 16  ;;  %v817_v50 = vshll.u32 %v3164_v41, 16  ;;  %v3165_v51 = vpack.c.bf16 %v564_v42, %v564_v42  ;;  %v497_v56 = vmul.f32 %v3223_v44, %v3937_v5 }
  0x62   : > { %v807_v54 = vrot.slane %v805_v46, 7  ;;  %v565_v55 = vmax.f32 %v533_v48, 0.0  ;;  %v566_v63 = vmax.f32 %v534_v53, 0.0  ;;  %v498_v25 = vmul.f32 %v3224_v57, %v3937_v5 }
  0x63   : > { %v816_v60 = vrot.slane %v814_v49, 7  ;;  %v822_v61 = vshrl.u32 %v3165_v51, 16  ;;  %v825_v62 = vshll.u32 %v3165_v51, 16  ;;  %v535_v7 = vadd.f32 %v3943_v10, %v497_v56 }
  0x64   : > { %v810_v0 = vor.u32 %v808_v47, %v807_v54  ;;  %v812_v2 = vrot.slane %v807_v54, 4  ;;  %v3166_v6 = vpack.c.bf16 %v565_v55, %v565_v55  ;;  %v3167_v12 = vpack.c.bf16 %v566_v63, %v566_v63  ;;  %v1069_v55 = vld [vmem:[#allocation2 + $0x84] sm:$0xf] }
  0x65   : > { %v819_v8 = vor.u32 %v817_v50, %v816_v60  ;;  %v820_v9 = vrot.slane %v816_v60, 4  ;;  %v824_v11 = vrot.slane %v822_v61, 7  ;;  %v567_v24 = vmax.f32 %v535_v7, 0.0 }
  0x66   : > { %v811_v13 = vsel %vm3971_vm8, %v803_v39, %v810_v0  ;;  %v1053_v14 = vsel %vm3853_vm3, %v812_v2, %v1052_v59  ;;  %v831_v3 = vshrl.u32 %v3166_v6, 16  ;;  %v834_v16 = vshll.u32 %v3166_v6, 16 }
  0x67   : > { %1051 = vst.msk [vmem:[#allocation2 + $0x64] sm:$0xf] %vm358_vm2, %v811_v13  ;;  %1054 = vst [vmem:[#allocation2 + $0x68] sm:$0x1] %v1053_v14  ;;  %v1056_v18 = vsel %vm3965_vm7, %v819_v8, %v1055_v4  ;;  %v827_v19 = vor.u32 %v825_v62, %v824_v11  ;;  %v829_v20 = vrot.slane %v824_v11, 4  ;;  %v839_v21 = vshrl.u32 %v3167_v12, 16 }
  0x68   : > { %1057 = vst [vmem:[#allocation2 + $0x6c] sm:$0xf] %v1056_v18  ;;  %v833_v22 = vrot.slane %v831_v3, 7  ;;  %v842_v23 = vshll.u32 %v3167_v12, 16  ;;  %v3227_v30 = vunpack.c.l.bf16 %v3255_v17  ;;  %v3168_v34 = vpack.c.bf16 %v567_v24, %v567_v24  ;;  %v1073_v13 = vld [vmem:[#allocation2 + $0x8c] sm:$0x1] }
  0x69   : > { %v828_v26 = vsel %vm3971_vm8, %v820_v9, %v827_v19  ;;  %v1060_v27 = vsel %vm3853_vm3, %v829_v20, %v1059_v15  ;;  %v841_v29 = vrot.slane %v839_v21, 7  ;;  %v536_v35 = vadd.f32 %v3943_v10, %v498_v25  ;;  %v3258_v25 = vld [vmem:[%s3838_s30 + $0x70] sm:$0xff]  }
  0x6a   : > { %1058 = vst.msk [vmem:[#allocation2 + $0x70] sm:$0xf] %vm358_vm2, %v828_v26  ;;  %1061 = vst [vmem:[#allocation2 + $0x74] sm:$0x1] %v1060_v27  ;;  %v836_v31 = vor.u32 %v834_v16, %v833_v22  ;;  %v837_v32 = vrot.slane %v833_v22, 4  ;;  %v499_v38 = vmul.f32 %v3227_v30, %v3937_v5  ;;  %v3228_v39 = vunpack.c.h.bf16 %v3255_v17 }
  0x6b   : > { %v844_v36 = vor.u32 %v842_v23, %v841_v29  ;;  %v846_v37 = vrot.slane %v841_v29, 4  ;;  %v848_v42 = vshrl.u32 %v3168_v34, 16  ;;  %v851_v43 = vshll.u32 %v3168_v34, 16 }
  0x6c   : > { %v1063_v41 = vsel %vm3965_vm7, %v836_v31, %v1062_v28  ;;  %v568_v44 = vmax.f32 %v536_v35, 0.0  ;;  %v537_v48 = vadd.f32 %v3943_v10, %v499_v38  ;;  %v500_v49 = vmul.f32 %v3228_v39, %v3937_v5  ;;  %v1076_v28 = vld [vmem:[#allocation2 + $0x90] sm:$0xf]  ;;  %v1080_v35 = vld [vmem:[#allocation2 + $0x98] sm:$0x1] }
  0x6d   : > { %1064 = vst [vmem:[#allocation2 + $0x78] sm:$0xf] %v1063_v41  ;;  %v845_v46 = vsel %vm3971_vm8, %v837_v32, %v844_v36  ;;  %v1067_v47 = vsel %vm3853_vm3, %v846_v37, %v1066_v33  ;;  %v850_v50 = vrot.slane %v848_v42, 7  ;;  %v3231_v53 = vunpack.c.l.bf16 %v3256_v40 }
  0x6e   : > { %1065 = vst.msk [vmem:[#allocation2 + $0x7c] sm:$0xf] %vm358_vm2, %v845_v46  ;;  %1068 = vst [vmem:[#allocation2 + $0x80] sm:$0x1] %v1067_v47  ;;  %v3169_v51 = vpack.c.bf16 %v568_v44, %v568_v44  ;;  %v3232_v54 = vunpack.c.h.bf16 %v3256_v40  ;;  %v569_v56 = vmax.f32 %v537_v48, 0.0  ;;  %v538_v57 = vadd.f32 %v3943_v10, %v500_v49  ;;  %v3259_v48 = vld [vmem:[%s3838_s30 + $0x78] sm:$0xff]  }
  0x6f   : > { %v3235_v59 = vunpack.c.l.bf16 %v3257_v45  ;;  %v3236_v60 = vunpack.c.h.bf16 %v3257_v45  ;;  %v853_v61 = vor.u32 %v851_v43, %v850_v50  ;;  %v854_v62 = vrot.slane %v850_v50, 4 }
  0x70   : > { %v856_v63 = vshrl.u32 %v3169_v51, 16  ;;  %v859_v0 = vshll.u32 %v3169_v51, 16  ;;  %v3170_v2 = vpack.c.bf16 %v569_v56, %v569_v56  ;;  %v570_v4 = vmax.f32 %v538_v57, 0.0 }
  0x71   : > { %v501_v6 = vmul.f32 %v3231_v53, %v3937_v5  ;;  %v502_v7 = vmul.f32 %v3232_v54, %v3937_v5  ;;  %v1070_v8 = vsel %vm3965_vm7, %v853_v61, %v1069_v55  ;;  %v503_v11 = vmul.f32 %v3235_v59, %v3937_v5  ;;  %v1083_v54 = vld [vmem:[#allocation2 + $0x9c] sm:$0xf] }
  0x72   : > { %v858_v9 = vrot.slane %v856_v63, 7  ;;  %v504_v12 = vmul.f32 %v3236_v60, %v3937_v5  ;;  %1071 = vst [vmem:[#allocation2 + $0x84] sm:$0xf] %v1070_v8  ;;  %v865_v14 = vshrl.u32 %v3170_v2, 16  ;;  %v868_v15 = vshll.u32 %v3170_v2, 16 }
  0x73   : > { %v3171_v3 = vpack.c.bf16 %v570_v4, %v570_v4  ;;  %v539_v16 = vadd.f32 %v3943_v10, %v501_v6  ;;  %v540_v19 = vadd.f32 %v3943_v10, %v502_v7  ;;  %v541_v20 = vadd.f32 %v3943_v10, %v503_v11  ;;  %v1090_v63 = vld [vmem:[#allocation2 + $0xa8] sm:$0xf] }
  0x74   : > { %v861_v17 = vor.u32 %v859_v0, %v858_v9  ;;  %v863_v18 = vrot.slane %v858_v9, 4  ;;  %v867_v21 = vrot.slane %v865_v14, 7  ;;  %v542_v38 = vadd.f32 %v3943_v10, %v504_v12 }
  0x75   : > { %v873_v22 = vshrl.u32 %v3171_v3, 16  ;;  %v876_v23 = vshll.u32 %v3171_v3, 16  ;;  %v571_v24 = vmax.f32 %v539_v16, 0.0  ;;  %v572_v29 = vmax.f32 %v540_v19, 0.0 }
  0x76   : > { %v862_v26 = vsel %vm3971_vm8, %v854_v62, %v861_v17  ;;  %v1074_v27 = vsel %vm3853_vm3, %v863_v18, %v1073_v13  ;;  %v573_v30 = vmax.f32 %v541_v20, 0.0  ;;  %v870_v31 = vor.u32 %v868_v15, %v867_v21  ;;  %v1087_v62 = vld [vmem:[#allocation2 + $0xa4] sm:$0x1] }
  0x77   : > { %1072 = vst.msk [vmem:[#allocation2 + $0x88] sm:$0xf] %vm358_vm2, %v862_v26  ;;  %1075 = vst [vmem:[#allocation2 + $0x8c] sm:$0x1] %v1074_v27  ;;  %v871_v32 = vrot.slane %v867_v21, 4  ;;  %v875_v33 = vrot.slane %v873_v22, 7  ;;  %v3172_v34 = vpack.c.bf16 %v571_v24, %v571_v24  ;;  %v3173_v36 = vpack.c.bf16 %v572_v29, %v572_v29 }
  0x78   : > { %v3174_v37 = vpack.c.bf16 %v573_v30, %v573_v30  ;;  %v3239_v39 = vunpack.c.l.bf16 %v3258_v25  ;;  %v1077_v40 = vsel %vm3965_vm7, %v870_v31, %v1076_v28  ;;  %v574_v57 = vmax.f32 %v542_v38, 0.0 }
  0x79   : > { %v878_v41 = vor.u32 %v876_v23, %v875_v33  ;;  %v880_v42 = vrot.slane %v875_v33, 4  ;;  %v882_v43 = vshrl.u32 %v3172_v34, 16  ;;  %1078 = vst [vmem:[#allocation2 + $0x90] sm:$0xf] %v1077_v40  ;;  %v885_v44 = vshll.u32 %v3172_v34, 16 }
  0x7a   : > { %v890_v45 = vshrl.u32 %v3173_v36, 16  ;;  %v893_v46 = vshll.u32 %v3173_v36, 16  ;;  %v899_v47 = vshrl.u32 %v3174_v37, 16  ;;  %v902_v53 = vshll.u32 %v3174_v37, 16  ;;  %v1094_v23 = vld [vmem:[#allocation2 + $0xb0] sm:$0x1] }
  0x7b   : > { %v879_v49 = vsel %vm3971_vm8, %v871_v32, %v878_v41  ;;  %v1081_v50 = vsel %vm3853_vm3, %v880_v42, %v1080_v35  ;;  %v884_v51 = vrot.slane %v882_v43, 7  ;;  %v505_v59 = vmul.f32 %v3239_v39, %v3937_v5 }
  0x7c   : > { %1079 = vst.msk [vmem:[#allocation2 + $0x94] sm:$0xf] %vm358_vm2, %v879_v49  ;;  %1082 = vst [vmem:[#allocation2 + $0x98] sm:$0x1] %v1081_v50  ;;  %v892_v55 = vrot.slane %v890_v45, 7  ;;  %v901_v56 = vrot.slane %v899_v47, 7  ;;  %v3240_v0 = vunpack.c.h.bf16 %v3258_v25  ;;  %v3243_v2 = vunpack.c.l.bf16 %v3259_v48 }
  0x7d   : > { %v887_v60 = vor.u32 %v885_v44, %v884_v51  ;;  %v888_v61 = vrot.slane %v884_v51, 4  ;;  %v3175_v8 = vpack.c.bf16 %v574_v57, %v574_v57  ;;  %v543_v11 = vadd.f32 %v3943_v10, %v505_v59 }
  0x7e   : > { %v895_v4 = vor.u32 %v893_v46, %v892_v55  ;;  %v897_v6 = vrot.slane %v892_v55, 4  ;;  %v904_v7 = vor.u32 %v902_v53, %v901_v56  ;;  %v506_v12 = vmul.f32 %v3240_v0, %v3937_v5  ;;  %v1101_v46 = vld [vmem:[#allocation2 + $0xbc] sm:$0x1]  ;;  %v1104_v53 = vld [vmem:[#allocation2 + $0xc0] sm:$0xf] }
  0x7f   : > { %v1084_v9 = vsel %vm3965_vm7, %v887_v60, %v1083_v54  ;;  %v907_v3 = vshrl.u32 %v3175_v8, 16  ;;  %v910_v16 = vshll.u32 %v3175_v8, 16  ;;  %v575_v17 = vmax.f32 %v543_v11, 0.0 }
  0x80   : > { %1085 = vst [vmem:[#allocation2 + $0x9c] sm:$0xf] %v1084_v9  ;;  %v896_v13 = vsel %vm3971_vm8, %v888_v61, %v895_v4  ;;  %v1088_v14 = vsel %vm3853_vm3, %v897_v6, %v1087_v62  ;;  %v1091_v15 = vsel %vm3965_vm7, %v904_v7, %v1090_v63  ;;  %v544_v18 = vadd.f32 %v3943_v10, %v506_v12  ;;  %v1108_v63 = vld [vmem:[#allocation2 + $0xc8] sm:$0x1] }
  0x81   : > { %1086 = vst.msk [vmem:[#allocation2 + $0xa0] sm:$0xf] %vm358_vm2, %v896_v13  ;;  %1089 = vst [vmem:[#allocation2 + $0xa4] sm:$0x1] %v1088_v14  ;;  %v507_v19 = vmul.f32 %v3243_v2, %v3937_v5  ;;  %v905_v20 = vrot.slane %v901_v56, 4  ;;  %v909_v21 = vrot.slane %v907_v3, 7  ;;  %v3244_v22 = vunpack.c.h.bf16 %v3259_v48 }
  0x82   : > { %1092 = vst [vmem:[#allocation2 + $0xa8] sm:$0xf] %v1091_v15  ;;  %v3176_v24 = vpack.c.bf16 %v575_v17, %v575_v17  ;;  %v576_v25 = vmax.f32 %v544_v18, 0.0 }
  0x83   : > { %v545_v26 = vadd.f32 %v3943_v10, %v507_v19  ;;  %v912_v27 = vor.u32 %v910_v16, %v909_v21  ;;  %v914_v28 = vrot.slane %v909_v21, 4  ;;  %v508_v29 = vmul.f32 %v3244_v22, %v3937_v5  ;;  %v1097_v5 = vld [vmem:[#allocation2 + $0xb4] sm:$0xf] }
  0x84   : > { %v916_v30 = vshrl.u32 %v3176_v24, 16  ;;  %v919_v31 = vshll.u32 %v3176_v24, 16  ;;  %v3177_v32 = vpack.c.bf16 %v576_v25, %v576_v25 }
  0x85   : > { %v577_v33 = vmax.f32 %v545_v26, 0.0  ;;  %v913_v34 = vsel %vm3971_vm8, %v905_v20, %v912_v27  ;;  %v1095_v35 = vsel %vm3853_vm3, %v914_v28, %v1094_v23  ;;  %v546_v36 = vadd.f32 %v3943_v10, %v508_v29 }
  0x86   : > { %1093 = vst.msk [vmem:[#allocation2 + $0xac] sm:$0xf] %vm358_vm2, %v913_v34  ;;  %1096 = vst [vmem:[#allocation2 + $0xb0] sm:$0x1] %v1095_v35  ;;  %v918_v37 = vrot.slane %v916_v30, 7  ;;  %v924_v38 = vshrl.u32 %v3177_v32, 16 }
  0x87   : > { %v927_v39 = vshll.u32 %v3177_v32, 16  ;;  %v3178_v40 = vpack.c.bf16 %v577_v33, %v577_v33  ;;  %v578_v41 = vmax.f32 %v546_v36, 0.0 }
  0x88   : > { %v921_v42 = vor.u32 %v919_v31, %v918_v37  ;;  %v922_v43 = vrot.slane %v918_v37, 4  ;;  %v926_v44 = vrot.slane %v924_v38, 7 }
  0x89   : > { %v933_v45 = vshrl.u32 %v3178_v40, 16  ;;  %v936_v47 = vshll.u32 %v3178_v40, 16  ;;  %v3179_v48 = vpack.c.bf16 %v578_v41, %v578_v41 }
  0x8a   : > { %v1098_v49 = vsel %vm3965_vm7, %v921_v42, %v1097_v5  ;;  %v929_v10 = vor.u32 %v927_v39, %v926_v44  ;;  %v931_v50 = vrot.slane %v926_v44, 4 }
  0x8b   : > { %v935_v51 = vrot.slane %v933_v45, 7  ;;  %1099 = vst [vmem:[#allocation2 + $0xb4] sm:$0xf] %v1098_v49  ;;  %v941_v54 = vshrl.u32 %v3179_v48, 16  ;;  %v944_v55 = vshll.u32 %v3179_v48, 16 }
  0x8c   : > { %v930_v56 = vsel %vm3971_vm8, %v922_v43, %v929_v10  ;;  %v1102_v57 = vsel %vm3853_vm3, %v931_v50, %v1101_v46 }
  0x8d   : > { %v938_v59 = vor.u32 %v936_v47, %v935_v51  ;;  %1100 = vst.msk [vmem:[#allocation2 + $0xb8] sm:$0xf] %vm358_vm2, %v930_v56  ;;  %1103 = vst [vmem:[#allocation2 + $0xbc] sm:$0x1] %v1102_v57  ;;  %v939_v60 = vrot.slane %v935_v51, 4  ;;  %v943_v61 = vrot.slane %v941_v54, 7 }
  0x8f   : > { %v1105_v62 = vsel %vm3965_vm7, %v938_v59, %v1104_v53  ;;  %v946_v0 = vor.u32 %v944_v55, %v943_v61  ;;  %v948_v2 = vrot.slane %v943_v61, 4 }
  0x90   : > { %1106 = vst [vmem:[#allocation2 + $0xc0] sm:$0xf] %v1105_v62 }
  0x91   : > { %v947_v4 = vsel %vm3971_vm8, %v939_v60, %v946_v0  ;;  %v1109_v6 = vsel %vm3853_vm3, %v948_v2, %v1108_v63 }
  0x92   : > { %1107 = vst.msk [vmem:[#allocation2 + $0xc4] sm:$0xf] %vm358_vm2, %v947_v4  ;;  %1110 = vst [vmem:[#allocation2 + $0xc8] sm:$0x1] %v1109_v6 }
  0x93 PF: > { %v3703_v52 = vld [vmem:[%s4790_s3 + $0x10] sm:$0xff]   ;;  %s3180_s27 = smul.u32 96, %s3753_s18  ;;  %v4162_v7 = vld [vmem:[%s4790_s3 + $0x40] sm:$0xff]   ;;  %v3705_v1 = vld [vmem:[%s4790_s3 + $0x18] sm:$0xff]   ;;  %vm1149_vm9 = vsmask.f32 3328 }
  0x94   : > { %3350 = vmatprep.subr.bf16.mxu1 %v3703_v52  ;;  %3430 = vmatprep.subr.bf16.mxu0 %v4162_v7  ;;  %v4171_v58 = vld [vmem:[%s4790_s3 + $0x48] sm:$0xff]   ;;  %vm1150_vm10 = vsmask.f32 7440  ;;  %v4194_v18 = vld [vmem:[%s4790_s3] sm:$0xff]   ;;  %v4199_v19 = vld [vmem:[%s4790_s3 + $0x50] sm:$0xff]   ;;  %vm1384_vm12 = vcmask 261120  }
  0x95   : > { %3351 = vmatpush3.bf16.msra.mxu1 %v3703_v52  ;;  %3431 = vmatpush3.bf16.msra.mxu0 %v4162_v7  ;;  %s4174_s18 = scalar_lea.vmem [#allocation2], %s3180_s27  ;;  %vm4217_vm11 = vmor %vm1149_vm9, %vm1150_vm10  ;;  %vm1687_vm13 = vcmask 1042432   ;;  %vm1688_vm14 = vcmask 1046532  }
  0x96   : > { %3352 = vmatprep.subr.bf16.mxu1 %v3705_v1  ;;  %3432 = vmatprep.subr.bf16.mxu0 %v4171_v58  ;;  %vm4306_vm15 = vmor %vm1687_vm13, %vm1688_vm14 }
  0x99   : > { %v4177_v8 = vld [vmem:[%s4174_s18] sm:$0xf]  ;;  %v4180_v9 = vld [vmem:[%s4174_s18 + $0x4] sm:$0xf]  ;;  %v4183_v11 = vld [vmem:[%s4174_s18 + $0x8] sm:$0x1]  ;;  %3353 = vmatpush3.bf16.msra.mxu1 %v3705_v1  ;;  %3433 = vmatpush3.bf16.msra.mxu0 %v4171_v58 }
  0x9a   : > { %v1153_v12 = vshrl.u32 %v4177_v8, 16  ;;  %v1156_v13 = vshll.u32 %v4177_v8, 16  ;;  %v1162_v14 = vshll.u32 %v4180_v9, 16  ;;  %v1166_v15 = vshrl.u32 %v4180_v9, 16  ;;  %v4203_v23 = vld [vmem:[%s4174_s18 + $0xc] sm:$0xf]  ;;  %3370 = vmatprep.subr.bf16.mxu1 %v4194_v18  ;;  %3450 = vmatprep.subr.bf16.mxu0 %v4199_v19 }
  0x9b   : > { %v1172_v3 = vshll.u32 %v4183_v11, 16  ;;  %v4207_v25 = vld [vmem:[%s4174_s18 + $0x10] sm:$0xf]  ;;  %v4210_v26 = vld [vmem:[%s4174_s18 + $0x14] sm:$0x1]  ;;  %v1177_v27 = vshrl.u32 %v4203_v23, 16 }
  0x9c   : > { %v1155_v16 = vrot.slane %v1153_v12, 4  ;;  %v1158_v17 = vrot.slane %v1156_v13, 5  ;;  %v1164_v20 = vrot.slane %v1162_v14, 5  ;;  %v1168_v21 = vrot.slane %v1166_v15, 4  ;;  %v4225_v5 = vld [vmem:[%s4174_s18 + $0x18] sm:$0xf] }
  0x9d   : > { %v1174_v22 = vrot.slane %v1172_v3, 5  ;;  %v1180_v28 = vshll.u32 %v4203_v23, 16  ;;  %v1186_v31 = vshll.u32 %v4207_v25, 16  ;;  %v1190_v32 = vshrl.u32 %v4207_v25, 16  ;;  %v4231_v44 = vld [vmem:[%s4174_s18 + $0x1c] sm:$0xf] }
  0x9e   : > { %v1159_v24 = vor.u32 %v1158_v17, %v1155_v16  ;;  %v1169_v30 = vor.u32 %v1168_v21, %v1164_v20  ;;  %v1196_v33 = vshll.u32 %v4210_v26, 16  ;;  %v1179_v35 = vrot.slane %v1177_v27, 4  ;;  %v4234_v45 = vld [vmem:[%s4174_s18 + $0x20] sm:$0x1]  ;;  %v4242_v50 = vld [vmem:[%s4174_s18 + $0x24] sm:$0xf] }
  0x9f   : > { %v1182_v36 = vrot.slane %v1180_v28, 5  ;;  %v1188_v38 = vrot.slane %v1186_v31, 5  ;;  %v1192_v39 = vrot.slane %v1190_v32, 4  ;;  %v1702_v43 = vrot.slane %v4210_v26, 5  ;;  %v4245_v51 = vld [vmem:[%s4174_s18 + $0x28] sm:$0xf] }
  0xa0   : > { %v1160_v34 = vrot.slane %v1159_v24, 4  ;;  %v1170_v37 = vrot.slane %v1169_v30, 4  ;;  %v1198_v40 = vrot.slane %v1196_v33, 5  ;;  %v1201_v46 = vshrl.u32 %v4225_v5, 16  ;;  %v4249_v57 = vld [vmem:[%s4174_s18 + $0x2c] sm:$0x1] }
  0xa1   : > { %v1183_v42 = vor.u32 %v1182_v36, %v1179_v35  ;;  %v1193_v48 = vor.u32 %v1192_v39, %v1188_v38  ;;  %v1204_v49 = vshll.u32 %v4225_v5, 16  ;;  %v1210_v10 = vshll.u32 %v4231_v44, 16  ;;  %v4261_v13 = vld [vmem:[%s4174_s18 + $0x30] sm:$0xf]  ;;  %v3711_v14 = vld [vmem:[%s4790_s3 + $0x8] sm:$0xff]  }
  0xa2   : > { %v1165_v41 = vsel %vm4217_vm11, %v1160_v34, %v1164_v20  ;;  %v1175_v47 = vsel %vm4217_vm11, %v1170_v37, %v1174_v22  ;;  %v1203_v55 = vrot.slane %v1201_v46, 4  ;;  %v1214_v56 = vshrl.u32 %v4231_v44, 16  ;;  %v4269_v20 = vld [vmem:[%s4174_s18 + $0x34] sm:$0xf]  ;;  %v4274_v28 = vld [vmem:[%s4174_s18 + $0x38] sm:$0x1] }
  0xa3   : > { %v3015_v53 = vcombine.low %v1165_v41, %v1175_v47  ;;  %v1184_v54 = vrot.slane %v1183_v42, 4  ;;  %v1194_v59 = vrot.slane %v1193_v48, 4  ;;  %v1206_v60 = vrot.slane %v1204_v49, 5  ;;  %v4293_v49 = vld [vmem:[%s4174_s18 + $0x3c] sm:$0xf] }
  0xa4   : > { %v1212_v61 = vrot.slane %v1210_v10, 5  ;;  %v1220_v62 = vshll.u32 %v4234_v45, 16  ;;  %v1216_v0 = vrot.slane %v1214_v56, 4  ;;  %v1706_v2 = vrot.slane %v4231_v44, 5  ;;  %v4298_v10 = vld [vmem:[%s4790_s3 + $0x20] sm:$0xff]  }
  0xa5   : > { %3354 = vmatprep.mubr.msk.bf16.mxu1 %vm1384_vm12, %v3015_v53  ;;  %v1189_v63 = vsel %vm4217_vm11, %v1184_v54, %v1188_v38  ;;  %v1709_v4 = vrot.slane %v4234_v45, 5  ;;  %v1199_v6 = vsel %vm4217_vm11, %v1194_v59, %v1198_v40  ;;  %v1207_v52 = vor.u32 %v1206_v60, %v1203_v55  ;;  %v4360_v26 = vld [vmem:[%s4174_s18 + $0x50] sm:$0x1] }
  0xa6   : > { %v1222_v1 = vrot.slane %v1220_v62, 5  ;;  %v1225_v12 = vshrl.u32 %v4242_v50, 16  ;;  %v3016_v15 = vcombine.low %v1189_v63, %v1199_v6  ;;  %v1217_v3 = vor.u32 %v1216_v0, %v1212_v61 }
  0xa7   : > { %v1228_v16 = vshll.u32 %v4242_v50, 16  ;;  %v1234_v17 = vshll.u32 %v4245_v51, 16  ;;  %v1208_v21 = vrot.slane %v1207_v52, 4  ;;  %v1238_v24 = vshrl.u32 %v4245_v51, 16  ;;  %v4316_v52 = vld [vmem:[%s4174_s18 + $0x40] sm:$0xf] }
  0xa8   : > { %v1227_v22 = vrot.slane %v1225_v12, 4  ;;  %v1244_v27 = vshll.u32 %v4249_v57, 16  ;;  %3434 = vmatprep.mubr.msk.bf16.mxu0 %vm1384_vm12, %v3016_v15  ;;  %3355 = vmatmul.mubr.msk.bf16.vlgmr.msra.gmra.mrb[0].mxu1 %vm1384_vm12, %v3016_v15  ;;  %v1218_v30 = vrot.slane %v1217_v3, 4  ;;  %v1249_v33 = vshrl.u32 %v4261_v13, 16 }
  0xa9   : > { %v1230_v31 = vrot.slane %v1228_v16, 5  ;;  %v1236_v32 = vrot.slane %v1234_v17, 5  ;;  %3371 = vmatpush3.bf16.msra.mxu1 %v4194_v18  ;;  %v1213_v34 = vsel %vm4217_vm11, %v1208_v21, %v1212_v61  ;;  %v1240_v35 = vrot.slane %v1238_v24, 4  ;;  %v3710_v18 = vld [vmem:[%s4790_s3 + $0x58] sm:$0xff]   ;;  %v4327_v16 = vld [vmem:[%s4174_s18 + $0x44] sm:$0x1] }
  0xaa   : > { %v1246_v36 = vrot.slane %v1244_v27, 5  ;;  %v1252_v37 = vshll.u32 %v4261_v13, 16  ;;  %v1223_v38 = vsel %vm4217_vm11, %v1218_v30, %v1222_v1  ;;  %v1251_v40 = vrot.slane %v1249_v33, 4  ;;  %3372 = vmatprep.subr.bf16.mxu1 %v3711_v14  ;;  %v4336_v27 = vld [vmem:[%s4174_s18 + $0x48] sm:$0xf] }
  0xab   : > { %v1231_v39 = vor.u32 %v1230_v31, %v1227_v22  ;;  %v1258_v41 = vshll.u32 %v4269_v20, 16  ;;  %v4286_v42 = vcombine.low %v1213_v34, %v1223_v38  ;;  %v1241_v46 = vor.u32 %v1240_v35, %v1236_v32 }
  0xac   : > { %v1254_v47 = vrot.slane %v1252_v37, 5  ;;  %v1262_v48 = vshrl.u32 %v4269_v20, 16  ;;  %v1268_v55 = vshll.u32 %v4274_v28, 16  ;;  %v3052_v62 = vrot.slane %v4203_v23, 9 }
  0xad   : > { %v1232_v53 = vrot.slane %v1231_v39, 4  ;;  %v1260_v54 = vrot.slane %v1258_v41, 5  ;;  %3435 = vmatmul.mubr.msk.bf16.vlgmr.msra.gmra.mrb[0].mxu0 %vm1384_vm12, %v4286_v42  ;;  %3358 = vmatprep.mubr.msk.bf16.mxu1 %vm1384_vm12, %v4286_v42  ;;  %v1242_v56 = vrot.slane %v1241_v46, 4  ;;  %v1699_v6 = vrot.slane %v4207_v25, 5  ;;  %v4357_v46 = vld [vmem:[%s4174_s18 + $0x4c] sm:$0xf] }
  0xae   : > { %v1255_v59 = vor.u32 %v1254_v47, %v1251_v40  ;;  %v1264_v60 = vrot.slane %v1262_v48, 4  ;;  %3451 = vmatpush3.bf16.msra.mxu0 %v4199_v19  ;;  %v1270_v0 = vrot.slane %v1268_v55, 5  ;;  %v1273_v1 = vshrl.u32 %v4293_v49, 16  ;;  %3373 = vmatpush3.bf16.msra.mxu1 %v3711_v14  ;;  %v4324_v19 = vld [vmem:[%s4790_s3 + $0x60] sm:$0xff]  }
  0xaf   : > { %v1237_v63 = vsel %vm4217_vm11, %v1232_v53, %v1236_v32  ;;  %v1247_v12 = vsel %vm4217_vm11, %v1242_v56, %v1246_v36  ;;  %3452 = vmatprep.subr.bf16.mxu0 %v3710_v18  ;;  %v1276_v17 = vshll.u32 %v4293_v49, 16  ;;  %3390 = vmatprep.subr.bf16.mxu1 %v4298_v10  ;;  %v1700_v14 = vsel %vm4306_vm15, %v3052_v62, %v1699_v6 }
  0xb0   : > { %v1256_v15 = vrot.slane %v1255_v59, 4  ;;  %v1265_v3 = vor.u32 %v1264_v60, %v1260_v54  ;;  %v4331_v21 = vcombine.low %v1237_v63, %v1247_v12  ;;  %v1701_v22 = vrot.slane %v1699_v6, 4  ;;  %v4374_v59 = vld [vmem:[%s4174_s18 + $0x54] sm:$0xf] }
  0xb1   : > { %v1275_v24 = vrot.slane %v1273_v1, 4  ;;  %v1278_v32 = vrot.slane %v1276_v17, 5  ;;  %v1282_v33 = vshll.u32 %v4316_v52, 16  ;;  %v1286_v35 = vshrl.u32 %v4316_v52, 16 }
  0xb2   : > { %v1261_v30 = vsel %vm4217_vm11, %v1256_v15, %v1260_v54  ;;  %v1266_v31 = vrot.slane %v1265_v3, 4  ;;  %3438 = vmatprep.mubr.msk.bf16.mxu0 %vm1384_vm12, %v4331_v21  ;;  %3359 = vmatmul.mubr.msk.bf16.gmra.mrb[4].mxu1 %vm1384_vm12, %v4331_v21  ;;  %v1703_v34 = vsel %vm4306_vm15, %v1701_v22, %v1702_v43  ;;  %v1292_v36 = vshll.u32 %v4327_v16, 16  ;;  %v4392_v15 = vld [vmem:[%s4174_s18 + $0x58] sm:$0xf] }
  0xb3   : > { %v3053_v37 = vrot.slane %v4225_v5, 9  ;;  %3453 = vmatpush3.bf16.msra.mxu0 %v3710_v18  ;;  %v4354_v39 = vcombine.low %v1700_v14, %v1703_v34  ;;  %v1279_v40 = vor.u32 %v1278_v32, %v1275_v24  ;;  %v1284_v41 = vrot.slane %v1282_v33, 5  ;;  %v4402_v34 = vld [vmem:[%s4174_s18 + $0x5c] sm:$0x1] }
  0xb4   : > { %v1271_v38 = vsel %vm4217_vm11, %v1266_v31, %v1270_v0  ;;  %3470 = vmatprep.subr.bf16.mxu0 %v4324_v19  ;;  %v1288_v47 = vrot.slane %v1286_v35, 4  ;;  %v1294_v48 = vrot.slane %v1292_v36, 5  ;;  %v1708_v54 = vrot.slane %v1706_v2, 4 }
  0xb5   : > { %v4362_v43 = vcombine.low %v1261_v30, %v1271_v38  ;;  %v1707_v53 = vsel %vm4306_vm15, %v3053_v37, %v1706_v2  ;;  %v1280_v18 = vrot.slane %v1279_v40, 4  ;;  %v1297_v55 = vshrl.u32 %v4336_v27, 16 }
  0xb6   : > { %v1300_v56 = vshll.u32 %v4336_v27, 16  ;;  %v1289_v60 = vor.u32 %v1288_v47, %v1284_v41  ;;  %v1306_v62 = vshll.u32 %v4357_v46, 16  ;;  %v1310_v63 = vshrl.u32 %v4357_v46, 16 }
  0xb7   : > { %3439 = vmatmul.mubr.msk.bf16.gmra.mrb[4].mxu0 %vm1384_vm12, %v4362_v43  ;;  %3362 = vmatprep.mubr.msk.bf16.mxu1 %vm1384_vm12, %v4362_v43  ;;  %v1316_v0 = vshll.u32 %v4360_v26, 16  ;;  %v1285_v2 = vsel %vm4217_vm11, %v1280_v18, %v1284_v41  ;;  %v1710_v6 = vsel %vm4306_vm15, %v1708_v54, %v1709_v4  ;;  %v1299_v1 = vrot.slane %v1297_v55, 4  ;;  %v3715_v41 = vld [vmem:[%s4790_s3 + $0x68] sm:$0xff]  }
  0xb8   : > { %3454 = vmatprep.mubr.msk.bf16.mxu0 %vm1384_vm12, %v4354_v39  ;;  %v1302_v12 = vrot.slane %v1300_v56, 5  ;;  %v1290_v3 = vrot.slane %v1289_v60, 4  ;;  %v4394_v17 = vcombine.low %v1707_v53, %v1710_v6  ;;  %v1308_v14 = vrot.slane %v1306_v62, 5 }
  0xb9   : > { %v1312_v22 = vrot.slane %v1310_v63, 4  ;;  %v1318_v30 = vrot.slane %v1316_v0, 5  ;;  %v3054_v31 = vrot.slane %v4242_v50, 9  ;;  %v1713_v32 = vrot.slane %v4245_v51, 5 }
  0xba   : > { %v1303_v24 = vor.u32 %v1302_v12, %v1299_v1  ;;  %v1295_v45 = vsel %vm4217_vm11, %v1290_v3, %v1294_v48  ;;  %v1716_v4 = vrot.slane %v4249_v57, 5  ;;  %v1321_v35 = vshrl.u32 %v4374_v59, 16 }
  0xbb   : > { %v1313_v33 = vor.u32 %v1312_v22, %v1308_v14  ;;  %v4405_v36 = vcombine.low %v1285_v2, %v1295_v45  ;;  %v1714_v38 = vsel %vm4306_vm15, %v3054_v31, %v1713_v32  ;;  %v1715_v40 = vrot.slane %v1713_v32, 4 }
  0xbc   : > { %v1304_v37 = vrot.slane %v1303_v24, 4  ;;  %v1323_v48 = vrot.slane %v1321_v35, 4  ;;  %v1324_v53 = vshll.u32 %v4374_v59, 16  ;;  %v1330_v57 = vshll.u32 %v4392_v15, 16 }
  0xbd   : > { %v1314_v47 = vrot.slane %v1313_v33, 4  ;;  %3363 = vmatmul.mubr.msk.bf16.gmra.mrb[8].mxu1 %vm1384_vm12, %v4405_v36  ;;  %v1717_v54 = vsel %vm4306_vm15, %v1715_v40, %v1716_v4  ;;  %v1334_v55 = vshrl.u32 %v4392_v15, 16  ;;  %v1340_v56 = vshll.u32 %v4402_v34, 16 }
  0xbe   : > { %v1309_v18 = vsel %vm4217_vm11, %v1304_v37, %v1308_v14  ;;  %v4426_v62 = vcombine.low %v1714_v38, %v1717_v54  ;;  %v1326_v63 = vrot.slane %v1324_v53, 5  ;;  %v1332_v0 = vrot.slane %v1330_v57, 5  ;;  %v4467_v54 = vld [vmem:[%s4174_s18 + $0x64] sm:$0xf] }
  0xbf   : > { %3455 = vmatmul.mubr.msk.bf16.vlgmr.msra.gmra.mrb[0].mxu0 %vm1384_vm12, %v4394_v17  ;;  %v1319_v60 = vsel %vm4217_vm11, %v1314_v47, %v1318_v30  ;;  %v1336_v6 = vrot.slane %v1334_v55, 4  ;;  %v1342_v1 = vrot.slane %v1340_v56, 5  ;;  %v3055_v12 = vrot.slane %v4261_v13, 9 }
  0xc0   : > { %3471 = vmatpush3.bf16.msra.mxu0 %v4324_v19  ;;  %v4429_v2 = vcombine.low %v1309_v18, %v1319_v60  ;;  %3458 = vmatprep.mubr.msk.bf16.mxu0 %vm1384_vm12, %v4426_v62  ;;  %v1327_v3 = vor.u32 %v1326_v63, %v1323_v48  ;;  %v1720_v14 = vrot.slane %v4269_v20, 5  ;;  %v1723_v22 = vrot.slane %v4274_v28, 5  ;;  %v4440_v19 = vld [vmem:[%s4790_s3 + $0x70] sm:$0xff]  }
  0xc1   : > { %v3056_v24 = vrot.slane %v4293_v49, 9  ;;  %3472 = vmatprep.subr.bf16.mxu0 %v3715_v41  ;;  %v1337_v30 = vor.u32 %v1336_v6, %v1332_v0  ;;  %v1727_v31 = vrot.slane %v4316_v52, 5  ;;  %v1730_v32 = vrot.slane %v4327_v16, 5 }
  0xc2   : > { %3366 = vmatprep.mubr.msk.bf16.mxu1 %vm1384_vm12, %v4429_v2  ;;  %v3057_v45 = vrot.slane %v4336_v27, 9  ;;  %v1328_v33 = vrot.slane %v1327_v3, 4  ;;  %v1721_v28 = vsel %vm4306_vm15, %v3055_v12, %v1720_v14  ;;  %v1722_v4 = vrot.slane %v1720_v14, 4  ;;  %v4487_v12 = vld [vmem:[%s4174_s18 + $0x60] sm:$0xf] }
  0xc3   : > { %v1734_v35 = vrot.slane %v4357_v46, 5  ;;  %v1338_v37 = vrot.slane %v1337_v30, 4  ;;  %v1728_v38 = vsel %vm4306_vm15, %v3056_v24, %v1727_v31  ;;  %v1729_v40 = vrot.slane %v1727_v31, 4  ;;  %v4490_v3 = vld [vmem:[%s4174_s18 + $0x68] sm:$0x1] }
  0xc4   : > { %v1737_v47 = vrot.slane %v4360_v26, 5  ;;  %3473 = vmatpush3.bf16.msra.mxu0 %v3715_v41  ;;  %v1333_v16 = vsel %vm4217_vm11, %v1328_v33, %v1332_v0  ;;  %v1724_v48 = vsel %vm4306_vm15, %v1722_v4, %v1723_v22  ;;  %v3033_v26 = vcombine.low %v4177_v8, %v4180_v9 }
  0xc5   : > { %v1736_v53 = vrot.slane %v1734_v35, 4  ;;  %3490 = vmatprep.subr.bf16.mxu0 %v4440_v19  ;;  %v1343_v57 = vsel %vm4217_vm11, %v1338_v37, %v1342_v1  ;;  %v4460_v18 = vcombine.low %v1721_v28, %v1724_v48  ;;  %v1731_v41 = vsel %vm4306_vm15, %v1729_v40, %v1730_v32 }
  0xc6   : > { %v4469_v55 = vcombine.low %v1333_v16, %v1343_v57  ;;  %v4471_v56 = vcombine.low %v1728_v38, %v1731_v41  ;;  %v3058_v60 = vrot.slane %v4374_v59, 9  ;;  %v1735_v63 = vsel %vm4306_vm15, %v3057_v45, %v1734_v35 }
  0xc7   : > { %3459 = vmatmul.mubr.msk.bf16.gmra.mrb[4].mxu0 %vm1384_vm12, %v4460_v18  ;;  %v1738_v0 = vsel %vm4306_vm15, %v1736_v53, %v1737_v47  ;;  %v1741_v6 = vrot.slane %v4392_v15, 5  ;;  %v1744_v1 = vrot.slane %v4402_v34, 5  ;;  %v2222_v14 = vrot.slane %v4467_v54, 5  ;;  %v4525_v47 = vld [vmem:[%s4174_s18 + $0x70] sm:$0xf] }
  0xc8   : > { %3367 = vmatmul.mubr.msk.bf16.gmra.mrb[12].mxu1 %vm1384_vm12, %v4469_v55  ;;  %3462 = vmatprep.mubr.msk.bf16.mxu0 %vm1384_vm12, %v4471_v56  ;;  %v1695_v34 = vrot.slane %v4183_v11, 5  ;;  %v4499_v30 = vcombine.low %v4203_v23, %v4207_v25  ;;  %v4501_v31 = vcombine.low %v1735_v63, %v1738_v0  ;;  %v3051_v32 = vrot.slane %v4177_v8, 9  ;;  %v4510_v11 = vld [vmem:[%s4174_s18 + $0x6c] sm:$0xf]  ;;  %v3724_v0 = vld [vmem:[%s4790_s3 + $0x30] sm:$0xff]  }
  0xc9   : > { %3374 = vmatprep.mubr.msk.bf16.mxu1 %vm1384_vm12, %v3033_v26  ;;  %v1742_v22 = vsel %vm4306_vm15, %v3058_v60, %v1741_v6  ;;  %v1743_v24 = vrot.slane %v1741_v6, 4  ;;  %v3099_v33 = vrot.slane %v4487_v12, 9  ;;  %v2225_v28 = vrot.slane %v4490_v3, 5 }
  0xca   : > { %v1692_v4 = vrot.slane %v4180_v9, 5  ;;  %v2224_v23 = vrot.slane %v2222_v14, 4  ;;  %v2500_v25 = vshrl.u32 %v4510_v11, 16  ;;  %v2503_v37 = vshll.u32 %v4510_v11, 16  ;;  %v3719_v9 = vld [vmem:[%s4790_s3 + $0x28] sm:$0xff]  }
  0xcb   : > { %v1745_v45 = vsel %vm4306_vm15, %v1743_v24, %v1744_v1  ;;  %v4518_v8 = vcombine.low %v4225_v5, %v4231_v44  ;;  %v2513_v16 = vshrl.u32 %v4525_v47, 16  ;;  %v1144_v44 = vld [vmem:[%s4174_s18 + $0x74] sm:$0x1]  ;;  %v2223_v57 = vsel %vm4306_vm15, %v3099_v33, %v2222_v14 }
  0xcc   : > { %v4512_v35 = vcombine.low %v1742_v22, %v1745_v45  ;;  %v4522_v38 = vsel %vm4306_vm15, %v3051_v32, %v1692_v4  ;;  %v1694_v40 = vrot.slane %v1692_v4, 4  ;;  %v2502_v48 = vrot.slane %v2500_v25, 4 }
  0xcd   : > { %v2505_v53 = vrot.slane %v2503_v37, 5  ;;  %v2226_v26 = vsel %vm4306_vm15, %v2224_v23, %v2225_v28  ;;  %v2509_v63 = vshll.u32 %v4525_v47, 16  ;;  %v2515_v6 = vrot.slane %v2513_v16, 4 }
  0xce   : > { %v1696_v5 = vsel %vm4306_vm15, %v1694_v40, %v1695_v34  ;;  %v2519_v1 = vshll.u32 %v1144_v44, 16  ;;  %v3133_v14 = vrot.slane %v4510_v11, 9  ;;  %v4553_v22 = vcombine.low %v2223_v57, %v2226_v26 }
  0xcf   : > { %3463 = vmatmul.mubr.msk.bf16.gmra.mrb[8].mxu0 %vm1384_vm12, %v4501_v31  ;;  %v3059_v41 = vcombine.low %v4522_v38, %v1696_v5  ;;  %v2506_v60 = vor.u32 %v2505_v53, %v2502_v48  ;;  %v2511_v34 = vrot.slane %v2509_v63, 5  ;;  %v4558_v32 = vcombine.low %v4242_v50, %v4245_v51  ;;  %v3730_v48 = vld [vmem:[%s4790_s3 + $0x88] sm:$0xff]  }
  0xd0   : > { %3375 = vmatmul.mubr.msk.bf16.vlgmr.msra.gmra.mrb[0].mxu1 %vm1384_vm12, %v4499_v30  ;;  %3466 = vmatprep.mubr.msk.bf16.mxu0 %vm1384_vm12, %v4512_v35  ;;  %v4562_v45 = vcombine.low %v4261_v13, %v4269_v20  ;;  %v2664_v33 = vrot.slane %v1144_v44, 5  ;;  %v2521_v23 = vrot.slane %v2519_v1, 5  ;;  %v4590_v40 = vcombine.low %v4293_v49, %v4316_v52  ;;  %v3729_v49 = vld [vmem:[%s4790_s3 + $0x80] sm:$0xff]   ;;  %v2806_v63 = vld [vmem:[%s3843_s11 + $0x28] sm:$0xff] }
  0xd1   : > { %3391 = vmatpush3.bf16.msra.mxu1 %v4298_v10  ;;  %3378 = vmatprep.mubr.msk.bf16.mxu1 %vm1384_vm12, %v4518_v8  ;;  %v2507_v24 = vrot.slane %v2506_v60, 4  ;;  %v2661_v10 = vrot.slane %v4525_v47, 5  ;;  %v2516_v4 = vor.u32 %v2515_v6, %v2511_v34  ;;  %v4594_v61 = vcombine.low %v4336_v27, %v4357_v46  ;;  %v3728_v46 = vld [vmem:[%s4790_s3 + $0x38] sm:$0xff]   ;;  %v2809_v6 = vld [vmem:[%s3843_s11 + $0x40] sm:$0xff] }
  0xd2   : > { %3392 = vmatprep.subr.bf16.mxu1 %v3719_v9  ;;  %v4613_v52 = vcombine.low %v4374_v59, %v4392_v15  ;;  %v3077_v27 = vcombine.low %v4487_v12, %v4467_v54  ;;  %v3111_v59 = vcombine.low %v4510_v11, %v4525_v47  ;;  %v2064_v15 = vshll.u32 %v4487_v12, 16  ;;  %v2808_v60 = vld [vmem:[%s3843_s11 + $0x38] sm:$0xff] }
  0xd3   : > { %v2512_v28 = vsel %vm4217_vm11, %v2507_v24, %v2511_v34  ;;  %v4568_v25 = vsel %vm4306_vm15, %v3133_v14, %v2661_v10  ;;  %v2663_v37 = vrot.slane %v2661_v10, 4  ;;  %v2517_v50 = vrot.slane %v2516_v4, 4  ;;  %v2810_v24 = vld [vmem:[%s3843_s11 + $0x48] sm:$0xff]  ;;  %v2815_v34 = vld [vmem:[%s3843_s11 + $0x70] sm:$0xff] }
  0xd4   : > { %v2074_v11 = vshrl.u32 %v4467_v54, 16  ;;  %v2066_v16 = vrot.slane %v2064_v15, 5 }
  0xd5   : > { %3393 = vmatpush3.bf16.msra.mxu1 %v3719_v9  ;;  %v4578_v51 = vsel %vm4306_vm15, %v2663_v37, %v2664_v33  ;;  %v2522_v13 = vsel %vm4217_vm11, %v2517_v50, %v2521_v23  ;;  %v3725_v9 = vld [vmem:[%s4790_s3 + $0x78] sm:$0xff]  }
  0xd6   : > { %3410 = vmatprep.subr.bf16.mxu1 %v3724_v0  ;;  %v3134_v20 = vcombine.low %v4568_v25, %v4578_v51  ;;  %v4586_v38 = vcombine.low %v2512_v28, %v2522_v13  ;;  %v2076_v44 = vrot.slane %v2074_v11, 4  ;;  %v4733_v33 = vld [vmem:[%s3843_s11 + $0x78] sm:$0xff]  ;;  %v4736_v28 = vld [vmem:[%s3843_s11 + $0x68] sm:$0xff] }
  0xd7   : > { %3467 = vmatmul.mubr.msk.bf16.gmra.mrb[12].mxu0 %vm1384_vm12, %v4553_v22 }
  0xd8   : > { %3379 = vmatmul.mubr.msk.bf16.gmra.mrb[4].mxu1 %vm1384_vm12, %v4558_v32  ;;  %3474 = vmatprep.mubr.msk.bf16.mxu0 %vm1384_vm12, %v4518_v8 }
  0xd9   : > { %3382 = vmatprep.mubr.msk.bf16.mxu1 %vm1384_vm12, %v4562_v45 }
  0xdf   : > { %3475 = vmatmul.mubr.msk.bf16.vlgmr.msra.gmra.mrb[0].mxu0 %vm1384_vm12, %v4558_v32 }
  0xe0   : > { %3383 = vmatmul.mubr.msk.bf16.gmra.mrb[8].mxu1 %vm1384_vm12, %v4590_v40  ;;  %3491 = vmatpush3.bf16.msra.mxu0 %v4440_v19  ;;  %v2070_v19 = vshll.u32 %v4467_v54, 16 }
  0xe1   : > { %3386 = vmatprep.mubr.msk.bf16.mxu1 %vm1384_vm12, %v4594_v61  ;;  %3478 = vmatprep.mubr.msk.bf16.mxu0 %vm1384_vm12, %v4562_v45 }
  0xe2   : > { %3492 = vmatprep.subr.bf16.mxu0 %v3725_v9  ;;  %v2072_v5 = vrot.slane %v2070_v19, 5 }
  0xe4   : > { %3493 = vmatpush3.bf16.msra.mxu0 %v3725_v9  ;;  %v2077_v54 = vor.u32 %v2076_v44, %v2072_v5 }
  0xe5   : > { %3510 = vmatprep.subr.bf16.mxu0 %v3729_v49 }
  0xe6   : > { %v2078_v57 = vrot.slane %v2077_v54, 4 }
  0xe7   : > { %3479 = vmatmul.mubr.msk.bf16.gmra.mrb[4].mxu0 %vm1384_vm12, %v4590_v40 }
  0xe8   : > { %3387 = vmatmul.mubr.msk.bf16.gmra.mrb[12].mxu1 %vm1384_vm12, %v4613_v52  ;;  %3482 = vmatprep.mubr.msk.bf16.mxu0 %vm1384_vm12, %v4594_v61 }
  0xe9   : > { %3394 = vmatprep.mubr.msk.bf16.mxu1 %vm1384_vm12, %v3059_v41  ;;  %v2805_v41 = vld [vmem:[%s3843_s11 + $0x20] sm:$0xff] }
  0xef   : > { %3483 = vmatmul.mubr.msk.bf16.gmra.mrb[8].mxu0 %vm1384_vm12, %v4613_v52 }
  0xf0   : > { %3395 = vmatmul.mubr.msk.bf16.vlgmr.msra.gmra.mrb[0].mxu1 %vm1384_vm12, %v4354_v39  ;;  %3486 = vmatprep.mubr.msk.bf16.mxu0 %vm1384_vm12, %v3077_v27  ;;  %v2061_v39 = vshrl.u32 %v4487_v12, 16  ;;  %v2080_v12 = vshll.u32 %v4490_v3, 16 }
  0xf1   : > { %3411 = vmatpush3.bf16.msra.mxu1 %v3724_v0  ;;  %3398 = vmatprep.mubr.msk.bf16.mxu1 %vm1384_vm12, %v4394_v17  ;;  %v2811_v0 = vld [vmem:[%s3843_s11 + $0x50] sm:$0xff] }
  0xf2   : > { %3412 = vmatprep.subr.bf16.mxu1 %v3728_v46  ;;  %v2063_v47 = vrot.slane %v2061_v39, 4  ;;  %v2082_v26 = vrot.slane %v2080_v12, 5 }
  0xf5   : > { %3413 = vmatpush3.bf16.msra.mxu1 %v3728_v46 }
  0xf6   : > { %3530 = vmatprep.subr.bf16.mxu1 %v4162_v7 }
  0xf7   : > { %3487 = vmatmul.mubr.msk.bf16.gmra.mrb[12].mxu0 %vm1384_vm12, %v3111_v59 }
  0xf8   : > { %3399 = vmatmul.mubr.msk.bf16.gmra.mrb[4].mxu1 %vm1384_vm12, %v4426_v62  ;;  %3494 = vmatprep.mubr.msk.bf16.mxu0 %vm1384_vm12, %v4286_v42  ;;  %v2067_v42 = vor.u32 %v2066_v16, %v2063_v47 }
  0xf9   : > { %3402 = vmatprep.mubr.msk.bf16.mxu1 %vm1384_vm12, %v4460_v18 }
  0xfa   : > { %v2068_v53 = vrot.slane %v2067_v42, 4 }
  0xff   : > { %3495 = vmatmul.mubr.msk.bf16.vlgmr.msra.gmra.mrb[0].mxu0 %vm1384_vm12, %v4331_v21  ;;  %v2073_v21 = vsel %vm4217_vm11, %v2068_v53, %v2072_v5 }
 0x100   : > { %3403 = vmatmul.mubr.msk.bf16.gmra.mrb[8].mxu1 %vm1384_vm12, %v4471_v56  ;;  %3511 = vmatpush3.bf16.msra.mxu0 %v3729_v49 }
 0x101   : > { %3406 = vmatprep.mubr.msk.bf16.mxu1 %vm1384_vm12, %v4501_v31  ;;  %3498 = vmatprep.mubr.msk.bf16.mxu0 %vm1384_vm12, %v4362_v43  ;;  %v2083_v43 = vsel %vm4217_vm11, %v2078_v57, %v2082_v26 }
 0x102   : > { %3512 = vmatprep.subr.bf16.mxu0 %v3730_v48  ;;  %v3088_v3 = vcombine.low %v2073_v21, %v2083_v43 }
 0x104   : > { %3513 = vmatpush3.bf16.msra.mxu0 %v3730_v48 }
 0x107   : > { %3499 = vmatmul.mubr.msk.bf16.gmra.mrb[4].mxu0 %vm1384_vm12, %v4405_v36 }
 0x108   : > { %3407 = vmatmul.mubr.msk.bf16.gmra.mrb[12].mxu1 %vm1384_vm12, %v4512_v35  ;;  %3502 = vmatprep.mubr.msk.bf16.mxu0 %vm1384_vm12, %v4429_v2 }
 0x109   : > { %3414 = vmatprep.mubr.msk.bf16.mxu1 %vm1384_vm12, %v4499_v30 }
 0x10f   : > { %3503 = vmatmul.mubr.msk.bf16.gmra.mrb[8].mxu0 %vm1384_vm12, %v4469_v55 }
 0x110   : > { %3415 = vmatmul.mubr.msk.bf16.vlgmr.msra.gmra.mrb[0].mxu1 %vm1384_vm12, %v4518_v8  ;;  %3506 = vmatprep.mubr.msk.bf16.mxu0 %vm1384_vm12, %v3088_v3  ;;  %v2807_v8 = vld [vmem:[%s3843_s11 + $0x30] sm:$0xff] }
 0x111   : > { %3532 = vmatpush3.bf16.msra.mxu1 %v4162_v7  ;;  %3418 = vmatprep.mubr.msk.bf16.mxu1 %vm1384_vm12, %v4558_v32 }
 0x112   : > { %3531 = vmatprep.subr.bf16.mxu1 %v4171_v58 }
 0x115   : > { %3533 = vmatpush3.bf16.msra.mxu1 %v4171_v58 }
 0x117   : > { %3507 = vmatmul.mubr.msk.bf16.gmra.mrb[12].mxu0 %vm1384_vm12, %v4586_v38 }
 0x118   : > { %3419 = vmatmul.mubr.msk.bf16.gmra.mrb[4].mxu1 %vm1384_vm12, %v4562_v45  ;;  %3514 = vmatprep.mubr.msk.bf16.mxu0 %vm1384_vm12, %v4394_v17  ;;  %v2813_v45 = vld [vmem:[%s3843_s11 + $0x60] sm:$0xff] }
 0x119   : > { %3422 = vmatprep.mubr.msk.bf16.mxu1 %vm1384_vm12, %v4590_v40 }
 0x11f   : > { %3515 = vmatmul.mubr.msk.bf16.vlgmr.msra.gmra.mrb[0].mxu0 %vm1384_vm12, %v4426_v62 }
 0x120   : > { %3423 = vmatmul.mubr.msk.bf16.gmra.mrb[8].mxu1 %vm1384_vm12, %v4594_v61  ;;  %3518 = vmatprep.mubr.msk.bf16.mxu0 %vm1384_vm12, %v4460_v18 }
 0x121   : > { %3426 = vmatprep.mubr.msk.bf16.mxu1 %vm1384_vm12, %v4613_v52 }
 0x127   : > { %3519 = vmatmul.mubr.msk.bf16.gmra.mrb[4].mxu0 %vm1384_vm12, %v4471_v56  ;;  %v2801_v56 = vld [vmem:[%s3843_s11] sm:$0xff] }
 0x128   : > { %3427 = vmatmul.mubr.msk.bf16.gmra.mrb[12].mxu1 %vm1384_vm12, %v3077_v27  ;;  %3522 = vmatprep.mubr.msk.bf16.mxu0 %vm1384_vm12, %v4501_v31  ;;  %v2804_v31 = vld [vmem:[%s3843_s11 + $0x18] sm:$0xff] }
 0x129   : > { %3442 = vmatprep.mubr.msk.bf16.mxu1 %vm1384_vm12, %v4405_v36 }
 0x12f   : > { %3523 = vmatmul.mubr.msk.bf16.gmra.mrb[8].mxu0 %vm1384_vm12, %v4512_v35  ;;  %v2802_v35 = vld [vmem:[%s3843_s11 + $0x8] sm:$0xff] }
 0x130   : > { %3443 = vmatmul.mubr.msk.bf16.vlgmr.msra.gmra.mrb[8].mxu1 %vm1384_vm12, %v4429_v2  ;;  %3526 = vmatprep.mubr.msk.bf16.mxu0 %vm1384_vm12, %v4553_v22  ;;  %v2812_v22 = vld [vmem:[%s3843_s11 + $0x58] sm:$0xff] }
 0x131   : > { %3446 = vmatprep.mubr.msk.bf16.mxu1 %vm1384_vm12, %v4469_v55  ;;  %v2803_v55 = vld [vmem:[%s3843_s11 + $0x10] sm:$0xff] }
 0x137   : > { %3527 = vmatmul.mubr.msk.bf16.gmra.mrb[12].mxu0 %vm1384_vm12, %v3134_v20 }
 0x138   : > { %3447 = vmatmul.mubr.msk.bf16.gmra.mrb[12].mxu1 %vm1384_vm12, %v3088_v3 }
 0x1e3   : > { %v3416_v7 = vpop.f32.mrb[0].mxu1 }
 0x1e4   : > { %v1981_v58 = vpop.f32.mrb[1].mxu1 }
 0x1e5   : > { %v3417_v29 = vpop.f32.mrb[2].mxu1 }
 0x1e6   : > { %v1984_v17 = vpop.f32.mrb[3].mxu1 }
 0x1eb   : > { %v3420_v36 = vpop.f32.mrb[4].mxu1 }
 0x1ec   : > { %v1997_v62 = vpop.f32.mrb[5].mxu1 }
 0x1ed   : > { %v3421_v2 = vpop.f32.mrb[6].mxu1 }
 0x1ee   : > { %v2000_v18 = vpop.f32.mrb[7].mxu1 }
 0x1f2   : > { %v3516_v30 = vpop.f32.mrb[0].mxu0 }
 0x1f3   : > { %v3534_v1 = vadd.f32 %v3516_v30, %v3416_v7  ;;  %v2722_v14 = vpop.f32.mrb[1].mxu0 }
 0x1f4   : > { %v3535_v10 = vadd.f32 %v2722_v14, %v1981_v58  ;;  %v3517_v32 = vpop.f32.mrb[2].mxu0 }
 0x1f5   : > { %v2819_v4 = vadd.f32 %v3534_v1, %v2803_v55  ;;  %v3536_v23 = vadd.f32 %v3517_v32, %v3417_v29  ;;  %v2725_v25 = vpop.f32.mrb[3].mxu0 }
 0x1f6   : > { %v2817_v37 = vadd.f32 %v3535_v10, %v2801_v56  ;;  %v3537_v50 = vadd.f32 %v2725_v25, %v1984_v17 }
 0x1f7   : > { %v2820_v51 = vadd.f32 %v3536_v23, %v2804_v31  ;;  %2835 = vst.msk [vmem:[%s3848_s14 + $0x10] sm:$0xff] %vm1384_vm12, %v2819_v4 }
 0x1f8   : > { %v2818_v13 = vadd.f32 %v3537_v50, %v2802_v35  ;;  %2833 = vst.msk [vmem:[%s3848_s14] sm:$0xff] %vm1384_vm12, %v2817_v37 }
 0x1f9   : > { %2836 = vst.msk [vmem:[%s3848_s14 + $0x18] sm:$0xff] %vm1384_vm12, %v2820_v51 }
 0x1fa   : > { %v3520_v20 = vpop.f32.mrb[4].mxu0  ;;  %2834 = vst.msk [vmem:[%s3848_s14 + $0x8] sm:$0xff] %vm1384_vm12, %v2818_v13 }
 0x1fb   : > { %v3538_v38 = vadd.f32 %v3520_v20, %v3420_v36  ;;  %v2738_v40 = vpop.f32.mrb[5].mxu0 }
 0x1fc   : > { %v3539_v61 = vadd.f32 %v2738_v40, %v1997_v62  ;;  %v3521_v9 = vpop.f32.mrb[6].mxu0 }
 0x1fd   : > { %v2823_v49 = vadd.f32 %v3538_v38, %v2807_v8  ;;  %v3540_v52 = vadd.f32 %v3521_v9, %v3421_v2  ;;  %v2741_v27 = vpop.f32.mrb[7].mxu0 }
 0x1fe   : > { %v2821_v46 = vadd.f32 %v3539_v61, %v2805_v41  ;;  %v3541_v59 = vadd.f32 %v2741_v27, %v2000_v18 }
 0x1ff   : > { %v2824_v39 = vadd.f32 %v3540_v52, %v2808_v60  ;;  %2839 = vst.msk [vmem:[%s3848_s14 + $0x30] sm:$0xff] %vm1384_vm12, %v2823_v49 }
 0x200   : > { %v2822_v15 = vadd.f32 %v3541_v59, %v2806_v63  ;;  %2837 = vst.msk [vmem:[%s3848_s14 + $0x20] sm:$0xff] %vm1384_vm12, %v2821_v46 }
 0x201   : > { %2840 = vst.msk [vmem:[%s3848_s14 + $0x38] sm:$0xff] %vm1384_vm12, %v2824_v39 }
 0x202   : > { %v3524_v19 = vpop.f32.mrb[8].mxu0  ;;  %2838 = vst.msk [vmem:[%s3848_s14 + $0x28] sm:$0xff] %vm1384_vm12, %v2822_v15 }
 0x203   : > { %v3444_v11 = vpop.f32.mrb[8].mxu1  ;;  %v2754_v47 = vpop.f32.mrb[9].mxu0 }
 0x204   : > { %v3542_v16 = vadd.f32 %v3524_v19, %v3444_v11  ;;  %v2172_v5 = vpop.f32.mrb[9].mxu1  ;;  %v3525_v44 = vpop.f32.mrb[10].mxu0 }
 0x205   : > { %v3543_v48 = vadd.f32 %v2754_v47, %v2172_v5  ;;  %v3445_v42 = vpop.f32.mrb[10].mxu1  ;;  %v2757_v54 = vpop.f32.mrb[11].mxu0 }
 0x206   : > { %v2827_v12 = vadd.f32 %v3542_v16, %v2811_v0  ;;  %v3544_v53 = vadd.f32 %v3525_v44, %v3445_v42  ;;  %v2175_v57 = vpop.f32.mrb[11].mxu1 }
 0x207   : > { %v2825_v26 = vadd.f32 %v3543_v48, %v2809_v6  ;;  %v3545_v21 = vadd.f32 %v2757_v54, %v2175_v57 }
 0x208   : > { %v2828_v43 = vadd.f32 %v3544_v53, %v2812_v22  ;;  %2843 = vst.msk [vmem:[%s3848_s14 + $0x50] sm:$0xff] %vm1384_vm12, %v2827_v12 }
 0x209   : > { %v2826_v3 = vadd.f32 %v3545_v21, %v2810_v24  ;;  %2841 = vst.msk [vmem:[%s3848_s14 + $0x40] sm:$0xff] %vm1384_vm12, %v2825_v26 }
 0x20a   : > { %v3528_v7 = vpop.f32.mrb[12].mxu0  ;;  %2844 = vst.msk [vmem:[%s3848_s14 + $0x58] sm:$0xff] %vm1384_vm12, %v2828_v43 }
 0x20b   : > { %v3448_v58 = vpop.f32.mrb[12].mxu1  ;;  %v2770_v29 = vpop.f32.mrb[13].mxu0  ;;  %2842 = vst.msk [vmem:[%s3848_s14 + $0x48] sm:$0xff] %vm1384_vm12, %v2826_v3 }
 0x20c   : > { %v3546_v17 = vadd.f32 %v3528_v7, %v3448_v58  ;;  %v2188_v36 = vpop.f32.mrb[13].mxu1  ;;  %v3529_v62 = vpop.f32.mrb[14].mxu0 }
 0x20d   : > { %v3547_v2 = vadd.f32 %v2770_v29, %v2188_v36  ;;  %v3449_v18 = vpop.f32.mrb[14].mxu1  ;;  %v2773_v55 = vpop.f32.mrb[15].mxu0 }
 0x20e   : > { %v2831_v56 = vadd.f32 %v3546_v17, %v2815_v34  ;;  %v3548_v30 = vadd.f32 %v3529_v62, %v3449_v18  ;;  %v2191_v31 = vpop.f32.mrb[15].mxu1 }
 0x20f   : > { %v2829_v35 = vadd.f32 %v3547_v2, %v2813_v45  ;;  %v3549_v8 = vadd.f32 %v2773_v55, %v2191_v31 }
 0x210   : > { %v2832_v41 = vadd.f32 %v3548_v30, %v4733_v33  ;;  %2847 = vst.msk [vmem:[%s3848_s14 + $0x70] sm:$0xff] %vm1384_vm12, %v2831_v56 }
 0x211   : > { %v2830_v60 = vadd.f32 %v3549_v8, %v4736_v28  ;;  %2845 = vst.msk [vmem:[%s3848_s14 + $0x60] sm:$0xff] %vm1384_vm12, %v2829_v35 }
 0x212   : > { %2848 = vst.msk [vmem:[%s3848_s14 + $0x78] sm:$0xff] %vm1384_vm12, %v2832_v41 }
 0x213   : > { %2846 = vst.msk [vmem:[%s3848_s14 + $0x68] sm:$0xff] %vm1384_vm12, %v2830_v60 }
 0x214 PF: > { %s15_s22 = sadd.s32 1, %s3769_s22   ;;  %s4805_s18 = smov %s3761_s20 }
 0x215   : > { %p12_p8 = scmp.ge.s32.totalorder %s15_s22, 6   ;;  %s4806_s19 = smov %s3765_s21 }
 0x216   : > { %s4807_s20 = smov %s4810_s23  ;;  %s4808_s21 = smov %s4814_s24 }
 0x217   :  { %14 = sbr.rel (!%p12_p8) target bundleno = 3 (0x3), region = 80 }

// kernel: basic_block_forward.4
= control target key start
LH: loop header
LB: loop body
LE: loop exit
PB: predicated region body
PF: predicated region fallthrough
CT: control target
= control target key end

     0   :  { %s3836_s18 = smov 0   ;;  %s3838_s19 = smov 0   ;;  %s4845_s0 = inlined_call_operand.vmem [shape: f32[2,16,16,32], index: 0, kind: input, shape index: {}]   ;;  %s4846_s1 = inlined_call_operand.vmem [shape: f32[1,32], index: 1, kind: input, shape index: {}]   ;;  %s4847_s2 = inlined_call_operand.vmem [shape: f32[1,32], index: 2, kind: input, shape index: {}]   ;;  %s4848_s3 = inlined_call_operand.vmem [shape: bf16[288,32], index: 3, kind: input, shape index: {}]   ;;  %s4849_s4 = inlined_call_operand.vmem [shape: bf16[2,16,16,32], index: 4, kind: output, shape index: {0}]   ;;  %s4850_s5 = inlined_call_operand.vmem [shape: f32[2,2,32], index: 5, kind: output, shape index: {1}]  }
   0x1   :  { %s3840_s20 = smov 0   ;;  %s3842_s21 = smov 0  }
   0x2   :  { %s3844_s22 = smov 0  }
   0x3 LB: > { %s25_s23 = sadd.s32 1, %s3794_s20  ;;  %s28_s24 = sadd.s32 1, %s3798_s21  ;;  %s3802_s22 = sphi %s3844_s22, %s16_s22   ;;  %s3798_s21 = sphi %s3842_s21, %s4866_s21   ;;  %s3794_s20 = sphi %s3840_s20, %s4865_s20   ;;  %s3790_s19 = sphi %s3838_s19, %s4864_s19   ;;  %s3786_s18 = sphi %s3836_s18, %s4863_s18  }
   0x4   : > { %p26_p0 = scmp.ge.s32.totalorder %s25_s23, 2  ;;  %p3048_p1 = scmp.ge.s32.totalorder %s3802_s22, 1 }
   0x5   : > { %p204_p2 = scmp.lt.s32.totalorder %s3802_s22, 5 }
   0x6   : > { %s4868_s23 = smov (%p26_p0, %s25_s23), 0  ;;  %s4870_s24 = smov (!%p26_p0, %s28_s24), %s3798_s21 }
   0x7   : > { %p205_p3 = pnand %p3048_p1, %p204_p2  ;;  %p30_p4 = scmp.ge.s32.totalorder %s4870_s24, 2 }
   0x8   : > { %p241_p5 = scmp.lt.s32.totalorder (!%p205_p3), %s3790_s19, 1  ;;  %s3051_s25 = sshll.u32 (!%p205_p3), %s3786_s18, 3 }
   0x9   : > { %s4872_s24 = smov (%p30_p4, %s4870_s24), 0  ;;  %208 = sbr.rel (%p205_p3) target bundleno = 547 (0x223), region = 36 }
   0xa   : > { %p249_p6 = scmp.lt.s32.totalorder (!%p205_p3), %s3051_s25, 15  ;;  %p3056_p7 = scmp.ne.s32.totalorder (!%p205_p3), %s3786_s18, 0 }
  0x10   : > { %s4874_s19 = smov (!%p241_p5, %s3790_s19), 1  ;;  %s4876_s25 = smov (!%p249_p6, %s3051_s25), 15 }
  0x11   : > { %s3242_s26 = sshll.u32 %s4874_s19, 8  ;;  %s3053_s27 = sshll.u32 %s4874_s19, 5  ;;  %vm301_vm0 = vcmask (!%p3056_p7), 253952   ;;  %vm309_vm1 = vsmask.f32 (!%p3056_p7), 256  ;;  %vm298_vm2 = vcmask (!%p3056_p7), 257024  }
  0x12   : > { %s3872_s30 = scalar_lea.vmem %s4845_s0, %s3242_s26  ;;  %s3052_s6 = sshll.u32 %s4876_s25, 1  ;;  %v311_v0 = vld [vmem:[#allocation2 + $0xc] sm:$0x1] (!%p3056_p7)  ;;  %vm3887_vm3 = vmand (!%p3056_p7), %vm301_vm0, %vm309_vm1  ;;  %v314_v2 = vld [vmem:[#allocation2 + $0x18] sm:$0x1] (!%p3056_p7)  ;;  %v3804_v11 = vmov (!%p3056_p7), 0  }
  0x13   : > { %s253_s7 = sadd.s32 %s3053_s27, %s3052_s6  ;;  %s3055_s8 = sshll.u32 %s4874_s19, 1  ;;  %v317_v3 = vld [vmem:[#allocation2 + $0x24] sm:$0x1] (!%p3056_p7)  ;;  %vm359_vm4 = vsmask.f32 (!%p3056_p7), 7938  ;;  %v312_v4 = vsel (!%p3056_p7), %vm3887_vm3, 0, %v311_v0 }
  0x14   : > { %s3054_s9 = sshll.u32 %s253_s7, 2  ;;  %s3877_s12 = scalar_lea.vmem %s4850_s5, %s3055_s8  ;;  %v315_v5 = vsel (!%p3056_p7), %vm3887_vm3, 0, %v314_v2  ;;  %v318_v6 = vsel (!%p3056_p7), %vm3887_vm3, 0, %v317_v3  ;;  %v320_v7 = vld [vmem:[#allocation2 + $0x30] sm:$0x1] (!%p3056_p7)  ;;  %vm3923_vm5 = vmand (!%p3056_p7), %vm301_vm0, %vm359_vm4  ;;  %vm1051_vm6 = vcmask (!%p3056_p7), 254976  }
  0x15   : > { %s3882_s15 = scalar_lea.vmem %s4849_s4, %s3054_s9  ;;  %265 = sbr.rel (%p3056_p7) target bundleno = 139 (0x8b), region = 40  ;;  %313 = vst [vmem:[#allocation2 + $0xc] sm:$0x1] (!%p3056_p7), %v312_v4  ;;  %316 = vst [vmem:[#allocation2 + $0x18] sm:$0x1] (!%p3056_p7), %v315_v5  ;;  %v321_v8 = vsel (!%p3056_p7), %vm3887_vm3, 0, %v320_v7 }
  0x16   : > { %319 = vst [vmem:[#allocation2 + $0x24] sm:$0x1] (!%p3056_p7), %v318_v6  ;;  %v323_v9 = vld [vmem:[#allocation2 + $0x3c] sm:$0x1] (!%p3056_p7)  ;;  %v326_v10 = vld [vmem:[#allocation2 + $0x48] sm:$0x1] (!%p3056_p7)  ;;  %vm4005_vm8 = vmand (!%p3056_p7), %vm298_vm2, %vm359_vm4 }
  0x17   : > { %299 = vst.msk [vmem:[#allocation2] sm:$0xf] (!%p3056_p7), %vm298_vm2, %v3804_v11  ;;  %300 = vst.msk [vmem:[#allocation2 + $0x4] sm:$0xf] (!%p3056_p7), %vm298_vm2, %v3804_v11  ;;  %v324_v12 = vsel (!%p3056_p7), %vm3887_vm3, 0, %v323_v9  ;;  %v327_v13 = vsel (!%p3056_p7), %vm3887_vm3, 0, %v326_v10 }
  0x18   : > { %302 = vst.msk [vmem:[#allocation2 + $0x8] sm:$0x1] (!%p3056_p7), %vm301_vm0, %v3804_v11  ;;  %306 = vst.msk [vmem:[#allocation2 + $0xd4] sm:$0x1] (!%p3056_p7), %vm301_vm0, %v3804_v11  ;;  %v329_v14 = vld [vmem:[#allocation2 + $0x54] sm:$0x1] (!%p3056_p7) }
  0x19   : > { %304 = vst.msk [vmem:[#allocation2 + $0xcc] sm:$0xf] (!%p3056_p7), %vm298_vm2, %v3804_v11  ;;  %305 = vst.msk [vmem:[#allocation2 + $0xd0] sm:$0xf] (!%p3056_p7), %vm298_vm2, %v3804_v11  ;;  %v332_v15 = vld [vmem:[#allocation2 + $0x60] sm:$0x1] (!%p3056_p7) }
  0x1a   : > { %322 = vst [vmem:[#allocation2 + $0x30] sm:$0x1] (!%p3056_p7), %v321_v8  ;;  %325 = vst [vmem:[#allocation2 + $0x3c] sm:$0x1] (!%p3056_p7), %v324_v12  ;;  %v330_v16 = vsel (!%p3056_p7), %vm3887_vm3, 0, %v329_v14  ;;  %v333_v17 = vsel (!%p3056_p7), %vm3887_vm3, 0, %v332_v15 }
  0x1b   : > { %328 = vst [vmem:[#allocation2 + $0x48] sm:$0x1] (!%p3056_p7), %v327_v13  ;;  %v335_v18 = vld [vmem:[#allocation2 + $0x6c] sm:$0x1] (!%p3056_p7)  ;;  %v338_v19 = vld [vmem:[#allocation2 + $0x78] sm:$0x1] (!%p3056_p7) }
  0x1c   : > { %331 = vst [vmem:[#allocation2 + $0x54] sm:$0x1] %v330_v16  ;;  %334 = vst [vmem:[#allocation2 + $0x60] sm:$0x1] %v333_v17  ;;  %v336_v20 = vsel %vm3887_vm3, 0, %v335_v18  ;;  %v339_v21 = vsel %vm3887_vm3, 0, %v338_v19 }
  0x1d   : > { %v341_v22 = vld [vmem:[#allocation2 + $0x84] sm:$0x1]  ;;  %v344_v23 = vld [vmem:[#allocation2 + $0x90] sm:$0x1]  ;;  %337 = vst [vmem:[#allocation2 + $0x6c] sm:$0x1] %v336_v20 }
  0x1e   : > { %340 = vst [vmem:[#allocation2 + $0x78] sm:$0x1] %v339_v21  ;;  %v342_v24 = vsel %vm3887_vm3, 0, %v341_v22  ;;  %v345_v25 = vsel %vm3887_vm3, 0, %v344_v23  ;;  %v347_v26 = vld [vmem:[#allocation2 + $0x9c] sm:$0x1] }
  0x1f   : > { %v350_v27 = vld [vmem:[#allocation2 + $0xa8] sm:$0x1]  ;;  %343 = vst [vmem:[#allocation2 + $0x84] sm:$0x1] %v342_v24  ;;  %346 = vst [vmem:[#allocation2 + $0x90] sm:$0x1] %v345_v25 }
  0x20   : > { %v348_v29 = vsel %vm3887_vm3, 0, %v347_v26  ;;  %v351_v30 = vsel %vm3887_vm3, 0, %v350_v27  ;;  %v353_v31 = vld [vmem:[#allocation2 + $0xb4] sm:$0x1]  ;;  %v356_v32 = vld [vmem:[#allocation2 + $0xc0] sm:$0x1] }
  0x21   : > { %349 = vst [vmem:[#allocation2 + $0x9c] sm:$0x1] %v348_v29  ;;  %352 = vst [vmem:[#allocation2 + $0xa8] sm:$0x1] %v351_v30  ;;  %v354_v33 = vsel %vm3887_vm3, 0, %v353_v31  ;;  %v357_v34 = vsel %vm3887_vm3, 0, %v356_v32 }
  0x22   : > { %v361_v35 = vld [vmem:[#allocation2 + $0x14] sm:$0x1]  ;;  %v364_v36 = vld [vmem:[#allocation2 + $0x20] sm:$0x1]  ;;  %355 = vst [vmem:[#allocation2 + $0xb4] sm:$0x1] %v354_v33 }
  0x23   : > { %358 = vst [vmem:[#allocation2 + $0xc0] sm:$0x1] %v357_v34  ;;  %v362_v37 = vsel %vm3923_vm5, 0, %v361_v35  ;;  %v365_v38 = vsel %vm3923_vm5, 0, %v364_v36  ;;  %v367_v39 = vld [vmem:[#allocation2 + $0x2c] sm:$0x1] }
  0x24   : > { %v370_v40 = vld [vmem:[#allocation2 + $0x38] sm:$0x1]  ;;  %363 = vst [vmem:[#allocation2 + $0x14] sm:$0x1] %v362_v37  ;;  %366 = vst [vmem:[#allocation2 + $0x20] sm:$0x1] %v365_v38 }
  0x25   : > { %v368_v41 = vsel %vm3923_vm5, 0, %v367_v39  ;;  %v371_v42 = vsel %vm3923_vm5, 0, %v370_v40  ;;  %v373_v43 = vld [vmem:[#allocation2 + $0x44] sm:$0x1]  ;;  %v376_v44 = vld [vmem:[#allocation2 + $0x50] sm:$0x1] }
  0x26   : > { %369 = vst [vmem:[#allocation2 + $0x2c] sm:$0x1] %v368_v41  ;;  %372 = vst [vmem:[#allocation2 + $0x38] sm:$0x1] %v371_v42  ;;  %v374_v45 = vsel %vm3923_vm5, 0, %v373_v43  ;;  %v377_v46 = vsel %vm3923_vm5, 0, %v376_v44 }
  0x27   : > { %v379_v47 = vld [vmem:[#allocation2 + $0x5c] sm:$0x1]  ;;  %v382_v48 = vld [vmem:[#allocation2 + $0x68] sm:$0x1]  ;;  %375 = vst [vmem:[#allocation2 + $0x44] sm:$0x1] %v374_v45 }
  0x28   : > { %378 = vst [vmem:[#allocation2 + $0x50] sm:$0x1] %v377_v46  ;;  %v380_v49 = vsel %vm3923_vm5, 0, %v379_v47  ;;  %v383_v50 = vsel %vm3923_vm5, 0, %v382_v48  ;;  %v385_v51 = vld [vmem:[#allocation2 + $0x74] sm:$0x1] }
  0x29   : > { %v388_v52 = vld [vmem:[#allocation2 + $0x80] sm:$0x1]  ;;  %381 = vst [vmem:[#allocation2 + $0x5c] sm:$0x1] %v380_v49  ;;  %384 = vst [vmem:[#allocation2 + $0x68] sm:$0x1] %v383_v50 }
  0x2a   : > { %v386_v53 = vsel %vm3923_vm5, 0, %v385_v51  ;;  %v389_v54 = vsel %vm3923_vm5, 0, %v388_v52  ;;  %v391_v55 = vld [vmem:[#allocation2 + $0x8c] sm:$0x1]  ;;  %v394_v56 = vld [vmem:[#allocation2 + $0x98] sm:$0x1] }
  0x2b   : > { %387 = vst [vmem:[#allocation2 + $0x74] sm:$0x1] %v386_v53  ;;  %390 = vst [vmem:[#allocation2 + $0x80] sm:$0x1] %v389_v54  ;;  %v392_v57 = vsel %vm3923_vm5, 0, %v391_v55  ;;  %v395_v58 = vsel %vm3923_vm5, 0, %v394_v56 }
  0x2c   : > { %v397_v59 = vld [vmem:[#allocation2 + $0xa4] sm:$0x1]  ;;  %v400_v60 = vld [vmem:[#allocation2 + $0xb0] sm:$0x1]  ;;  %393 = vst [vmem:[#allocation2 + $0x8c] sm:$0x1] %v392_v57 }
  0x2d   : > { %396 = vst [vmem:[#allocation2 + $0x98] sm:$0x1] %v395_v58  ;;  %v398_v61 = vsel %vm3923_vm5, 0, %v397_v59  ;;  %v401_v62 = vsel %vm3923_vm5, 0, %v400_v60  ;;  %v403_v63 = vld [vmem:[#allocation2 + $0xbc] sm:$0x1] }
  0x2e   : > { %v406_v0 = vld [vmem:[#allocation2 + $0xc8] sm:$0x1]  ;;  %399 = vst [vmem:[#allocation2 + $0xa4] sm:$0x1] %v398_v61  ;;  %402 = vst [vmem:[#allocation2 + $0xb0] sm:$0x1] %v401_v62 }
  0x2f   : > { %v404_v2 = vsel %vm3923_vm5, 0, %v403_v63  ;;  %v407_v3 = vsel %vm3923_vm5, 0, %v406_v0  ;;  %v266_v4 = vld [vmem:[%s3872_s30] sm:$0xff]  ;;  %v267_v6 = vld [vmem:[%s3872_s30 + $0x8] sm:$0xff]  ;;  %v268_v10 = vld [vmem:[%s3872_s30 + $0x10] sm:$0xff]  ;;  %v3805_v15 = vmov 0.0  }
  0x30   : > { %v3971_v5 = vld [vmem:[%s4846_s1] ss:$0 sm:$0xff]  ;;  %405 = vst [vmem:[#allocation2 + $0xbc] sm:$0x1] %v404_v2  ;;  %408 = vst [vmem:[#allocation2 + $0xc8] sm:$0x1] %v407_v3 }
  0x31   : > { %v3977_v7 = vld [vmem:[%s4847_s2] ss:$0 sm:$0xff]  ;;  %v417_v8 = vmul.f32 %v3971_v5, %v266_v4  ;;  %v418_v9 = vmul.f32 %v3971_v5, %v267_v6  ;;  %v419_v13 = vmul.f32 %v3971_v5, %v268_v10  ;;  %v269_v14 = vld [vmem:[%s3872_s30 + $0x18] sm:$0xff]  ;;  %1052 = vst.msk [vmem:[%s3877_s12] sm:$0x3] %vm1051_vm6, %v3805_v15  ;;  %v271_v18 = vld [vmem:[%s3872_s30 + $0x28] sm:$0xff] }
  0x32   : > { %vm615_vm7 = vsmask.f32 4368  ;;  %v420_v16 = vmul.f32 %v3971_v5, %v269_v14  ;;  %v270_v17 = vld [vmem:[%s3872_s30 + $0x20] sm:$0xff]  ;;  %v272_v23 = vld [vmem:[%s3872_s30 + $0x30] sm:$0xff]  ;;  %v273_v24 = vld [vmem:[%s3872_s30 + $0x38] sm:$0xff]  ;;  %v422_v26 = vmul.f32 %v3971_v5, %v271_v18 }
  0x33   : > { %v455_v11 = vadd.f32 %v3977_v7, %v417_v8  ;;  %v456_v12 = vadd.f32 %v3977_v7, %v418_v9  ;;  %v457_v21 = vadd.f32 %v3977_v7, %v419_v13  ;;  %v421_v22 = vmul.f32 %v3971_v5, %v270_v17  ;;  %v939_v47 = vld [vmem:[#allocation2 + $0xc] sm:$0xf]  ;;  %vm4011_vm9 = vmor %vm309_vm1, %vm615_vm7  ;;  %v943_v52 = vld [vmem:[#allocation2 + $0x14] sm:$0x1] }
  0x34   : > { %v458_v25 = vadd.f32 %v3977_v7, %v420_v16  ;;  %v423_v27 = vmul.f32 %v3971_v5, %v272_v23  ;;  %v424_v28 = vmul.f32 %v3971_v5, %v273_v24  ;;  %v460_v34 = vadd.f32 %v3977_v7, %v422_v26  ;;  %v946_v6 = vld [vmem:[#allocation2 + $0x18] sm:$0xf]  ;;  %v950_v8 = vld [vmem:[#allocation2 + $0x20] sm:$0x1] }
  0x35   : > { %v487_v19 = vmax.f32 %v455_v11, 0.0  ;;  %v488_v20 = vmax.f32 %v456_v12, 0.0  ;;  %v489_v31 = vmax.f32 %v457_v21, 0.0  ;;  %v459_v32 = vadd.f32 %v3977_v7, %v421_v22  ;;  %v274_v14 = vld [vmem:[%s3872_s30 + $0x40] sm:$0xff] }
  0x36   : > { %v490_v33 = vmax.f32 %v458_v25, 0.0  ;;  %v461_v35 = vadd.f32 %v3977_v7, %v423_v27  ;;  %v462_v36 = vadd.f32 %v3977_v7, %v424_v28  ;;  %v492_v44 = vmax.f32 %v460_v34, 0.0 }
  0x37   : > { %v3243_v29 = vpack.c.bf16 %v487_v19, %v487_v19  ;;  %v3244_v30 = vpack.c.bf16 %v488_v20, %v488_v20  ;;  %v3245_v41 = vpack.c.bf16 %v489_v31, %v489_v31  ;;  %v491_v43 = vmax.f32 %v459_v32, 0.0  ;;  %v275_v19 = vld [vmem:[%s3872_s30 + $0x48] sm:$0xff]  ;;  %v276_v20 = vld [vmem:[%s3872_s30 + $0x50] sm:$0xff] }
  0x38   : > { %v3246_v42 = vpack.c.bf16 %v490_v33, %v490_v33  ;;  %v493_v49 = vmax.f32 %v461_v35, 0.0  ;;  %v494_v50 = vmax.f32 %v462_v36, 0.0  ;;  %v3248_v0 = vpack.c.bf16 %v492_v44, %v492_v44  ;;  %v277_v44 = vld [vmem:[%s3872_s30 + $0x58] sm:$0xff] }
  0x39   : > { %v618_v37 = vshrl.u32 %v3243_v29, 16  ;;  %v621_v38 = vshll.u32 %v3243_v29, 16  ;;  %v626_v39 = vshrl.u32 %v3244_v30, 16  ;;  %v629_v40 = vshll.u32 %v3244_v30, 16  ;;  %v953_v29 = vld [vmem:[#allocation2 + $0x24] sm:$0xf] }
  0x3a   : > { %v635_v53 = vshrl.u32 %v3245_v41, 16  ;;  %v638_v54 = vshll.u32 %v3245_v41, 16  ;;  %v643_v55 = vshrl.u32 %v3246_v42, 16  ;;  %v646_v56 = vshll.u32 %v3246_v42, 16  ;;  %v957_v30 = vld [vmem:[#allocation2 + $0x2c] sm:$0x1] }
  0x3b   : > { %v620_v46 = vrot.slane %v618_v37, 7  ;;  %v628_v48 = vrot.slane %v626_v39, 7  ;;  %v3247_v63 = vpack.c.bf16 %v491_v43, %v491_v43  ;;  %v3249_v9 = vpack.c.bf16 %v493_v49, %v493_v49  ;;  %v960_v39 = vld [vmem:[#allocation2 + $0x30] sm:$0xf] }
  0x3c   : > { %v637_v61 = vrot.slane %v635_v53, 7  ;;  %v645_v62 = vrot.slane %v643_v55, 7  ;;  %v660_v17 = vshrl.u32 %v3248_v0, 16  ;;  %v663_v18 = vshll.u32 %v3248_v0, 16 }
  0x3d   : > { %v623_v57 = vor.u32 %v621_v38, %v620_v46  ;;  %v624_v58 = vrot.slane %v620_v46, 4  ;;  %v631_v59 = vor.u32 %v629_v40, %v628_v48  ;;  %v633_v60 = vrot.slane %v628_v48, 4  ;;  %v278_v46 = vld [vmem:[%s3872_s30 + $0x60] sm:$0xff] }
  0x3e   : > { %v640_v10 = vor.u32 %v638_v54, %v637_v61  ;;  %v641_v11 = vrot.slane %v637_v61, 4  ;;  %v648_v12 = vor.u32 %v646_v56, %v645_v62  ;;  %v650_v13 = vrot.slane %v645_v62, 4 }
  0x3f   : > { %v940_v2 = vsel %vm4005_vm8, %v623_v57, %v939_v47  ;;  %v632_v3 = vsel %vm4011_vm9, %v624_v58, %v631_v59  ;;  %v944_v4 = vsel %vm3887_vm3, %v633_v60, %v943_v52  ;;  %v652_v15 = vshrl.u32 %v3247_v63, 16  ;;  %v279_v47 = vld [vmem:[%s3872_s30 + $0x68] sm:$0xff]  ;;  %v964_v57 = vld [vmem:[#allocation2 + $0x38] sm:$0x1] }
  0x40   : > { %941 = vst [vmem:[#allocation2 + $0xc] sm:$0xf] %v940_v2  ;;  %942 = vst.msk [vmem:[#allocation2 + $0x10] sm:$0xf] %vm298_vm2, %v632_v3  ;;  %v655_v16 = vshll.u32 %v3247_v63, 16  ;;  %v947_v21 = vsel %vm4005_vm8, %v640_v10, %v946_v6  ;;  %v649_v22 = vsel %vm4011_vm9, %v641_v11, %v648_v12  ;;  %v951_v23 = vsel %vm3887_vm3, %v650_v13, %v950_v8 }
  0x41   : > { %945 = vst [vmem:[#allocation2 + $0x14] sm:$0x1] %v944_v4  ;;  %v669_v24 = vshrl.u32 %v3249_v9, 16  ;;  %948 = vst [vmem:[#allocation2 + $0x18] sm:$0xf] %v947_v21  ;;  %v654_v25 = vrot.slane %v652_v15, 7  ;;  %v3250_v28 = vpack.c.bf16 %v494_v50, %v494_v50  ;;  %v425_v32 = vmul.f32 %v3971_v5, %v274_v14 }
  0x42   : > { %949 = vst.msk [vmem:[#allocation2 + $0x1c] sm:$0xf] %vm298_vm2, %v649_v22  ;;  %952 = vst [vmem:[#allocation2 + $0x20] sm:$0x1] %v951_v23  ;;  %v662_v26 = vrot.slane %v660_v17, 7  ;;  %v672_v27 = vshll.u32 %v3249_v9, 16  ;;  %v426_v33 = vmul.f32 %v3971_v5, %v275_v19  ;;  %v427_v34 = vmul.f32 %v3971_v5, %v276_v20 }
  0x43   : > { %v671_v31 = vrot.slane %v669_v24, 7  ;;  %v657_v35 = vor.u32 %v655_v16, %v654_v25  ;;  %v658_v36 = vrot.slane %v654_v25, 4  ;;  %v677_v42 = vshrl.u32 %v3250_v28, 16  ;;  %v280_v17 = vld [vmem:[%s3872_s30 + $0x70] sm:$0xff] }
  0x44   : > { %v665_v37 = vor.u32 %v663_v18, %v662_v26  ;;  %v667_v38 = vrot.slane %v662_v26, 4  ;;  %v680_v43 = vshll.u32 %v3250_v28, 16  ;;  %v463_v52 = vadd.f32 %v3977_v7, %v425_v32  ;;  %v281_v18 = vld [vmem:[%s3872_s30 + $0x78] sm:$0xff] }
  0x45   : > { %v674_v40 = vor.u32 %v672_v27, %v671_v31  ;;  %v675_v41 = vrot.slane %v671_v31, 4  ;;  %v954_v48 = vsel %vm4005_vm8, %v657_v35, %v953_v29  ;;  %v679_v54 = vrot.slane %v677_v42, 7  ;;  %v967_v27 = vld [vmem:[#allocation2 + $0x3c] sm:$0xf]  ;;  %v971_v29 = vld [vmem:[#allocation2 + $0x44] sm:$0x1] }
  0x46   : > { %v666_v49 = vsel %vm4011_vm9, %v658_v36, %v665_v37  ;;  %v958_v50 = vsel %vm3887_vm3, %v667_v38, %v957_v30  ;;  %955 = vst [vmem:[#allocation2 + $0x24] sm:$0xf] %v954_v48  ;;  %v464_v55 = vadd.f32 %v3977_v7, %v426_v33  ;;  %v465_v56 = vadd.f32 %v3977_v7, %v427_v34  ;;  %v974_v35 = vld [vmem:[#allocation2 + $0x48] sm:$0xf] }
  0x47   : > { %956 = vst.msk [vmem:[#allocation2 + $0x28] sm:$0xf] %vm298_vm2, %v666_v49  ;;  %959 = vst [vmem:[#allocation2 + $0x2c] sm:$0x1] %v958_v50  ;;  %v961_v53 = vsel %vm4005_vm8, %v674_v40, %v960_v39  ;;  %v495_v58 = vmax.f32 %v463_v52, 0.0  ;;  %v428_v59 = vmul.f32 %v3971_v5, %v277_v44  ;;  %v429_v60 = vmul.f32 %v3971_v5, %v278_v46 }
  0x48   : > { %962 = vst [vmem:[#allocation2 + $0x30] sm:$0xf] %v961_v53  ;;  %v430_v61 = vmul.f32 %v3971_v5, %v279_v47  ;;  %v682_v62 = vor.u32 %v680_v43, %v679_v54  ;;  %v684_v63 = vrot.slane %v679_v54, 4  ;;  %v496_v0 = vmax.f32 %v464_v55, 0.0  ;;  %v282_v47 = vld [vmem:[%s3872_s30 + $0x80] sm:$0xff] }
  0x49   : > { %v497_v2 = vmax.f32 %v465_v56, 0.0  ;;  %v3251_v3 = vpack.c.bf16 %v495_v58, %v495_v58  ;;  %v466_v4 = vadd.f32 %v3977_v7, %v428_v59  ;;  %v467_v6 = vadd.f32 %v3977_v7, %v429_v60  ;;  %v978_v52 = vld [vmem:[#allocation2 + $0x50] sm:$0x1] }
  0x4a   : > { %v468_v8 = vadd.f32 %v3977_v7, %v430_v61  ;;  %v683_v9 = vsel %vm4011_vm9, %v675_v41, %v682_v62  ;;  %v965_v10 = vsel %vm3887_vm3, %v684_v63, %v964_v57  ;;  %v3252_v11 = vpack.c.bf16 %v496_v0, %v496_v0  ;;  %v981_v57 = vld [vmem:[#allocation2 + $0x54] sm:$0xf]  ;;  %v283_v63 = vld [vmem:[%s3872_s30 + $0x88] sm:$0xff] }
  0x4b   : > { %v3253_v12 = vpack.c.bf16 %v497_v2, %v497_v2  ;;  %963 = vst.msk [vmem:[#allocation2 + $0x34] sm:$0xf] %vm298_vm2, %v683_v9  ;;  %966 = vst [vmem:[#allocation2 + $0x38] sm:$0x1] %v965_v10  ;;  %v686_v13 = vshrl.u32 %v3251_v3, 16  ;;  %v689_v14 = vshll.u32 %v3251_v3, 16  ;;  %v431_v31 = vmul.f32 %v3971_v5, %v280_v17 }
  0x4c   : > { %v498_v15 = vmax.f32 %v466_v4, 0.0  ;;  %v499_v16 = vmax.f32 %v467_v6, 0.0  ;;  %v694_v19 = vshrl.u32 %v3252_v11, 16  ;;  %v697_v20 = vshll.u32 %v3252_v11, 16  ;;  %v284_v0 = vld [vmem:[%s3872_s30 + $0x90] sm:$0xff]  ;;  %v285_v2 = vld [vmem:[%s3872_s30 + $0x98] sm:$0xff] }
  0x4d   : > { %v703_v21 = vshrl.u32 %v3253_v12, 16  ;;  %v706_v22 = vshll.u32 %v3253_v12, 16  ;;  %v688_v23 = vrot.slane %v686_v13, 7  ;;  %v500_v26 = vmax.f32 %v468_v8, 0.0 }
  0x4e   : > { %v3254_v24 = vpack.c.bf16 %v498_v15, %v498_v15  ;;  %v3255_v25 = vpack.c.bf16 %v499_v16, %v499_v16  ;;  %v696_v28 = vrot.slane %v694_v19, 7  ;;  %v432_v32 = vmul.f32 %v3971_v5, %v281_v18 }
  0x4f   : > { %v705_v30 = vrot.slane %v703_v21, 7  ;;  %v691_v33 = vor.u32 %v689_v14, %v688_v23  ;;  %v692_v34 = vrot.slane %v688_v23, 4  ;;  %v3256_v53 = vpack.c.bf16 %v500_v26, %v500_v26  ;;  %v985_v14 = vld [vmem:[#allocation2 + $0x5c] sm:$0x1]  ;;  %v286_v26 = vld [vmem:[%s3872_s30 + $0xa0] sm:$0xff] }
  0x50   : > { %v711_v36 = vshrl.u32 %v3254_v24, 16  ;;  %v714_v37 = vshll.u32 %v3254_v24, 16  ;;  %v699_v38 = vor.u32 %v697_v20, %v696_v28  ;;  %v701_v39 = vrot.slane %v696_v28, 4 }
  0x51   : > { %v708_v40 = vor.u32 %v706_v22, %v705_v30  ;;  %v709_v41 = vrot.slane %v705_v30, 4  ;;  %v968_v42 = vsel %vm4005_vm8, %v691_v33, %v967_v27  ;;  %v720_v44 = vshrl.u32 %v3255_v25, 16 }
  0x52   : > { %v713_v43 = vrot.slane %v711_v36, 7  ;;  %v723_v46 = vshll.u32 %v3255_v25, 16  ;;  %969 = vst [vmem:[#allocation2 + $0x3c] sm:$0xf] %v968_v42  ;;  %v700_v48 = vsel %vm4011_vm9, %v692_v34, %v699_v38  ;;  %v972_v49 = vsel %vm3887_vm3, %v701_v39, %v971_v29  ;;  %v988_v39 = vld [vmem:[#allocation2 + $0x60] sm:$0xf] }
  0x53   : > { %v975_v50 = vsel %vm4005_vm8, %v708_v40, %v974_v35  ;;  %970 = vst.msk [vmem:[#allocation2 + $0x40] sm:$0xf] %vm298_vm2, %v700_v48  ;;  %973 = vst [vmem:[#allocation2 + $0x44] sm:$0x1] %v972_v49  ;;  %v722_v56 = vrot.slane %v720_v44, 7  ;;  %v469_v58 = vadd.f32 %v3977_v7, %v431_v31  ;;  %v728_v59 = vshrl.u32 %v3256_v53, 16 }
  0x54   : > { %976 = vst [vmem:[#allocation2 + $0x48] sm:$0xf] %v975_v50  ;;  %v716_v54 = vor.u32 %v714_v37, %v713_v43  ;;  %v718_v55 = vrot.slane %v713_v43, 4  ;;  %v731_v60 = vshll.u32 %v3256_v53, 16  ;;  %v470_v61 = vadd.f32 %v3977_v7, %v432_v32 }
  0x55   : > { %v433_v62 = vmul.f32 %v3971_v5, %v282_v47  ;;  %v725_v6 = vor.u32 %v723_v46, %v722_v56  ;;  %v726_v8 = vrot.slane %v722_v56, 4  ;;  %v730_v9 = vrot.slane %v728_v59, 7  ;;  %v992_v47 = vld [vmem:[#allocation2 + $0x68] sm:$0x1] }
  0x56   : > { %v717_v3 = vsel %vm4011_vm9, %v709_v41, %v716_v54  ;;  %v979_v4 = vsel %vm3887_vm3, %v718_v55, %v978_v52  ;;  %v501_v10 = vmax.f32 %v469_v58, 0.0  ;;  %v502_v11 = vmax.f32 %v470_v61, 0.0  ;;  %v995_v54 = vld [vmem:[#allocation2 + $0x6c] sm:$0xf]  ;;  %v288_v61 = vld [vmem:[%s3872_s30 + $0xb0] sm:$0xff] }
  0x57   : > { %977 = vst.msk [vmem:[#allocation2 + $0x4c] sm:$0xf] %vm298_vm2, %v717_v3  ;;  %980 = vst [vmem:[#allocation2 + $0x50] sm:$0x1] %v979_v4  ;;  %v471_v12 = vadd.f32 %v3977_v7, %v433_v62  ;;  %v982_v13 = vsel %vm4005_vm8, %v725_v6, %v981_v57  ;;  %v434_v15 = vmul.f32 %v3971_v5, %v283_v63  ;;  %v735_v19 = vrot.slane %v730_v9, 4 }
  0x58   : > { %v435_v16 = vmul.f32 %v3971_v5, %v284_v0  ;;  %v436_v17 = vmul.f32 %v3971_v5, %v285_v2  ;;  %983 = vst [vmem:[#allocation2 + $0x54] sm:$0xf] %v982_v13  ;;  %v733_v18 = vor.u32 %v731_v60, %v730_v9  ;;  %v3257_v20 = vpack.c.bf16 %v501_v10, %v501_v10  ;;  %v287_v60 = vld [vmem:[%s3872_s30 + $0xa8] sm:$0xff]  ;;  %v999_v10 = vld [vmem:[#allocation2 + $0x74] sm:$0x1] }
  0x59   : > { %v3258_v21 = vpack.c.bf16 %v502_v11, %v502_v11  ;;  %v503_v22 = vmax.f32 %v471_v12, 0.0  ;;  %v472_v23 = vadd.f32 %v3977_v7, %v434_v15  ;;  %v986_v28 = vsel %vm3887_vm3, %v735_v19, %v985_v14  ;;  %v1002_v11 = vld [vmem:[#allocation2 + $0x78] sm:$0xf] }
  0x5a   : > { %v473_v24 = vadd.f32 %v3977_v7, %v435_v16  ;;  %v474_v25 = vadd.f32 %v3977_v7, %v436_v17  ;;  %v734_v27 = vsel %vm4011_vm9, %v726_v8, %v733_v18  ;;  %v737_v29 = vshrl.u32 %v3257_v20, 16  ;;  %987 = vst [vmem:[#allocation2 + $0x5c] sm:$0x1] %v986_v28  ;;  %v289_v15 = vld [vmem:[%s3872_s30 + $0xb8] sm:$0xff] }
  0x5b   : > { %v740_v30 = vshll.u32 %v3257_v20, 16  ;;  %984 = vst.msk [vmem:[#allocation2 + $0x58] sm:$0xf] %vm298_vm2, %v734_v27  ;;  %v745_v31 = vshrl.u32 %v3258_v21, 16  ;;  %v748_v32 = vshll.u32 %v3258_v21, 16  ;;  %v3259_v33 = vpack.c.bf16 %v503_v22, %v503_v22 }
  0x5c   : > { %v504_v34 = vmax.f32 %v472_v23, 0.0  ;;  %v739_v35 = vrot.slane %v737_v29, 7  ;;  %v505_v36 = vmax.f32 %v473_v24, 0.0  ;;  %v506_v37 = vmax.f32 %v474_v25, 0.0  ;;  %v290_v24 = vld [vmem:[%s3872_s30 + $0xc0] sm:$0xff]  ;;  %v291_v25 = vld [vmem:[%s3872_s30 + $0xc8] sm:$0xff] }
  0x5d   : > { %v437_v38 = vmul.f32 %v3971_v5, %v286_v26  ;;  %v747_v40 = vrot.slane %v745_v31, 7  ;;  %v754_v41 = vshrl.u32 %v3259_v33, 16  ;;  %v757_v42 = vshll.u32 %v3259_v33, 16  ;;  %v1006_v29 = vld [vmem:[#allocation2 + $0x80] sm:$0x1] }
  0x5e   : > { %v3260_v43 = vpack.c.bf16 %v504_v34, %v504_v34  ;;  %v742_v44 = vor.u32 %v740_v30, %v739_v35  ;;  %v743_v46 = vrot.slane %v739_v35, 4  ;;  %v3261_v48 = vpack.c.bf16 %v505_v36, %v505_v36 }
  0x5f   : > { %v3262_v49 = vpack.c.bf16 %v506_v37, %v506_v37  ;;  %v750_v50 = vor.u32 %v748_v32, %v747_v40  ;;  %v752_v52 = vrot.slane %v747_v40, 4  ;;  %v756_v53 = vrot.slane %v754_v41, 7  ;;  %v293_v40 = vld [vmem:[%s3872_s30 + $0xd8] sm:$0xff] }
  0x60   : > { %v762_v55 = vshrl.u32 %v3260_v43, 16  ;;  %v989_v56 = vsel %vm4005_vm8, %v742_v44, %v988_v39  ;;  %v765_v57 = vshll.u32 %v3260_v43, 16  ;;  %v771_v58 = vshrl.u32 %v3261_v48, 16  ;;  %v292_v39 = vld [vmem:[%s3872_s30 + $0xd0] sm:$0xff] }
  0x61   : > { %v774_v59 = vshll.u32 %v3261_v48, 16  ;;  %990 = vst [vmem:[#allocation2 + $0x60] sm:$0xf] %v989_v56  ;;  %v751_v62 = vsel %vm4011_vm9, %v743_v46, %v750_v50  ;;  %v993_v63 = vsel %vm3887_vm3, %v752_v52, %v992_v47  ;;  %v759_v0 = vor.u32 %v757_v42, %v756_v53 }
  0x62   : > { %v760_v2 = vrot.slane %v756_v53, 4  ;;  %991 = vst.msk [vmem:[#allocation2 + $0x64] sm:$0xf] %vm298_vm2, %v751_v62  ;;  %994 = vst [vmem:[#allocation2 + $0x68] sm:$0x1] %v993_v63  ;;  %v764_v3 = vrot.slane %v762_v55, 7  ;;  %v475_v12 = vadd.f32 %v3977_v7, %v437_v38  ;;  %v438_v13 = vmul.f32 %v3971_v5, %v287_v60 }
  0x63   : > { %v773_v4 = vrot.slane %v771_v58, 7  ;;  %v779_v6 = vshrl.u32 %v3262_v49, 16  ;;  %v782_v8 = vshll.u32 %v3262_v49, 16  ;;  %v996_v9 = vsel %vm4005_vm8, %v759_v0, %v995_v54  ;;  %v1009_v55 = vld [vmem:[#allocation2 + $0x84] sm:$0xf] }
  0x64   : > { %v439_v14 = vmul.f32 %v3971_v5, %v288_v61  ;;  %997 = vst [vmem:[#allocation2 + $0x6c] sm:$0xf] %v996_v9  ;;  %v767_v16 = vor.u32 %v765_v57, %v764_v3  ;;  %v769_v17 = vrot.slane %v764_v3, 4  ;;  %v507_v21 = vmax.f32 %v475_v12, 0.0  ;;  %v1016_v9 = vld [vmem:[#allocation2 + $0x90] sm:$0xf] }
  0x65   : > { %v776_v18 = vor.u32 %v774_v59, %v773_v4  ;;  %v777_v19 = vrot.slane %v773_v4, 4  ;;  %v781_v20 = vrot.slane %v779_v6, 7  ;;  %v476_v22 = vadd.f32 %v3977_v7, %v438_v13 }
  0x66   : > { %v477_v23 = vadd.f32 %v3977_v7, %v439_v14  ;;  %v768_v26 = vsel %vm4011_vm9, %v760_v2, %v767_v16  ;;  %v1000_v27 = vsel %vm3887_vm3, %v769_v17, %v999_v10  ;;  %v440_v30 = vmul.f32 %v3971_v5, %v289_v15 }
  0x67   : > { %v1003_v28 = vsel %vm4005_vm8, %v776_v18, %v1002_v11  ;;  %998 = vst.msk [vmem:[#allocation2 + $0x70] sm:$0xf] %vm298_vm2, %v768_v26  ;;  %1001 = vst [vmem:[#allocation2 + $0x74] sm:$0x1] %v1000_v27  ;;  %v784_v31 = vor.u32 %v782_v8, %v781_v20  ;;  %v786_v32 = vrot.slane %v781_v20, 4  ;;  %v3263_v33 = vpack.c.bf16 %v507_v21, %v507_v21  ;;  %v294_v21 = vld [vmem:[%s3872_s30 + $0xe0] sm:$0xff] }
  0x68   : > { %1004 = vst [vmem:[#allocation2 + $0x78] sm:$0xf] %v1003_v28  ;;  %v508_v34 = vmax.f32 %v476_v22, 0.0  ;;  %v509_v35 = vmax.f32 %v477_v23, 0.0  ;;  %v478_v36 = vadd.f32 %v3977_v7, %v440_v30  ;;  %v441_v37 = vmul.f32 %v3971_v5, %v290_v24  ;;  %v1013_v8 = vld [vmem:[#allocation2 + $0x8c] sm:$0x1] }
  0x69   : > { %v442_v38 = vmul.f32 %v3971_v5, %v291_v25  ;;  %v785_v41 = vsel %vm4011_vm9, %v777_v19, %v784_v31  ;;  %v1007_v42 = vsel %vm3887_vm3, %v786_v32, %v1006_v29  ;;  %v788_v43 = vshrl.u32 %v3263_v33, 16  ;;  %v1020_v25 = vld [vmem:[#allocation2 + $0x98] sm:$0x1]  ;;  %v1023_v31 = vld [vmem:[#allocation2 + $0x9c] sm:$0xf] }
  0x6a   : > { %v791_v44 = vshll.u32 %v3263_v33, 16  ;;  %1005 = vst.msk [vmem:[#allocation2 + $0x7c] sm:$0xf] %vm298_vm2, %v785_v41  ;;  %1008 = vst [vmem:[#allocation2 + $0x80] sm:$0x1] %v1007_v42  ;;  %v3264_v46 = vpack.c.bf16 %v508_v34, %v508_v34  ;;  %v3265_v47 = vpack.c.bf16 %v509_v35, %v509_v35  ;;  %v510_v48 = vmax.f32 %v478_v36, 0.0 }
  0x6b   : > { %v479_v49 = vadd.f32 %v3977_v7, %v441_v37  ;;  %v790_v50 = vrot.slane %v788_v43, 7  ;;  %v480_v52 = vadd.f32 %v3977_v7, %v442_v38  ;;  %v443_v53 = vmul.f32 %v3971_v5, %v292_v39  ;;  %v295_v36 = vld [vmem:[%s3872_s30 + $0xe8] sm:$0xff]  ;;  %v296_v37 = vld [vmem:[%s3872_s30 + $0xf0] sm:$0xff] }
  0x6c   : > { %v444_v54 = vmul.f32 %v3971_v5, %v293_v40  ;;  %v796_v56 = vshrl.u32 %v3264_v46, 16  ;;  %v799_v57 = vshll.u32 %v3264_v46, 16  ;;  %v805_v58 = vshrl.u32 %v3265_v47, 16 }
  0x6d   : > { %v808_v59 = vshll.u32 %v3265_v47, 16  ;;  %v793_v60 = vor.u32 %v791_v44, %v790_v50  ;;  %v794_v61 = vrot.slane %v790_v50, 4  ;;  %v3266_v62 = vpack.c.bf16 %v510_v48, %v510_v48  ;;  %v297_v47 = vld [vmem:[%s3872_s30 + $0xf8] sm:$0xff] }
  0x6e   : > { %v511_v63 = vmax.f32 %v479_v49, 0.0  ;;  %v798_v0 = vrot.slane %v796_v56, 7  ;;  %v807_v2 = vrot.slane %v805_v58, 7  ;;  %v512_v3 = vmax.f32 %v480_v52, 0.0  ;;  %v1027_v49 = vld [vmem:[#allocation2 + $0xa4] sm:$0x1] }
  0x6f   : > { %v481_v4 = vadd.f32 %v3977_v7, %v443_v53  ;;  %v1010_v6 = vsel %vm4005_vm8, %v793_v60, %v1009_v55  ;;  %v813_v10 = vshrl.u32 %v3266_v62, 16  ;;  %v816_v11 = vshll.u32 %v3266_v62, 16  ;;  %v1030_v58 = vld [vmem:[#allocation2 + $0xa8] sm:$0xf] }
  0x70   : > { %v3267_v12 = vpack.c.bf16 %v511_v63, %v511_v63  ;;  %1011 = vst [vmem:[#allocation2 + $0x84] sm:$0xf] %v1010_v6  ;;  %v801_v13 = vor.u32 %v799_v57, %v798_v0  ;;  %v803_v14 = vrot.slane %v798_v0, 4  ;;  %v810_v15 = vor.u32 %v808_v59, %v807_v2 }
  0x71   : > { %v811_v16 = vrot.slane %v807_v2, 4  ;;  %v815_v17 = vrot.slane %v813_v10, 7  ;;  %v3268_v20 = vpack.c.bf16 %v512_v3, %v512_v3  ;;  %v513_v26 = vmax.f32 %v481_v4, 0.0 }
  0x72   : > { %v822_v18 = vshrl.u32 %v3267_v12, 16  ;;  %v825_v19 = vshll.u32 %v3267_v12, 16  ;;  %v802_v22 = vsel %vm4011_vm9, %v794_v61, %v801_v13  ;;  %v1014_v23 = vsel %vm3887_vm3, %v803_v14, %v1013_v8 }
  0x73   : > { %v1017_v24 = vsel %vm4005_vm8, %v810_v15, %v1016_v9  ;;  %1012 = vst.msk [vmem:[#allocation2 + $0x88] sm:$0xf] %vm298_vm2, %v802_v22  ;;  %1015 = vst [vmem:[#allocation2 + $0x8c] sm:$0x1] %v1014_v23  ;;  %v818_v27 = vor.u32 %v816_v11, %v815_v17  ;;  %v820_v28 = vrot.slane %v815_v17, 4  ;;  %v830_v30 = vshrl.u32 %v3268_v20, 16 }
  0x74   : > { %1018 = vst [vmem:[#allocation2 + $0x90] sm:$0xf] %v1017_v24  ;;  %v824_v29 = vrot.slane %v822_v18, 7  ;;  %v833_v32 = vshll.u32 %v3268_v20, 16  ;;  %v3269_v33 = vpack.c.bf16 %v513_v26, %v513_v26  ;;  %v482_v34 = vadd.f32 %v3977_v7, %v444_v54  ;;  %v1037_v23 = vld [vmem:[#allocation2 + $0xb4] sm:$0xf] }
  0x75   : > { %v445_v35 = vmul.f32 %v3971_v5, %v294_v21  ;;  %v819_v38 = vsel %vm4011_vm9, %v811_v16, %v818_v27  ;;  %v1021_v39 = vsel %vm3887_vm3, %v820_v28, %v1020_v25  ;;  %v832_v42 = vrot.slane %v830_v30, 7  ;;  %v1034_v16 = vld [vmem:[#allocation2 + $0xb0] sm:$0x1] }
  0x76   : > { %v827_v40 = vor.u32 %v825_v19, %v824_v29  ;;  %v828_v41 = vrot.slane %v824_v29, 4  ;;  %1019 = vst.msk [vmem:[#allocation2 + $0x94] sm:$0xf] %vm298_vm2, %v819_v38  ;;  %1022 = vst [vmem:[#allocation2 + $0x98] sm:$0x1] %v1021_v39  ;;  %v839_v43 = vshrl.u32 %v3269_v33, 16  ;;  %v446_v52 = vmul.f32 %v3971_v5, %v295_v36 }
  0x77   : > { %v842_v44 = vshll.u32 %v3269_v33, 16  ;;  %v514_v46 = vmax.f32 %v482_v34, 0.0  ;;  %v483_v50 = vadd.f32 %v3977_v7, %v445_v35  ;;  %v447_v53 = vmul.f32 %v3971_v5, %v296_v37  ;;  %v1041_v35 = vld [vmem:[#allocation2 + $0xbc] sm:$0x1]  ;;  %v1044_v36 = vld [vmem:[#allocation2 + $0xc0] sm:$0xf] }
  0x78   : > { %v1024_v48 = vsel %vm4005_vm8, %v827_v40, %v1023_v31  ;;  %v835_v54 = vor.u32 %v833_v32, %v832_v42  ;;  %v837_v55 = vrot.slane %v832_v42, 4  ;;  %v841_v56 = vrot.slane %v839_v43, 7 }
  0x79   : > { %1025 = vst [vmem:[#allocation2 + $0x9c] sm:$0xf] %v1024_v48  ;;  %v3270_v57 = vpack.c.bf16 %v514_v46, %v514_v46  ;;  %v515_v59 = vmax.f32 %v483_v50, 0.0  ;;  %v484_v60 = vadd.f32 %v3977_v7, %v446_v52  ;;  %v485_v61 = vadd.f32 %v3977_v7, %v447_v53 }
  0x7a   : > { %v448_v62 = vmul.f32 %v3971_v5, %v297_v47  ;;  %v836_v63 = vsel %vm4011_vm9, %v828_v41, %v835_v54  ;;  %v1028_v0 = vsel %vm3887_vm3, %v837_v55, %v1027_v49  ;;  %v844_v2 = vor.u32 %v842_v44, %v841_v56  ;;  %v1048_v47 = vld [vmem:[#allocation2 + $0xc8] sm:$0x1] }
  0x7b   : > { %1026 = vst.msk [vmem:[#allocation2 + $0xa0] sm:$0xf] %vm298_vm2, %v836_v63  ;;  %1029 = vst [vmem:[#allocation2 + $0xa4] sm:$0x1] %v1028_v0  ;;  %v847_v3 = vshrl.u32 %v3270_v57, 16  ;;  %v850_v4 = vshll.u32 %v3270_v57, 16  ;;  %v3271_v6 = vpack.c.bf16 %v515_v59, %v515_v59 }
  0x7c   : > { %v516_v8 = vmax.f32 %v484_v60, 0.0  ;;  %v1031_v9 = vsel %vm4005_vm8, %v844_v2, %v1030_v58  ;;  %v845_v10 = vrot.slane %v841_v56, 4  ;;  %v517_v11 = vmax.f32 %v485_v61, 0.0 }
  0x7d   : > { %v486_v5 = vadd.f32 %v3977_v7, %v448_v62  ;;  %1032 = vst [vmem:[#allocation2 + $0xa8] sm:$0xf] %v1031_v9  ;;  %v849_v12 = vrot.slane %v847_v3, 7  ;;  %v856_v13 = vshrl.u32 %v3271_v6, 16  ;;  %v859_v14 = vshll.u32 %v3271_v6, 16 }
  0x7e   : > { %v3272_v15 = vpack.c.bf16 %v516_v8, %v516_v8  ;;  %v3273_v17 = vpack.c.bf16 %v517_v11, %v517_v11 }
  0x7f   : > { %v518_v18 = vmax.f32 %v486_v5, 0.0  ;;  %v852_v19 = vor.u32 %v850_v4, %v849_v12  ;;  %v854_v20 = vrot.slane %v849_v12, 4  ;;  %v858_v21 = vrot.slane %v856_v13, 7 }
  0x80   : > { %v864_v22 = vshrl.u32 %v3272_v15, 16  ;;  %v867_v24 = vshll.u32 %v3272_v15, 16  ;;  %v873_v25 = vshrl.u32 %v3273_v17, 16  ;;  %v876_v26 = vshll.u32 %v3273_v17, 16 }
  0x81   : > { %v3274_v27 = vpack.c.bf16 %v518_v18, %v518_v18  ;;  %v853_v7 = vsel %vm4011_vm9, %v845_v10, %v852_v19  ;;  %v1035_v28 = vsel %vm3887_vm3, %v854_v20, %v1034_v16  ;;  %v861_v29 = vor.u32 %v859_v14, %v858_v21 }
  0x82   : > { %1033 = vst.msk [vmem:[#allocation2 + $0xac] sm:$0xf] %vm298_vm2, %v853_v7  ;;  %1036 = vst [vmem:[#allocation2 + $0xb0] sm:$0x1] %v1035_v28  ;;  %v862_v30 = vrot.slane %v858_v21, 4  ;;  %v866_v31 = vrot.slane %v864_v22, 7 }
  0x83   : > { %v875_v32 = vrot.slane %v873_v25, 7  ;;  %v881_v33 = vshrl.u32 %v3274_v27, 16  ;;  %v1038_v34 = vsel %vm4005_vm8, %v861_v29, %v1037_v23  ;;  %v884_v37 = vshll.u32 %v3274_v27, 16 }
  0x84   : > { %1039 = vst [vmem:[#allocation2 + $0xb4] sm:$0xf] %v1038_v34  ;;  %v869_v38 = vor.u32 %v867_v24, %v866_v31  ;;  %v871_v39 = vrot.slane %v866_v31, 4 }
  0x85   : > { %v878_v40 = vor.u32 %v876_v26, %v875_v32  ;;  %v879_v41 = vrot.slane %v875_v32, 4  ;;  %v883_v42 = vrot.slane %v881_v33, 7 }
  0x86   : > { %v870_v43 = vsel %vm4011_vm9, %v862_v30, %v869_v38  ;;  %v1042_v44 = vsel %vm3887_vm3, %v871_v39, %v1041_v35 }
  0x87   : > { %v1045_v46 = vsel %vm4005_vm8, %v878_v40, %v1044_v36  ;;  %1040 = vst.msk [vmem:[#allocation2 + $0xb8] sm:$0xf] %vm298_vm2, %v870_v43  ;;  %1043 = vst [vmem:[#allocation2 + $0xbc] sm:$0x1] %v1042_v44  ;;  %v886_v48 = vor.u32 %v884_v37, %v883_v42  ;;  %v888_v49 = vrot.slane %v883_v42, 4 }
  0x88   : > { %1046 = vst [vmem:[#allocation2 + $0xc0] sm:$0xf] %v1045_v46 }
  0x89   : > { %v887_v50 = vsel %vm4011_vm9, %v879_v41, %v886_v48  ;;  %v1049_v52 = vsel %vm3887_vm3, %v888_v49, %v1048_v47 }
  0x8a   : > { %1047 = vst.msk [vmem:[#allocation2 + $0xc4] sm:$0xf] %vm298_vm2, %v887_v50  ;;  %1050 = vst [vmem:[#allocation2 + $0xc8] sm:$0x1] %v1049_v52 }
  0x8b PF: > { %v3736_v45 = vld [vmem:[%s4848_s3 + $0x10] sm:$0xff]   ;;  %s3275_s28 = smul.u32 96, %s3786_s18  ;;  %v4206_v53 = vld [vmem:[%s4848_s3 + $0x40] sm:$0xff]   ;;  %v3738_v1 = vld [vmem:[%s4848_s3 + $0x18] sm:$0xff]   ;;  %vm1091_vm10 = vsmask.f32 3328 }
  0x8c   : > { %3382 = vmatprep.subr.bf16.mxu1 %v3736_v45  ;;  %3462 = vmatprep.subr.bf16.mxu0 %v4206_v53  ;;  %v4215_v51 = vld [vmem:[%s4848_s3 + $0x48] sm:$0xff]   ;;  %vm1092_vm11 = vsmask.f32 7440  ;;  %v4238_v0 = vld [vmem:[%s4848_s3] sm:$0xff]   ;;  %v4243_v2 = vld [vmem:[%s4848_s3 + $0x50] sm:$0xff]   ;;  %vm1326_vm13 = vcmask 261120  }
  0x8d   : > { %3383 = vmatpush3.bf16.msra.mxu1 %v3736_v45  ;;  %3463 = vmatpush3.bf16.msra.mxu0 %v4206_v53  ;;  %s4218_s18 = scalar_lea.vmem [#allocation2], %s3275_s28  ;;  %vm4261_vm12 = vmor %vm1091_vm10, %vm1092_vm11  ;;  %vm1629_vm14 = vcmask 1042432   ;;  %vm1630_vm15 = vcmask 1046532   ;;  %vm2904_vm1 = vcmask 257024   ;;  %vm2782_vm2 = vcmask 253952  }
  0x8e   : > { %3384 = vmatprep.subr.bf16.mxu1 %v3738_v1  ;;  %3464 = vmatprep.subr.bf16.mxu0 %v4215_v51  ;;  %vm4350_vm0 = vmor %vm1629_vm14, %vm1630_vm15 }
  0x91   : > { %v4221_v54 = vld [vmem:[%s4218_s18] sm:$0xf]  ;;  %v4224_v55 = vld [vmem:[%s4218_s18 + $0x4] sm:$0xf]  ;;  %v4227_v56 = vld [vmem:[%s4218_s18 + $0x8] sm:$0x1]  ;;  %3385 = vmatpush3.bf16.msra.mxu1 %v3738_v1  ;;  %3465 = vmatpush3.bf16.msra.mxu0 %v4215_v51 }
  0x92   : > { %v1095_v57 = vshrl.u32 %v4221_v54, 16  ;;  %v1098_v58 = vshll.u32 %v4221_v54, 16  ;;  %v1104_v59 = vshll.u32 %v4224_v55, 16  ;;  %v1108_v60 = vshrl.u32 %v4224_v55, 16  ;;  %v4247_v8 = vld [vmem:[%s4218_s18 + $0xc] sm:$0xf]  ;;  %3402 = vmatprep.subr.bf16.mxu1 %v4238_v0  ;;  %3482 = vmatprep.subr.bf16.mxu0 %v4243_v2 }
  0x93   : > { %v1114_v61 = vshll.u32 %v4227_v56, 16  ;;  %v4251_v10 = vld [vmem:[%s4218_s18 + $0x10] sm:$0xf]  ;;  %v4254_v11 = vld [vmem:[%s4218_s18 + $0x14] sm:$0x1]  ;;  %v1119_v5 = vshrl.u32 %v4247_v8, 16 }
  0x94   : > { %v1097_v62 = vrot.slane %v1095_v57, 4  ;;  %v1100_v63 = vrot.slane %v1098_v58, 5  ;;  %v1106_v3 = vrot.slane %v1104_v59, 5  ;;  %v1110_v4 = vrot.slane %v1108_v60, 4  ;;  %v4269_v25 = vld [vmem:[%s4218_s18 + $0x18] sm:$0xf] }
  0x95   : > { %v1116_v6 = vrot.slane %v1114_v61, 5  ;;  %v1122_v12 = vshll.u32 %v4247_v8, 16  ;;  %v1128_v15 = vshll.u32 %v4251_v10, 16  ;;  %v1132_v16 = vshrl.u32 %v4251_v10, 16  ;;  %v4275_v28 = vld [vmem:[%s4218_s18 + $0x1c] sm:$0xf] }
  0x96   : > { %v1101_v9 = vor.u32 %v1100_v63, %v1097_v62  ;;  %v1111_v14 = vor.u32 %v1110_v4, %v1106_v3  ;;  %v1138_v17 = vshll.u32 %v4254_v11, 16  ;;  %v1121_v19 = vrot.slane %v1119_v5, 4  ;;  %v4278_v29 = vld [vmem:[%s4218_s18 + $0x20] sm:$0x1]  ;;  %v4286_v35 = vld [vmem:[%s4218_s18 + $0x24] sm:$0xf] }
  0x97   : > { %v1124_v20 = vrot.slane %v1122_v12, 5  ;;  %v1130_v22 = vrot.slane %v1128_v15, 5  ;;  %v1134_v23 = vrot.slane %v1132_v16, 4  ;;  %v1644_v7 = vrot.slane %v4254_v11, 5  ;;  %v4289_v36 = vld [vmem:[%s4218_s18 + $0x28] sm:$0xf] }
  0x98   : > { %v1102_v18 = vrot.slane %v1101_v9, 4  ;;  %v1112_v21 = vrot.slane %v1111_v14, 4  ;;  %v1140_v24 = vrot.slane %v1138_v17, 5  ;;  %v1143_v30 = vshrl.u32 %v4269_v25, 16  ;;  %v4293_v41 = vld [vmem:[%s4218_s18 + $0x2c] sm:$0x1] }
  0x99   : > { %v1125_v27 = vor.u32 %v1124_v20, %v1121_v19  ;;  %v1135_v32 = vor.u32 %v1134_v23, %v1130_v22  ;;  %v1146_v33 = vshll.u32 %v4269_v25, 16  ;;  %v1152_v34 = vshll.u32 %v4275_v28, 16  ;;  %v4305_v58 = vld [vmem:[%s4218_s18 + $0x30] sm:$0xf]  ;;  %v3744_v59 = vld [vmem:[%s4848_s3 + $0x8] sm:$0xff]  }
  0x9a   : > { %v1107_v26 = vsel %vm4261_vm12, %v1102_v18, %v1106_v3  ;;  %v1117_v31 = vsel %vm4261_vm12, %v1112_v21, %v1116_v6  ;;  %v1145_v39 = vrot.slane %v1143_v30, 4  ;;  %v1156_v40 = vshrl.u32 %v4275_v28, 16  ;;  %v4313_v3 = vld [vmem:[%s4218_s18 + $0x34] sm:$0xf]  ;;  %v4318_v12 = vld [vmem:[%s4218_s18 + $0x38] sm:$0x1] }
  0x9b   : > { %v3094_v37 = vcombine.low %v1107_v26, %v1117_v31  ;;  %v1126_v38 = vrot.slane %v1125_v27, 4  ;;  %v1136_v42 = vrot.slane %v1135_v32, 4  ;;  %v1148_v43 = vrot.slane %v1146_v33, 5  ;;  %v4337_v33 = vld [vmem:[%s4218_s18 + $0x3c] sm:$0xf] }
  0x9c   : > { %v1154_v44 = vrot.slane %v1152_v34, 5  ;;  %v1162_v46 = vshll.u32 %v4278_v29, 16  ;;  %v1158_v48 = vrot.slane %v1156_v40, 4  ;;  %v1648_v49 = vrot.slane %v4275_v28, 5  ;;  %v4342_v34 = vld [vmem:[%s4848_s3 + $0x20] sm:$0xff]  }
  0x9d   : > { %3386 = vmatprep.mubr.msk.bf16.mxu1 %vm1326_vm13, %v3094_v37  ;;  %v1131_v47 = vsel %vm4261_vm12, %v1126_v38, %v1130_v22  ;;  %v1651_v50 = vrot.slane %v4278_v29, 5  ;;  %v1141_v52 = vsel %vm4261_vm12, %v1136_v42, %v1140_v24  ;;  %v1149_v45 = vor.u32 %v1148_v43, %v1145_v39  ;;  %v4404_v11 = vld [vmem:[%s4218_s18 + $0x50] sm:$0x1] }
  0x9e   : > { %v1164_v1 = vrot.slane %v1162_v46, 5  ;;  %v1167_v57 = vshrl.u32 %v4286_v35, 16  ;;  %v3095_v60 = vcombine.low %v1131_v47, %v1141_v52  ;;  %v1159_v61 = vor.u32 %v1158_v48, %v1154_v44 }
  0x9f   : > { %v1170_v62 = vshll.u32 %v4286_v35, 16  ;;  %v1176_v63 = vshll.u32 %v4289_v36, 16  ;;  %v1150_v4 = vrot.slane %v1149_v45, 4  ;;  %v1180_v9 = vshrl.u32 %v4289_v36, 16  ;;  %v4360_v45 = vld [vmem:[%s4218_s18 + $0x40] sm:$0xf] }
  0xa0   : > { %v1169_v6 = vrot.slane %v1167_v57, 4  ;;  %v1186_v5 = vshll.u32 %v4293_v41, 16  ;;  %3466 = vmatprep.mubr.msk.bf16.mxu0 %vm1326_vm13, %v3095_v60  ;;  %3387 = vmatmul.mubr.msk.bf16.vlgmr.msra.gmra.mrb[0].mxu1 %vm1326_vm13, %v3095_v60  ;;  %v1160_v14 = vrot.slane %v1159_v61, 4  ;;  %v1191_v17 = vshrl.u32 %v4305_v58, 16 }
  0xa1   : > { %v1172_v15 = vrot.slane %v1170_v62, 5  ;;  %v1178_v16 = vrot.slane %v1176_v63, 5  ;;  %3403 = vmatpush3.bf16.msra.mxu1 %v4238_v0  ;;  %v1155_v18 = vsel %vm4261_vm12, %v1150_v4, %v1154_v44  ;;  %v1182_v19 = vrot.slane %v1180_v9, 4  ;;  %v3743_v0 = vld [vmem:[%s4848_s3 + $0x58] sm:$0xff]   ;;  %v4371_v62 = vld [vmem:[%s4218_s18 + $0x44] sm:$0x1] }
  0xa2   : > { %v1188_v20 = vrot.slane %v1186_v5, 5  ;;  %v1194_v21 = vshll.u32 %v4305_v58, 16  ;;  %v1165_v22 = vsel %vm4261_vm12, %v1160_v14, %v1164_v1  ;;  %v1193_v24 = vrot.slane %v1191_v17, 4  ;;  %3404 = vmatprep.subr.bf16.mxu1 %v3744_v59  ;;  %v4380_v5 = vld [vmem:[%s4218_s18 + $0x48] sm:$0xf] }
  0xa3   : > { %v1173_v23 = vor.u32 %v1172_v15, %v1169_v6  ;;  %v1200_v26 = vshll.u32 %v4313_v3, 16  ;;  %v4330_v27 = vcombine.low %v1155_v18, %v1165_v22  ;;  %v1183_v30 = vor.u32 %v1182_v19, %v1178_v16 }
  0xa4   : > { %v1196_v31 = vrot.slane %v1194_v21, 5  ;;  %v1204_v32 = vshrl.u32 %v4313_v3, 16  ;;  %v1210_v39 = vshll.u32 %v4318_v12, 16  ;;  %v3131_v46 = vrot.slane %v4247_v8, 9 }
  0xa5   : > { %v1174_v37 = vrot.slane %v1173_v23, 4  ;;  %v1202_v38 = vrot.slane %v1200_v26, 5  ;;  %3467 = vmatmul.mubr.msk.bf16.vlgmr.msra.gmra.mrb[0].mxu0 %vm1326_vm13, %v4330_v27  ;;  %3390 = vmatprep.mubr.msk.bf16.mxu1 %vm1326_vm13, %v4330_v27  ;;  %v1184_v40 = vrot.slane %v1183_v30, 4  ;;  %v1641_v52 = vrot.slane %v4251_v10, 5  ;;  %v4401_v30 = vld [vmem:[%s4218_s18 + $0x4c] sm:$0xf] }
  0xa6   : > { %v1197_v42 = vor.u32 %v1196_v31, %v1193_v24  ;;  %v1206_v43 = vrot.slane %v1204_v32, 4  ;;  %3483 = vmatpush3.bf16.msra.mxu0 %v4243_v2  ;;  %v1212_v48 = vrot.slane %v1210_v39, 5  ;;  %v1215_v1 = vshrl.u32 %v4337_v33, 16  ;;  %3405 = vmatpush3.bf16.msra.mxu1 %v3744_v59  ;;  %v4368_v2 = vld [vmem:[%s4848_s3 + $0x60] sm:$0xff]  }
  0xa7   : > { %v1179_v47 = vsel %vm4261_vm12, %v1174_v37, %v1178_v16  ;;  %v1189_v57 = vsel %vm4261_vm12, %v1184_v40, %v1188_v20  ;;  %3484 = vmatprep.subr.bf16.mxu0 %v3743_v0  ;;  %v1218_v63 = vshll.u32 %v4337_v33, 16  ;;  %3422 = vmatprep.subr.bf16.mxu1 %v4342_v34  ;;  %v1642_v59 = vsel %vm4350_vm0, %v3131_v46, %v1641_v52 }
  0xa8   : > { %v1198_v60 = vrot.slane %v1197_v42, 4  ;;  %v1207_v61 = vor.u32 %v1206_v43, %v1202_v38  ;;  %v4375_v4 = vcombine.low %v1179_v47, %v1189_v57  ;;  %v1643_v6 = vrot.slane %v1641_v52, 4  ;;  %v4418_v42 = vld [vmem:[%s4218_s18 + $0x54] sm:$0xf] }
  0xa9   : > { %v1217_v9 = vrot.slane %v1215_v1, 4  ;;  %v1220_v16 = vrot.slane %v1218_v63, 5  ;;  %v1224_v17 = vshll.u32 %v4360_v45, 16  ;;  %v1228_v19 = vshrl.u32 %v4360_v45, 16 }
  0xaa   : > { %v1203_v14 = vsel %vm4261_vm12, %v1198_v60, %v1202_v38  ;;  %v1208_v15 = vrot.slane %v1207_v61, 4  ;;  %3470 = vmatprep.mubr.msk.bf16.mxu0 %vm1326_vm13, %v4375_v4  ;;  %3391 = vmatmul.mubr.msk.bf16.gmra.mrb[4].mxu1 %vm1326_vm13, %v4375_v4  ;;  %v1645_v18 = vsel %vm4350_vm0, %v1643_v6, %v1644_v7  ;;  %v1234_v20 = vshll.u32 %v4371_v62, 16  ;;  %v4436_v60 = vld [vmem:[%s4218_s18 + $0x58] sm:$0xf] }
  0xab   : > { %v3132_v21 = vrot.slane %v4269_v25, 9  ;;  %3485 = vmatpush3.bf16.msra.mxu0 %v3743_v0  ;;  %v4398_v23 = vcombine.low %v1642_v59, %v1645_v18  ;;  %v1221_v24 = vor.u32 %v1220_v16, %v1217_v9  ;;  %v1226_v26 = vrot.slane %v1224_v17, 5  ;;  %v4446_v18 = vld [vmem:[%s4218_s18 + $0x5c] sm:$0x1] }
  0xac   : > { %v1213_v22 = vsel %vm4261_vm12, %v1208_v15, %v1212_v48  ;;  %3502 = vmatprep.subr.bf16.mxu0 %v4368_v2  ;;  %v1230_v31 = vrot.slane %v1228_v19, 4  ;;  %v1236_v32 = vrot.slane %v1234_v20, 5  ;;  %v1650_v38 = vrot.slane %v1648_v49, 4 }
  0xad   : > { %v4406_v7 = vcombine.low %v1203_v14, %v1213_v22  ;;  %v1649_v37 = vsel %vm4350_vm0, %v3132_v21, %v1648_v49  ;;  %v1222_v0 = vrot.slane %v1221_v24, 4  ;;  %v1239_v39 = vshrl.u32 %v4380_v5, 16 }
  0xae   : > { %v1242_v40 = vshll.u32 %v4380_v5, 16  ;;  %v1231_v43 = vor.u32 %v1230_v31, %v1226_v26  ;;  %v1248_v46 = vshll.u32 %v4401_v30, 16  ;;  %v1252_v47 = vshrl.u32 %v4401_v30, 16 }
  0xaf   : > { %3471 = vmatmul.mubr.msk.bf16.gmra.mrb[4].mxu0 %vm1326_vm13, %v4406_v7  ;;  %3394 = vmatprep.mubr.msk.bf16.mxu1 %vm1326_vm13, %v4406_v7  ;;  %v1258_v48 = vshll.u32 %v4404_v11, 16  ;;  %v1227_v49 = vsel %vm4261_vm12, %v1222_v0, %v1226_v26  ;;  %v1652_v52 = vsel %vm4350_vm0, %v1650_v38, %v1651_v50  ;;  %v1241_v1 = vrot.slane %v1239_v39, 4  ;;  %v3748_v26 = vld [vmem:[%s4848_s3 + $0x68] sm:$0xff]  }
  0xb0   : > { %3486 = vmatprep.mubr.msk.bf16.mxu0 %vm1326_vm13, %v4398_v23  ;;  %v1244_v57 = vrot.slane %v1242_v40, 5  ;;  %v1232_v61 = vrot.slane %v1231_v43, 4  ;;  %v4438_v63 = vcombine.low %v1649_v37, %v1652_v52  ;;  %v1250_v59 = vrot.slane %v1248_v46, 5 }
  0xb1   : > { %v1254_v6 = vrot.slane %v1252_v47, 4  ;;  %v1260_v14 = vrot.slane %v1258_v48, 5  ;;  %v3133_v15 = vrot.slane %v4286_v35, 9  ;;  %v1655_v16 = vrot.slane %v4289_v36, 5 }
  0xb2   : > { %v1245_v9 = vor.u32 %v1244_v57, %v1241_v1  ;;  %v1237_v29 = vsel %vm4261_vm12, %v1232_v61, %v1236_v32  ;;  %v1658_v50 = vrot.slane %v4293_v41, 5  ;;  %v1263_v19 = vshrl.u32 %v4418_v42, 16 }
  0xb3   : > { %v1255_v17 = vor.u32 %v1254_v6, %v1250_v59  ;;  %v4449_v20 = vcombine.low %v1227_v49, %v1237_v29  ;;  %v1656_v22 = vsel %vm4350_vm0, %v3133_v15, %v1655_v16  ;;  %v1657_v24 = vrot.slane %v1655_v16, 4 }
  0xb4   : > { %v1246_v21 = vrot.slane %v1245_v9, 4  ;;  %v1265_v32 = vrot.slane %v1263_v19, 4  ;;  %v1266_v37 = vshll.u32 %v4418_v42, 16  ;;  %v1272_v41 = vshll.u32 %v4436_v60, 16 }
  0xb5   : > { %v1256_v31 = vrot.slane %v1255_v17, 4  ;;  %3395 = vmatmul.mubr.msk.bf16.gmra.mrb[8].mxu1 %vm1326_vm13, %v4449_v20  ;;  %v1659_v38 = vsel %vm4350_vm0, %v1657_v24, %v1658_v50  ;;  %v1276_v39 = vshrl.u32 %v4436_v60, 16  ;;  %v1282_v40 = vshll.u32 %v4446_v18, 16 }
  0xb6   : > { %v1251_v0 = vsel %vm4261_vm12, %v1246_v21, %v1250_v59  ;;  %v4470_v46 = vcombine.low %v1656_v22, %v1659_v38  ;;  %v1268_v47 = vrot.slane %v1266_v37, 5  ;;  %v1274_v48 = vrot.slane %v1272_v41, 5  ;;  %v4511_v38 = vld [vmem:[%s4218_s18 + $0x64] sm:$0xf] }
  0xb7   : > { %3487 = vmatmul.mubr.msk.bf16.vlgmr.msra.gmra.mrb[0].mxu0 %vm1326_vm13, %v4438_v63  ;;  %v1261_v43 = vsel %vm4261_vm12, %v1256_v31, %v1260_v14  ;;  %v1278_v52 = vrot.slane %v1276_v39, 4  ;;  %v1284_v1 = vrot.slane %v1282_v40, 5  ;;  %v3134_v57 = vrot.slane %v4305_v58, 9 }
  0xb8   : > { %3503 = vmatpush3.bf16.msra.mxu0 %v4368_v2  ;;  %v4473_v49 = vcombine.low %v1251_v0, %v1261_v43  ;;  %3490 = vmatprep.mubr.msk.bf16.mxu0 %vm1326_vm13, %v4470_v46  ;;  %v1269_v61 = vor.u32 %v1268_v47, %v1265_v32  ;;  %v1662_v59 = vrot.slane %v4313_v3, 5  ;;  %v1665_v6 = vrot.slane %v4318_v12, 5  ;;  %v4484_v2 = vld [vmem:[%s4848_s3 + $0x70] sm:$0xff]  }
  0xb9   : > { %v3135_v9 = vrot.slane %v4337_v33, 9  ;;  %3504 = vmatprep.subr.bf16.mxu0 %v3748_v26  ;;  %v1279_v14 = vor.u32 %v1278_v52, %v1274_v48  ;;  %v1669_v15 = vrot.slane %v4360_v45, 5  ;;  %v1672_v16 = vrot.slane %v4371_v62, 5 }
  0xba   : > { %3398 = vmatprep.mubr.msk.bf16.mxu1 %vm1326_vm13, %v4473_v49  ;;  %v3136_v29 = vrot.slane %v4380_v5, 9  ;;  %v1270_v17 = vrot.slane %v1269_v61, 4  ;;  %v1663_v12 = vsel %vm4350_vm0, %v3134_v57, %v1662_v59  ;;  %v1664_v50 = vrot.slane %v1662_v59, 4  ;;  %v4531_v57 = vld [vmem:[%s4218_s18 + $0x60] sm:$0xf] }
  0xbb   : > { %v1676_v19 = vrot.slane %v4401_v30, 5  ;;  %v1280_v21 = vrot.slane %v1279_v14, 4  ;;  %v1670_v22 = vsel %vm4350_vm0, %v3135_v9, %v1669_v15  ;;  %v1671_v24 = vrot.slane %v1669_v15, 4  ;;  %v4534_v61 = vld [vmem:[%s4218_s18 + $0x68] sm:$0x1] }
  0xbc   : > { %v1679_v31 = vrot.slane %v4404_v11, 5  ;;  %3505 = vmatpush3.bf16.msra.mxu0 %v3748_v26  ;;  %v1275_v62 = vsel %vm4261_vm12, %v1270_v17, %v1274_v48  ;;  %v1666_v32 = vsel %vm4350_vm0, %v1664_v50, %v1665_v6  ;;  %v3112_v11 = vcombine.low %v4221_v54, %v4224_v55 }
  0xbd   : > { %v1678_v37 = vrot.slane %v1676_v19, 4  ;;  %3522 = vmatprep.subr.bf16.mxu0 %v4484_v2  ;;  %v1285_v41 = vsel %vm4261_vm12, %v1280_v21, %v1284_v1  ;;  %v4504_v0 = vcombine.low %v1663_v12, %v1666_v32  ;;  %v1673_v26 = vsel %vm4350_vm0, %v1671_v24, %v1672_v16 }
  0xbe   : > { %v4513_v39 = vcombine.low %v1275_v62, %v1285_v41  ;;  %v4515_v40 = vcombine.low %v1670_v22, %v1673_v26  ;;  %v3137_v43 = vrot.slane %v4418_v42, 9  ;;  %v1677_v47 = vsel %vm4350_vm0, %v3136_v29, %v1676_v19 }
  0xbf   : > { %3491 = vmatmul.mubr.msk.bf16.gmra.mrb[4].mxu0 %vm1326_vm13, %v4504_v0  ;;  %v1680_v48 = vsel %vm4350_vm0, %v1678_v37, %v1679_v31  ;;  %v1683_v52 = vrot.slane %v4436_v60, 5  ;;  %v1686_v1 = vrot.slane %v4446_v18, 5  ;;  %v2164_v59 = vrot.slane %v4511_v38, 5  ;;  %v4569_v31 = vld [vmem:[%s4218_s18 + $0x70] sm:$0xf] }
  0xc0   : > { %3399 = vmatmul.mubr.msk.bf16.gmra.mrb[12].mxu1 %vm1326_vm13, %v4513_v39  ;;  %3494 = vmatprep.mubr.msk.bf16.mxu0 %vm1326_vm13, %v4515_v40  ;;  %v1637_v18 = vrot.slane %v4227_v56, 5  ;;  %v4543_v14 = vcombine.low %v4247_v8, %v4251_v10  ;;  %v4545_v15 = vcombine.low %v1677_v47, %v1680_v48  ;;  %v3130_v16 = vrot.slane %v4221_v54, 9  ;;  %v4554_v56 = vld [vmem:[%s4218_s18 + $0x6c] sm:$0xf]  ;;  %v3757_v48 = vld [vmem:[%s4848_s3 + $0x30] sm:$0xff]  }
  0xc1   : > { %3406 = vmatprep.mubr.msk.bf16.mxu1 %vm1326_vm13, %v3112_v11  ;;  %v1684_v6 = vsel %vm4350_vm0, %v3137_v43, %v1683_v52  ;;  %v1685_v9 = vrot.slane %v1683_v52, 4  ;;  %v3178_v17 = vrot.slane %v4531_v57, 9  ;;  %v2167_v12 = vrot.slane %v4534_v61, 5 }
  0xc2   : > { %v1634_v50 = vrot.slane %v4224_v55, 5  ;;  %v2166_v8 = vrot.slane %v2164_v59, 4  ;;  %v2442_v10 = vshrl.u32 %v4554_v56, 16  ;;  %v2445_v21 = vshll.u32 %v4554_v56, 16  ;;  %v3752_v55 = vld [vmem:[%s4848_s3 + $0x28] sm:$0xff]  }
  0xc3   : > { %v1687_v29 = vsel %vm4350_vm0, %v1685_v9, %v1686_v1  ;;  %v4562_v54 = vcombine.low %v4269_v25, %v4275_v28  ;;  %v2455_v62 = vshrl.u32 %v4569_v31, 16  ;;  %v1086_v28 = vld [vmem:[%s4218_s18 + $0x74] sm:$0x1]  ;;  %v2165_v41 = vsel %vm4350_vm0, %v3178_v17, %v2164_v59 }
  0xc4   : > { %v4556_v19 = vcombine.low %v1684_v6, %v1687_v29  ;;  %v4566_v22 = vsel %vm4350_vm0, %v3130_v16, %v1634_v50  ;;  %v1636_v24 = vrot.slane %v1634_v50, 4  ;;  %v2444_v32 = vrot.slane %v2442_v10, 4 }
  0xc5   : > { %v2447_v37 = vrot.slane %v2445_v21, 5  ;;  %v2168_v11 = vsel %vm4350_vm0, %v2166_v8, %v2167_v12  ;;  %v2451_v47 = vshll.u32 %v4569_v31, 16  ;;  %v2457_v52 = vrot.slane %v2455_v62, 4 }
  0xc6   : > { %v1638_v25 = vsel %vm4350_vm0, %v1636_v24, %v1637_v18  ;;  %v2461_v1 = vshll.u32 %v1086_v28, 16  ;;  %v3212_v59 = vrot.slane %v4554_v56, 9  ;;  %v4597_v6 = vcombine.low %v2165_v41, %v2168_v11 }
  0xc7   : > { %3495 = vmatmul.mubr.msk.bf16.gmra.mrb[8].mxu0 %vm1326_vm13, %v4545_v15  ;;  %v3138_v26 = vcombine.low %v4566_v22, %v1638_v25  ;;  %v2448_v43 = vor.u32 %v2447_v37, %v2444_v32  ;;  %v2453_v18 = vrot.slane %v2451_v47, 5  ;;  %v4602_v16 = vcombine.low %v4286_v35, %v4289_v36  ;;  %v3763_v32 = vld [vmem:[%s4848_s3 + $0x88] sm:$0xff]  }
  0xc8   : > { %3407 = vmatmul.mubr.msk.bf16.vlgmr.msra.gmra.mrb[0].mxu1 %vm1326_vm13, %v4543_v14  ;;  %3498 = vmatprep.mubr.msk.bf16.mxu0 %vm1326_vm13, %v4556_v19  ;;  %v4606_v29 = vcombine.low %v4305_v58, %v4313_v3  ;;  %v2606_v17 = vrot.slane %v1086_v28, 5  ;;  %v2463_v8 = vrot.slane %v2461_v1, 5  ;;  %v4634_v24 = vcombine.low %v4337_v33, %v4360_v45  ;;  %v3762_v33 = vld [vmem:[%s4848_s3 + $0x80] sm:$0xff]  }
  0xc9   : > { %3423 = vmatpush3.bf16.msra.mxu1 %v4342_v34  ;;  %3410 = vmatprep.mubr.msk.bf16.mxu1 %vm1326_vm13, %v4562_v54  ;;  %v2449_v9 = vrot.slane %v2448_v43, 4  ;;  %v2603_v34 = vrot.slane %v4569_v31, 5  ;;  %v2458_v50 = vor.u32 %v2457_v52, %v2453_v18  ;;  %v4638_v44 = vcombine.low %v4380_v5, %v4401_v30  ;;  %v3761_v30 = vld [vmem:[%s4848_s3 + $0x38] sm:$0xff]  }
  0xca   : > { %3424 = vmatprep.subr.bf16.mxu1 %v3752_v55  ;;  %v4657_v45 = vcombine.low %v4418_v42, %v4436_v60  ;;  %v3156_v5 = vcombine.low %v4531_v57, %v4511_v38  ;;  %v3190_v42 = vcombine.low %v4554_v56, %v4569_v31  ;;  %v2006_v60 = vshll.u32 %v4531_v57, 16 }
  0xcb   : > { %v2454_v12 = vsel %vm4261_vm12, %v2449_v9, %v2453_v18  ;;  %v4612_v10 = vsel %vm4350_vm0, %v3212_v59, %v2603_v34  ;;  %v2605_v21 = vrot.slane %v2603_v34, 4  ;;  %v2459_v35 = vrot.slane %v2458_v50, 4 }
  0xcc   : > { %v2016_v56 = vshrl.u32 %v4511_v38, 16  ;;  %v2008_v62 = vrot.slane %v2006_v60, 5 }
  0xcd   : > { %3425 = vmatpush3.bf16.msra.mxu1 %v3752_v55  ;;  %v4622_v36 = vsel %vm4350_vm0, %v2605_v21, %v2606_v17  ;;  %v2464_v58 = vsel %vm4261_vm12, %v2459_v35, %v2463_v8  ;;  %v3758_v55 = vld [vmem:[%s4848_s3 + $0x78] sm:$0xff]  }
  0xce   : > { %3442 = vmatprep.subr.bf16.mxu1 %v3757_v48  ;;  %v3213_v3 = vcombine.low %v4612_v10, %v4622_v36  ;;  %v4630_v22 = vcombine.low %v2454_v12, %v2464_v58  ;;  %v2018_v28 = vrot.slane %v2016_v56, 4 }
  0xcf   : > { %3499 = vmatmul.mubr.msk.bf16.gmra.mrb[12].mxu0 %vm1326_vm13, %v4597_v6 }
  0xd0   : > { %3411 = vmatmul.mubr.msk.bf16.gmra.mrb[4].mxu1 %vm1326_vm13, %v4602_v16  ;;  %3506 = vmatprep.mubr.msk.bf16.mxu0 %vm1326_vm13, %v4562_v54 }
  0xd1   : > { %3414 = vmatprep.mubr.msk.bf16.mxu1 %vm1326_vm13, %v4606_v29 }
  0xd7   : > { %3507 = vmatmul.mubr.msk.bf16.vlgmr.msra.gmra.mrb[0].mxu0 %vm1326_vm13, %v4602_v16 }
  0xd8   : > { %3415 = vmatmul.mubr.msk.bf16.gmra.mrb[8].mxu1 %vm1326_vm13, %v4634_v24  ;;  %3523 = vmatpush3.bf16.msra.mxu0 %v4484_v2  ;;  %v2012_v2 = vshll.u32 %v4511_v38, 16 }
  0xd9   : > { %3418 = vmatprep.mubr.msk.bf16.mxu1 %vm1326_vm13, %v4638_v44  ;;  %3510 = vmatprep.mubr.msk.bf16.mxu0 %vm1326_vm13, %v4606_v29 }
  0xda   : > { %3524 = vmatprep.subr.bf16.mxu0 %v3758_v55  ;;  %v2014_v25 = vrot.slane %v2012_v2, 5 }
  0xdc   : > { %3525 = vmatpush3.bf16.msra.mxu0 %v3758_v55  ;;  %v2019_v38 = vor.u32 %v2018_v28, %v2014_v25 }
  0xdd   : > { %3542 = vmatprep.subr.bf16.mxu0 %v3762_v33 }
  0xde   : > { %v2020_v41 = vrot.slane %v2019_v38, 4 }
  0xdf   : > { %3511 = vmatmul.mubr.msk.bf16.gmra.mrb[4].mxu0 %vm1326_vm13, %v4634_v24 }
  0xe0   : > { %3419 = vmatmul.mubr.msk.bf16.gmra.mrb[12].mxu1 %vm1326_vm13, %v4657_v45  ;;  %3514 = vmatprep.mubr.msk.bf16.mxu0 %vm1326_vm13, %v4638_v44 }
  0xe1   : > { %3426 = vmatprep.mubr.msk.bf16.mxu1 %vm1326_vm13, %v3138_v26 }
  0xe7   : > { %3515 = vmatmul.mubr.msk.bf16.gmra.mrb[8].mxu0 %vm1326_vm13, %v4657_v45 }
  0xe8   : > { %3427 = vmatmul.mubr.msk.bf16.vlgmr.msra.gmra.mrb[0].mxu1 %vm1326_vm13, %v4398_v23  ;;  %3518 = vmatprep.mubr.msk.bf16.mxu0 %vm1326_vm13, %v3156_v5  ;;  %v2003_v23 = vshrl.u32 %v4531_v57, 16  ;;  %v2022_v57 = vshll.u32 %v4534_v61, 16 }
  0xe9   : > { %3443 = vmatpush3.bf16.msra.mxu1 %v3757_v48  ;;  %3430 = vmatprep.mubr.msk.bf16.mxu1 %vm1326_vm13, %v4438_v63 }
  0xea   : > { %3444 = vmatprep.subr.bf16.mxu1 %v3761_v30  ;;  %v2005_v31 = vrot.slane %v2003_v23, 4  ;;  %v2024_v11 = vrot.slane %v2022_v57, 5 }
  0xed   : > { %3445 = vmatpush3.bf16.msra.mxu1 %v3761_v30 }
  0xee   : > { %3562 = vmatprep.subr.bf16.mxu1 %v4206_v53 }
  0xef   : > { %3519 = vmatmul.mubr.msk.bf16.gmra.mrb[12].mxu0 %vm1326_vm13, %v3190_v42 }
  0xf0   : > { %3431 = vmatmul.mubr.msk.bf16.gmra.mrb[4].mxu1 %vm1326_vm13, %v4470_v46  ;;  %3526 = vmatprep.mubr.msk.bf16.mxu0 %vm1326_vm13, %v4330_v27  ;;  %v2009_v27 = vor.u32 %v2008_v62, %v2005_v31 }
  0xf1   : > { %3434 = vmatprep.mubr.msk.bf16.mxu1 %vm1326_vm13, %v4504_v0 }
  0xf2   : > { %v2010_v37 = vrot.slane %v2009_v27, 4 }
  0xf7   : > { %3527 = vmatmul.mubr.msk.bf16.vlgmr.msra.gmra.mrb[0].mxu0 %vm1326_vm13, %v4375_v4  ;;  %v2015_v4 = vsel %vm4261_vm12, %v2010_v37, %v2014_v25 }
  0xf8   : > { %3435 = vmatmul.mubr.msk.bf16.gmra.mrb[8].mxu1 %vm1326_vm13, %v4515_v40  ;;  %3543 = vmatpush3.bf16.msra.mxu0 %v3762_v33 }
  0xf9   : > { %3438 = vmatprep.mubr.msk.bf16.mxu1 %vm1326_vm13, %v4545_v15  ;;  %3530 = vmatprep.mubr.msk.bf16.mxu0 %vm1326_vm13, %v4406_v7  ;;  %v2025_v7 = vsel %vm4261_vm12, %v2020_v41, %v2024_v11 }
  0xfa   : > { %3544 = vmatprep.subr.bf16.mxu0 %v3763_v32  ;;  %v3167_v61 = vcombine.low %v2015_v4, %v2025_v7 }
  0xfc   : > { %3545 = vmatpush3.bf16.msra.mxu0 %v3763_v32 }
  0xff   : > { %3531 = vmatmul.mubr.msk.bf16.gmra.mrb[4].mxu0 %vm1326_vm13, %v4449_v20 }
 0x100   : > { %3439 = vmatmul.mubr.msk.bf16.gmra.mrb[12].mxu1 %vm1326_vm13, %v4556_v19  ;;  %3534 = vmatprep.mubr.msk.bf16.mxu0 %vm1326_vm13, %v4473_v49 }
 0x101   : > { %3446 = vmatprep.mubr.msk.bf16.mxu1 %vm1326_vm13, %v4543_v14 }
 0x107   : > { %3535 = vmatmul.mubr.msk.bf16.gmra.mrb[8].mxu0 %vm1326_vm13, %v4513_v39 }
 0x108   : > { %3447 = vmatmul.mubr.msk.bf16.vlgmr.msra.gmra.mrb[0].mxu1 %vm1326_vm13, %v4562_v54  ;;  %3538 = vmatprep.mubr.msk.bf16.mxu0 %vm1326_vm13, %v3167_v61 }
 0x109   : > { %3564 = vmatpush3.bf16.msra.mxu1 %v4206_v53  ;;  %3450 = vmatprep.mubr.msk.bf16.mxu1 %vm1326_vm13, %v4602_v16 }
 0x10a   : > { %3563 = vmatprep.subr.bf16.mxu1 %v4215_v51 }
 0x10d   : > { %3565 = vmatpush3.bf16.msra.mxu1 %v4215_v51 }
 0x10f   : > { %3539 = vmatmul.mubr.msk.bf16.gmra.mrb[12].mxu0 %vm1326_vm13, %v4630_v22 }
 0x110   : > { %3451 = vmatmul.mubr.msk.bf16.gmra.mrb[4].mxu1 %vm1326_vm13, %v4606_v29  ;;  %3546 = vmatprep.mubr.msk.bf16.mxu0 %vm1326_vm13, %v4438_v63 }
 0x111   : > { %3454 = vmatprep.mubr.msk.bf16.mxu1 %vm1326_vm13, %v4634_v24 }
 0x117   : > { %3547 = vmatmul.mubr.msk.bf16.vlgmr.msra.gmra.mrb[0].mxu0 %vm1326_vm13, %v4470_v46 }
 0x118   : > { %3455 = vmatmul.mubr.msk.bf16.gmra.mrb[8].mxu1 %vm1326_vm13, %v4638_v44  ;;  %3550 = vmatprep.mubr.msk.bf16.mxu0 %vm1326_vm13, %v4504_v0 }
 0x119   : > { %3458 = vmatprep.mubr.msk.bf16.mxu1 %vm1326_vm13, %v4657_v45 }
 0x11f   : > { %3551 = vmatmul.mubr.msk.bf16.gmra.mrb[4].mxu0 %vm1326_vm13, %v4515_v40 }
 0x120   : > { %3459 = vmatmul.mubr.msk.bf16.gmra.mrb[12].mxu1 %vm1326_vm13, %v3156_v5  ;;  %3554 = vmatprep.mubr.msk.bf16.mxu0 %vm1326_vm13, %v4545_v15 }
 0x121   : > { %3474 = vmatprep.mubr.msk.bf16.mxu1 %vm1326_vm13, %v4449_v20 }
 0x127   : > { %3555 = vmatmul.mubr.msk.bf16.gmra.mrb[8].mxu0 %vm1326_vm13, %v4556_v19 }
 0x128   : > { %3475 = vmatmul.mubr.msk.bf16.vlgmr.msra.gmra.mrb[8].mxu1 %vm1326_vm13, %v4473_v49  ;;  %3558 = vmatprep.mubr.msk.bf16.mxu0 %vm1326_vm13, %v4597_v6 }
 0x129   : > { %3478 = vmatprep.mubr.msk.bf16.mxu1 %vm1326_vm13, %v4513_v39 }
 0x12f   : > { %3559 = vmatmul.mubr.msk.bf16.gmra.mrb[12].mxu0 %vm1326_vm13, %v3213_v3 }
 0x130   : > { %3479 = vmatmul.mubr.msk.bf16.gmra.mrb[12].mxu1 %vm1326_vm13, %v3167_v61 }
 0x1db   : > { %v3448_v53 = vpop.f32.mrb[0].mxu1 }
 0x1dc   : > { %v1923_v51 = vpop.f32.mrb[1].mxu1 }
 0x1dd   : > { %v3449_v13 = vpop.f32.mrb[2].mxu1 }
 0x1de   : > { %v1926_v63 = vpop.f32.mrb[3].mxu1 }
 0x1e3   : > { %v3452_v20 = vpop.f32.mrb[4].mxu1 }
 0x1e4   : > { %v1939_v46 = vpop.f32.mrb[5].mxu1 }
 0x1e5   : > { %v3453_v49 = vpop.f32.mrb[6].mxu1 }
 0x1e6   : > { %v1942_v0 = vpop.f32.mrb[7].mxu1 }
 0x1ea   : > { %v3548_v40 = vpop.f32.mrb[0].mxu0 }
 0x1eb   : > { %v3566_v14 = vadd.f32 %v3548_v40, %v3448_v53  ;;  %v2664_v39 = vpop.f32.mrb[1].mxu0 }
 0x1ec   : > { %v3567_v15 = vadd.f32 %v2664_v39, %v1923_v51  ;;  %v3549_v19 = vpop.f32.mrb[2].mxu0 }
 0x1ed   : > { %v3278_v54 = vpack.c.bf16 %v3566_v14, %v3566_v14  ;;  %v3568_v26 = vadd.f32 %v3549_v19, %v3449_v13  ;;  %v2667_v43 = vpop.f32.mrb[3].mxu0  ;;  %v2787_v1 = vmul.f32 %v3566_v14, %v3566_v14  ;;  %v2747_v17 = vsel %vm1326_vm13, %v3566_v14, 0.0 }
 0x1ee   : > { %v2785_v47 = vmul.f32 %v3567_v15, %v3567_v15  ;;  %v3276_v48 = vpack.c.bf16 %v3567_v15, %v3567_v15  ;;  %v3569_v52 = vadd.f32 %v2667_v43, %v1926_v63  ;;  %v2744_v6 = vsel %vm1326_vm13, %v3567_v15, 0.0 }
 0x1ef   : > { %2907 = vst.msk [vmem:[%s3882_s15 + $0x8] sm:$0xf] %vm2904_vm1, %v3278_v54  ;;  %v3279_v59 = vpack.c.bf16 %v3568_v26, %v3568_v26  ;;  %v2788_v16 = vmul.f32 %v3568_v26, %v3568_v26  ;;  %v2804_v58 = vsel %vm1326_vm13, %v2787_v1, 0.0  ;;  %v2749_v24 = vsel %vm1326_vm13, %v3568_v26, 0.0 }
 0x1f0   : > { %2905 = vst.msk [vmem:[%s3882_s15] sm:$0xf] %vm2904_vm1, %v3276_v48  ;;  %v2745_v9 = vsel %vm1326_vm13, %v3569_v52, 0.0  ;;  %v2786_v18 = vmul.f32 %v3569_v52, %v3569_v52  ;;  %v3277_v34 = vpack.c.bf16 %v3569_v52, %v3569_v52  ;;  %v2801_v12 = vsel %vm1326_vm13, %v2785_v47, 0.0 }
 0x1f1   : > { %2908 = vst.msk [vmem:[%s3882_s15 + $0xc] sm:$0xf] %vm2904_vm1, %v3279_v59  ;;  %v2746_v29 = vadd.f32 %v2745_v9, %v2744_v6  ;;  %v2806_v44 = vsel %vm1326_vm13, %v2788_v16, 0.0 }
 0x1f2   : > { %v2802_v50 = vsel %vm1326_vm13, %v2786_v18, 0.0  ;;  %2906 = vst.msk [vmem:[%s3882_s15 + $0x4] sm:$0xf] %vm2904_vm1, %v3277_v34  ;;  %v3552_v8 = vpop.f32.mrb[4].mxu0 }
 0x1f3   : > { %v2748_v10 = vadd.f32 %v2747_v17, %v2746_v29  ;;  %v2803_v21 = vadd.f32 %v2802_v50, %v2801_v12  ;;  %v3570_v35 = vadd.f32 %v3552_v8, %v3452_v20  ;;  %v2680_v36 = vpop.f32.mrb[5].mxu0 }
 0x1f4   : > { %v3571_v3 = vadd.f32 %v2680_v36, %v1939_v46  ;;  %v3553_v22 = vpop.f32.mrb[6].mxu0 }
 0x1f5   : > { %v2805_v55 = vadd.f32 %v2804_v58, %v2803_v21  ;;  %v3282_v33 = vpack.c.bf16 %v3570_v35, %v3570_v35  ;;  %v2683_v45 = vpop.f32.mrb[7].mxu0  ;;  %v2750_v5 = vadd.f32 %v2749_v24, %v2748_v10  ;;  %v3572_v2 = vadd.f32 %v3553_v22, %v3453_v49 }
 0x1f6   : > { %v2751_v30 = vsel %vm1326_vm13, %v3571_v3, 0.0  ;;  %v2789_v42 = vmul.f32 %v3571_v3, %v3571_v3  ;;  %v3280_v23 = vpack.c.bf16 %v3571_v3, %v3571_v3  ;;  %v3573_v56 = vadd.f32 %v2683_v45, %v1942_v0 }
 0x1f7   : > { %2911 = vst.msk [vmem:[%s3882_s15 + $0x18] sm:$0xf] %vm2904_vm1, %v3282_v33  ;;  %v2807_v60 = vadd.f32 %v2806_v44, %v2805_v55  ;;  %v2752_v31 = vadd.f32 %v2751_v30, %v2750_v5  ;;  %v3283_v28 = vpack.c.bf16 %v3572_v2, %v3572_v2  ;;  %v2791_v32 = vmul.f32 %v3570_v35, %v3570_v35 }
 0x1f8   : > { %v2808_v62 = vsel %vm1326_vm13, %v2789_v42, 0.0  ;;  %2909 = vst.msk [vmem:[%s3882_s15 + $0x10] sm:$0xf] %vm2904_vm1, %v3280_v23  ;;  %v2753_v27 = vsel %vm1326_vm13, %v3573_v56, 0.0  ;;  %v2790_v38 = vmul.f32 %v3573_v56, %v3573_v56  ;;  %v3281_v57 = vpack.c.bf16 %v3573_v56, %v3573_v56 }
 0x1f9   : > { %v2809_v25 = vadd.f32 %v2808_v62, %v2807_v60  ;;  %2912 = vst.msk [vmem:[%s3882_s15 + $0x1c] sm:$0xf] %vm2904_vm1, %v3283_v28  ;;  %v2754_v41 = vadd.f32 %v2753_v27, %v2752_v31  ;;  %v2755_v7 = vsel %vm1326_vm13, %v3570_v35, 0.0  ;;  %v2792_v61 = vmul.f32 %v3572_v2, %v3572_v2 }
 0x1fa   : > { %v3556_v37 = vpop.f32.mrb[8].mxu0  ;;  %v2810_v53 = vsel %vm1326_vm13, %v2790_v38, 0.0  ;;  %2910 = vst.msk [vmem:[%s3882_s15 + $0x14] sm:$0xf] %vm2904_vm1, %v3281_v57  ;;  %v2812_v14 = vsel %vm1326_vm13, %v2791_v32, 0.0  ;;  %v2757_v39 = vsel %vm1326_vm13, %v3572_v2, 0.0 }
 0x1fb   : > { %v3476_v11 = vpop.f32.mrb[8].mxu1  ;;  %v2696_v4 = vpop.f32.mrb[9].mxu0  ;;  %v2756_v20 = vadd.f32 %v2755_v7, %v2754_v41  ;;  %v2811_v46 = vadd.f32 %v2810_v53, %v2809_v25  ;;  %v2814_v52 = vsel %vm1326_vm13, %v2792_v61, 0.0 }
 0x1fc   : > { %v3574_v51 = vadd.f32 %v3556_v37, %v3476_v11  ;;  %v2114_v13 = vpop.f32.mrb[9].mxu1  ;;  %v3557_v63 = vpop.f32.mrb[10].mxu0 }
 0x1fd   : > { %v3575_v49 = vadd.f32 %v2696_v4, %v2114_v13  ;;  %v3477_v0 = vpop.f32.mrb[10].mxu1  ;;  %v2699_v40 = vpop.f32.mrb[11].mxu0  ;;  %v2813_v26 = vadd.f32 %v2812_v14, %v2811_v46  ;;  %v2758_v43 = vadd.f32 %v2757_v39, %v2756_v20 }
 0x1fe   : > { %v3286_v15 = vpack.c.bf16 %v3574_v51, %v3574_v51  ;;  %v3576_v19 = vadd.f32 %v3557_v63, %v3477_v0  ;;  %v2117_v54 = vpop.f32.mrb[11].mxu1  ;;  %v2795_v34 = vmul.f32 %v3574_v51, %v3574_v51  ;;  %v2763_v3 = vsel %vm1326_vm13, %v3574_v51, 0.0 }
 0x1ff   : > { %v2759_v47 = vsel %vm1326_vm13, %v3575_v49, 0.0  ;;  %v2793_v48 = vmul.f32 %v3575_v49, %v3575_v49  ;;  %v3284_v1 = vpack.c.bf16 %v3575_v49, %v3575_v49  ;;  %v2815_v6 = vadd.f32 %v2814_v52, %v2813_v26 }
 0x200   : > { %2915 = vst.msk [vmem:[%s3882_s15 + $0x28] sm:$0xf] %vm2904_vm1, %v3286_v15  ;;  %v2760_v59 = vadd.f32 %v2759_v47, %v2758_v43  ;;  %v3287_v18 = vpack.c.bf16 %v3576_v19, %v3576_v19  ;;  %v3577_v16 = vadd.f32 %v2699_v40, %v2117_v54  ;;  %v2820_v33 = vsel %vm1326_vm13, %v2795_v34, 0.0 }
 0x201   : > { %v2816_v9 = vsel %vm1326_vm13, %v2793_v48, 0.0  ;;  %2913 = vst.msk [vmem:[%s3882_s15 + $0x20] sm:$0xf] %vm2904_vm1, %v3284_v1  ;;  %v2796_v45 = vmul.f32 %v3576_v19, %v3576_v19  ;;  %v2765_v23 = vsel %vm1326_vm13, %v3576_v19, 0.0 }
 0x202   : > { %v3560_v29 = vpop.f32.mrb[12].mxu0  ;;  %v2817_v17 = vadd.f32 %v2816_v9, %v2815_v6  ;;  %2916 = vst.msk [vmem:[%s3882_s15 + $0x2c] sm:$0xf] %vm2904_vm1, %v3287_v18  ;;  %v2761_v8 = vsel %vm1326_vm13, %v3577_v16, 0.0  ;;  %v2794_v10 = vmul.f32 %v3577_v16, %v3577_v16  ;;  %v3285_v21 = vpack.c.bf16 %v3577_v16, %v3577_v16  ;;  %v2743_v18 = vld [vmem:[%s3877_s12] sm:$0x1] }
 0x203   : > { %v3480_v12 = vpop.f32.mrb[12].mxu1  ;;  %v2712_v50 = vpop.f32.mrb[13].mxu0  ;;  %v2762_v22 = vadd.f32 %v2761_v8, %v2760_v59  ;;  %v2822_v38 = vsel %vm1326_vm13, %v2796_v45, 0.0 }
 0x204   : > { %v3578_v35 = vadd.f32 %v3560_v29, %v3480_v12  ;;  %v2130_v36 = vpop.f32.mrb[13].mxu1  ;;  %v3561_v58 = vpop.f32.mrb[14].mxu0  ;;  %v2818_v5 = vsel %vm1326_vm13, %v2794_v10, 0.0  ;;  %2914 = vst.msk [vmem:[%s3882_s15 + $0x24] sm:$0xf] %vm2904_vm1, %v3285_v21 }
 0x205   : > { %v3579_v24 = vadd.f32 %v2712_v50, %v2130_v36  ;;  %v3481_v44 = vpop.f32.mrb[14].mxu1  ;;  %v2715_v55 = vpop.f32.mrb[15].mxu0  ;;  %v2764_v60 = vadd.f32 %v2763_v3, %v2762_v22  ;;  %v2819_v2 = vadd.f32 %v2818_v5, %v2817_v17  ;;  %v2784_v29 = vld [vmem:[%s3877_s12 + $0x1] sm:$0x1] }
 0x206   : > { %v3290_v30 = vpack.c.bf16 %v3578_v35, %v3578_v35  ;;  %v2133_v42 = vpop.f32.mrb[15].mxu1  ;;  %v3580_v25 = vadd.f32 %v3561_v58, %v3481_v44  ;;  %v2799_v53 = vmul.f32 %v3578_v35, %v3578_v35  ;;  %v2771_v20 = vsel %vm1326_vm13, %v3578_v35, 0.0 }
 0x207   : > { %v2797_v56 = vmul.f32 %v3579_v24, %v3579_v24  ;;  %v2767_v31 = vsel %vm1326_vm13, %v3579_v24, 0.0  ;;  %v3288_v62 = vpack.c.bf16 %v3579_v24, %v3579_v24  ;;  %v3581_v28 = vadd.f32 %v2715_v55, %v2133_v42 }
 0x208   : > { %2919 = vst.msk [vmem:[%s3882_s15 + $0x38] sm:$0xf] %vm2904_vm1, %v3290_v30  ;;  %v2821_v32 = vadd.f32 %v2820_v33, %v2819_v2  ;;  %v2766_v27 = vadd.f32 %v2765_v23, %v2764_v60  ;;  %v3291_v37 = vpack.c.bf16 %v3580_v25, %v3580_v25  ;;  %v2800_v46 = vmul.f32 %v3580_v25, %v3580_v25 }
 0x209   : > { %v2824_v57 = vsel %vm1326_vm13, %v2797_v56, 0.0  ;;  %2917 = vst.msk [vmem:[%s3882_s15 + $0x30] sm:$0xf] %vm2904_vm1, %v3288_v62  ;;  %v2769_v41 = vsel %vm1326_vm13, %v3581_v28, 0.0  ;;  %v2798_v7 = vmul.f32 %v3581_v28, %v3581_v28  ;;  %v3289_v61 = vpack.c.bf16 %v3581_v28, %v3581_v28 }
 0x20a   : > { %v2768_v11 = vadd.f32 %v2767_v31, %v2766_v27  ;;  %v2823_v4 = vadd.f32 %v2822_v38, %v2821_v32  ;;  %2920 = vst.msk [vmem:[%s3882_s15 + $0x3c] sm:$0xf] %vm2904_vm1, %v3291_v37  ;;  %v2828_v40 = vsel %vm1326_vm13, %v2799_v53, 0.0  ;;  %v2773_v14 = vsel %vm1326_vm13, %v3580_v25, 0.0 }
 0x20b   : > { %v2826_v63 = vsel %vm1326_vm13, %v2798_v7, 0.0  ;;  %2918 = vst.msk [vmem:[%s3882_s15 + $0x34] sm:$0xf] %vm2904_vm1, %v3289_v61  ;;  %v2830_v19 = vsel %vm1326_vm13, %v2800_v46, 0.0 }
 0x20c   : > { %v2825_v51 = vadd.f32 %v2824_v57, %v2823_v4  ;;  %v2770_v13 = vadd.f32 %v2769_v41, %v2768_v11 }
 0x20e   : > { %v2772_v49 = vadd.f32 %v2771_v20, %v2770_v13  ;;  %v2827_v0 = vadd.f32 %v2826_v63, %v2825_v51 }
 0x210   : > { %v2774_v39 = vadd.f32 %v2773_v14, %v2772_v49  ;;  %v2829_v15 = vadd.f32 %v2828_v40, %v2827_v0 }
 0x212   : > { %v2775_v54 = vrot.slane %v2774_v39, 4  ;;  %v2831_v26 = vadd.f32 %v2830_v19, %v2829_v15 }
 0x214   : > { %v2776_v43 = vadd.f32 %v2775_v54, %v2774_v39  ;;  %v2832_v47 = vrot.slane %v2831_v26, 4 }
 0x216   : > { %v2777_v48 = vrot.slane %v2776_v43, 2  ;;  %v2833_v52 = vadd.f32 %v2832_v47, %v2831_v26 }
 0x218   : > { %v2778_v1 = vadd.f32 %v2777_v48, %v2776_v43  ;;  %v2834_v59 = vrot.slane %v2833_v52, 2 }
 0x21a   : > { %v2779_v6 = vrot.slane %v2778_v1, 1  ;;  %v2835_v9 = vadd.f32 %v2834_v59, %v2833_v52 }
 0x21c   : > { %v2780_v34 = vadd.f32 %v2779_v6, %v2778_v1  ;;  %v2836_v16 = vrot.slane %v2835_v9, 1 }
 0x21e   : > { %v2781_v17 = vadd.f32 %v2780_v34, %v2743_v18  ;;  %v2837_v12 = vadd.f32 %v2836_v16, %v2835_v9 }
 0x220   : > { %2783 = vst.msk [vmem:[%s3877_s12] sm:$0x1] %vm2782_vm2, %v2781_v17  ;;  %v2838_v50 = vadd.f32 %v2837_v12, %v2784_v29 }
 0x222   : > { %2839 = vst.msk [vmem:[%s3877_s12 + $0x1] sm:$0x1] %vm2782_vm2, %v2838_v50 }
 0x223 PF: > { %s16_s22 = sadd.s32 1, %s3802_s22   ;;  %s4863_s18 = smov %s3794_s20 }
 0x224   : > { %p13_p8 = scmp.ge.s32.totalorder %s16_s22, 6   ;;  %s4864_s19 = smov %s3798_s21 }
 0x225   : > { %s4865_s20 = smov %s4868_s23  ;;  %s4866_s21 = smov %s4872_s24 }
 0x226   :  { %15 = sbr.rel (!%p13_p8) target bundleno = 3 (0x3), region = 85 }

</bundles_post_ra>
